<compile_context>
chip_gen: v7x
topology: tpu7x:2x2x1
jax: 0.10.0
libtpu: 0.0.40
codegen_flags: <defaults>
</compile_context>

<pallas_src>
import functools

import jax
import jax.numpy as jnp
from jax import lax
from jax.experimental import pallas as pl
from jax.experimental.pallas import tpu as pltpu

NEG_SLOPE = 0.01          # PyTorch nn.LeakyReLU default negative_slope
CH = 12                   # self.channel
HID = 32                  # self.hidden_size
CH_P = 16                 # input channels padded 12 -> 16 (alignment)
CTOT = CH_P + 4 * HID     # 144 channels in the (padded) dense concat
K_TOT = 9 * CTOT          # 1296 rows of the im2col patch scratch


# --------------------------- fused Pallas kernel ----------------------------

def _rdb_fused_kernel(x_ref,
                      w1_ref, b1_ref, w2_ref, b2_ref, w3_ref, b3_ref,
                      w4_ref, b4_ref, w5_ref, b5_ref,
                      o_ref, patch_ref, *, H, W):
    """Whole dense block for one image (channels-first, spatially flattened).

    x_ref    : (1, CH_P, H*W)  bf16   input; channels 12..15 are zero
    w*_ref   : (Cout, 9*cin_p) bf16   transposed im2col weights (_prep_weight)
    b*_ref   : (Cout, 1)       f32    bias
    o_ref    : (1, CH, H*W)    f32    x5 output, NCHW-flat
    patch_ref: (9*CTOT, H*W)   bf16   persistent incremental im2col scratch
    """
    HW = H * W

    # ---- per-tap destination-validity masks (computed once, reused 5x) ------
    pos = lax.broadcasted_iota(jnp.int32, (1, HW), 1)
    col = pos % W
    row_ok_top = pos >= W                  # y >= 1      (needed when dy == 0)
    row_ok_bot = pos < (H - 1) * W         # y <= H - 2  (needed when dy == 2)
    col_ok_lft = col >= 1                  # x >= 1      (needed when dx == 0)
    col_ok_rgt = col <= W - 2              # x <= W - 2  (needed when dx == 2)

    taps = []                              # (flat offset, validity mask | None)
    for dy in range(3):
        for dx in range(3):
            conds = []
            if dy == 0:
                conds.append(row_ok_top)
            elif dy == 2:
                conds.append(row_ok_bot)
            if dx == 0:
                conds.append(col_ok_lft)
            elif dx == 2:
                conds.append(col_ok_rgt)
            valid = None
            for c in conds:
                valid = c if valid is None else jnp.logical_and(valid, c)
            taps.append(((dy - 1) * W + (dx - 1), valid))

    def scatter_taps(slab, base):
        """Write the 9 shifted/masked taps of `slab` ((cg, HW) bf16) into patch
        rows [base + t*cg, base + (t+1)*cg) for taps t = 0..8 (dy-major)."""
        cg = slab.shape[0]
        zeros = jnp.zeros((cg, HW), slab.dtype)
        zpad = jnp.zeros((cg, W + 1), slab.dtype)
        # Zero-padded flat layout: every tap becomes one static lane slice.
        slab_pad = jnp.concatenate([zpad, slab, zpad], axis=1)
        for t, (off, valid) in enumerate(taps):
            if off == 0:
                shifted = slab
            else:
                start = (W + 1) + off
                shifted = slab_pad[:, start:start + HW]
            tap = shifted if valid is None else jnp.where(valid, shifted, zeros)
            patch_ref[base + t * cg: base + (t + 1) * cg, :] = tap

    # ---- group 0: input taps (rows 0 .. 9*CH_P-1) ----------------------------
    scatter_taps(x_ref[0], 0)

    def conv_stage(w_ref, b_ref, k, apply_lrelu):
        # One MXU matmul against the live row-prefix of the patch scratch.
        acc = jnp.dot(w_ref[...], patch_ref[0:k, :],
                      preferred_element_type=jnp.float32)       # (Cout, HW) f32
        acc = acc + b_ref[...]
        if apply_lrelu:
            acc = jnp.where(acc >= 0.0, acc, acc * NEG_SLOPE)
        return acc

    w_refs = (w1_ref, w2_ref, w3_ref, w4_ref)
    b_refs = (b1_ref, b2_ref, b3_ref, b4_ref)

    k = 9 * CH_P                            # number of live patch rows so far
    for i in range(4):
        acc = conv_stage(w_refs[i], b_refs[i], k, apply_lrelu=True)
        # Dense concat == append this stage's taps at row offset k (cast once).
        scatter_taps(acc.astype(jnp.bfloat16), k)
        k += 9 * HID

    acc5 = conv_stage(w5_ref, b5_ref, k, apply_lrelu=False)     # (CH, HW) f32
    o_ref[0] = acc5.astype(o_ref.dtype)


# ------------------------------ wrapper glue --------------------------------

def _prep_weight(w_hwio):
    """HWIO (3,3,cin,cout) conv weight -> (cout, K) bf16 whose K rows match the
    kernel's patch-row layout: [group 0: input padded 12->16][group g: x_g (32)]
    ... each group ordered tap-major ((dy, dx) outer, channel inner)."""
    kh, kw, cin, cout = w_hwio.shape
    groups = [jnp.concatenate(
        [w_hwio[:, :, :CH, :],
         jnp.zeros((kh, kw, CH_P - CH, cout), w_hwio.dtype)], axis=2)]
    c = CH
    while c < cin:
        groups.append(w_hwio[:, :, c:c + HID, :])
        c += HID
    cols = [jnp.transpose(g, (3, 0, 1, 2)).reshape(cout, kh * kw * g.shape[2])
            for g in groups]
    return jnp.concatenate(cols, axis=1).astype(jnp.bfloat16)


def _prep_bias(b):
    return b.reshape(-1, 1).astype(jnp.float32)


@jax.jit
def residual_dense_block_out(x_nchw, params):
    """Pallas forward of ResidualDenseBlock_out.  NCHW in -> NCHW x5 out."""
    N, C, H, W = x_nchw.shape
    assert C == CH
    HW = H * W          # perf assumption: H*W a multiple of 128 (true at 16x16)

    # NCHW -> NCHW-flat; pad channels 12->16 with zeros; bf16 MXU operand.
    # (pure reshape + one tiny pad/cast; no transposes anywhere in the wrapper)
    x = x_nchw.reshape(N, CH, HW)
    x = jnp.concatenate([x, jnp.zeros((N, CH_P - CH, HW), x.dtype)], axis=1)
    x = x.astype(jnp.bfloat16)

    w1 = _prep_weight(params["w1"]); b1 = _prep_bias(params["b1"])
    w2 = _prep_weight(params["w2"]); b2 = _prep_bias(params["b2"])
    w3 = _prep_weight(params["w3"]); b3 = _prep_bias(params["b3"])
    w4 = _prep_weight(params["w4"]); b4 = _prep_bias(params["b4"])
    w5 = _prep_weight(params["w5"]); b5 = _prep_bias(params["b5"])

    kernel = functools.partial(_rdb_fused_kernel, H=H, W=W)

    def full(shape):
        return pl.BlockSpec(shape, lambda n: (0, 0))

    out = pl.pallas_call(
        kernel,
        out_shape=jax.ShapeDtypeStruct((N, CH, HW), jnp.float32),
        grid_spec=pltpu.PrefetchScalarGridSpec(
            num_scalar_prefetch=0,
            grid=(N,),
            in_specs=[
                pl.BlockSpec((1, CH_P, HW), lambda n: (n, 0, 0)),           # x
                full((HID, 9 * CH_P)),             full((HID, 1)),          # conv1
                full((HID, 9 * (CH_P + HID))),     full((HID, 1)),          # conv2
                full((HID, 9 * (CH_P + 2 * HID))), full((HID, 1)),          # conv3
                full((HID, 9 * (CH_P + 3 * HID))), full((HID, 1)),          # conv4
                full((CH, K_TOT)),                 full((CH, 1)),           # conv5
            ],
            out_specs=pl.BlockSpec((1, CH, HW), lambda n: (n, 0, 0)),
            scratch_shapes=[pltpu.VMEM((K_TOT, HW), jnp.bfloat16)],
        ),
        compiler_params=pltpu.CompilerParams(
            dimension_semantics=("parallel",),
            # Working set is ~2 MiB; explicit limit keeps ample headroom on all
            # of v5e / v6e / v7x (v7x: 64 MiB physical VMEM).
            vmem_limit_bytes=32 * 1024 * 1024),
    )(x, w1, b1, w2, b2, w3, b3, w4, b4, w5, b5)

    # NCHW-flat -> NCHW is a pure reshape (no transpose).
    return out.reshape(N, CH, H, W)


# --------------------------- synthetic parameters ---------------------------

def init_params(key):
    """Deterministic parameters matching the module's __init__ shapes.

    conv5 mirrors `initialize_weights([conv5], 0.0)` -> zero weight and bias.
    """
    ks = jax.random.split(key, 8)

    def w(k, cin, cout, scale=0.1):
        return (scale * jax.random.normal(k, (3, 3, cin, cout))).astype(jnp.float32)

    def b(k, cout, scale=0.1):
        return (scale * jax.random.normal(k, (cout,))).astype(jnp.float32)

    return {
        "w1": w(ks[0], CH, HID),            "b1": b(ks[1], HID),
        "w2": w(ks[2], CH + HID, HID),      "b2": b(ks[3], HID),
        "w3": w(ks[4], CH + 2 * HID, HID),  "b3": b(ks[5], HID),
        "w4": w(ks[6], CH + 3 * HID, HID),  "b4": b(ks[7], HID),
        "w5": jnp.zeros((3, 3, CH + 4 * HID, CH), jnp.float32),
        "b5": jnp.zeros((CH,), jnp.float32),
    }


# ---------------- pure-JAX f32 reference (for correctness check) ------------

def _ref_conv3x3(x_nhwc, w_hwio, b, *, apply_lrelu):
    y = lax.conv_general_dilated(
        x_nhwc, w_hwio, window_strides=(1, 1), padding=((1, 1), (1, 1)),
        dimension_numbers=("NHWC", "HWIO", "NHWC"))
    y = y + b[None, None, None, :]
    if apply_lrelu:
        y = jnp.where(y >= 0, y, y * NEG_SLOPE)
    return y


@jax.jit
def ref_forward(x_nchw, params):
    x = jnp.transpose(x_nchw, (0, 2, 3, 1))
    x1 = _ref_conv3x3(x, params["w1"], params["b1"], apply_lrelu=True)
    x2 = _ref_conv3x3(jnp.concatenate([x, x1], -1),
                      params["w2"], params["b2"], apply_lrelu=True)
    x3 = _ref_conv3x3(jnp.concatenate([x, x1, x2], -1),
                      params["w3"], params["b3"], apply_lrelu=True)
    x4 = _ref_conv3x3(jnp.concatenate([x, x1, x2, x3], -1),
                      params["w4"], params["b4"], apply_lrelu=True)
    x5 = _ref_conv3x3(jnp.concatenate([x, x1, x2, x3, x4], -1),
                      params["w5"], params["b5"], apply_lrelu=False)
    return jnp.transpose(x5, (0, 3, 1, 2))


if __name__ == "__main__":
    key = jax.random.PRNGKey(0)
    k_x, k_p, k_w5, k_b5 = jax.random.split(key, 4)

    # NCHW input; channels must be 12 to match the module.
    x = jax.random.normal(k_x, (2, CH, 16, 16), jnp.float32)
    params = init_params(k_p)

    def rel_err(a, b):
        a = a.astype(jnp.float32)
        b = b.astype(jnp.float32)
        return float(jnp.linalg.norm(a - b) / (jnp.linalg.norm(b) + 1e-12))

    # --- Test A: module init (conv5 zero-initialised) -> x5 is exactly zero --
    out = jax.block_until_ready(residual_dense_block_out(x, params))
    ref = jax.block_until_ready(ref_forward(x, params))
    assert out.shape == (2, CH, 16, 16) and out.dtype == jnp.float32
    assert float(jnp.max(jnp.abs(out))) < 1e-5
    assert float(jnp.max(jnp.abs(ref))) < 1e-5

    # --- Test B: random conv5 so the full 5-conv dense chain is exercised ----
    # (any error in x1..x4 propagates into x5 through nonzero conv5 weights)
    params_b = dict(params)
    params_b["w5"] = (0.1 * jax.random.normal(
        k_w5, (3, 3, CH + 4 * HID, CH))).astype(jnp.float32)
    params_b["b5"] = (0.1 * jax.random.normal(k_b5, (CH,))).astype(jnp.float32)
    out_b = jax.block_until_ready(residual_dense_block_out(x, params_b))
    ref_b = jax.block_until_ready(ref_forward(x, params_b))
    err = rel_err(out_b, ref_b)
    # bf16 MXU operands with f32 accumulation -> ~<1% relative error expected.
    assert err < 3e-2, err

    print("KERNEL_OK")
</pallas_src>

<mosaic_0001>
module attributes {stable_mosaic.version = 11 : i64} {
  func.func @_rdb_fused_kernel(%arg0: i32, %arg1: memref<1x16x256xbf16, #tpu.memory_space<vmem>>, %arg2: memref<32x144xbf16, #tpu.memory_space<vmem>>, %arg3: memref<32x1xf32, #tpu.memory_space<vmem>>, %arg4: memref<32x432xbf16, #tpu.memory_space<vmem>>, %arg5: memref<32x1xf32, #tpu.memory_space<vmem>>, %arg6: memref<32x720xbf16, #tpu.memory_space<vmem>>, %arg7: memref<32x1xf32, #tpu.memory_space<vmem>>, %arg8: memref<32x1008xbf16, #tpu.memory_space<vmem>>, %arg9: memref<32x1xf32, #tpu.memory_space<vmem>>, %arg10: memref<12x1296xbf16, #tpu.memory_space<vmem>>, %arg11: memref<12x1xf32, #tpu.memory_space<vmem>>, %arg12: memref<1x12x256xf32, #tpu.memory_space<vmem>>, %arg13: memref<1296x256xbf16, #tpu.memory_space<vmem>>) attributes {dimension_semantics = [#tpu.dimension_semantics<parallel>], iteration_bounds = array<i64: 2>, scalar_prefetch = 0 : i64, scratch_operands = 1 : i64, tpu.core_type = #tpu.core_type<tc>, window_params = [{transform_indices = @transform_0, window_bounds = array<i64: 1, 16, 256>}, {pipeline_mode = #tpu.pipeline_mode<synchronous>, transform_indices = @transform_1, window_bounds = array<i64: 32, 144>}, {pipeline_mode = #tpu.pipeline_mode<synchronous>, transform_indices = @transform_2, window_bounds = array<i64: 32, 1>}, {pipeline_mode = #tpu.pipeline_mode<synchronous>, transform_indices = @transform_3, window_bounds = array<i64: 32, 432>}, {pipeline_mode = #tpu.pipeline_mode<synchronous>, transform_indices = @transform_4, window_bounds = array<i64: 32, 1>}, {pipeline_mode = #tpu.pipeline_mode<synchronous>, transform_indices = @transform_5, window_bounds = array<i64: 32, 720>}, {pipeline_mode = #tpu.pipeline_mode<synchronous>, transform_indices = @transform_6, window_bounds = array<i64: 32, 1>}, {pipeline_mode = #tpu.pipeline_mode<synchronous>, transform_indices = @transform_7, window_bounds = array<i64: 32, 1008>}, {pipeline_mode = #tpu.pipeline_mode<synchronous>, transform_indices = @transform_8, window_bounds = array<i64: 32, 1>}, {pipeline_mode = #tpu.pipeline_mode<synchronous>, transform_indices = @transform_9, window_bounds = array<i64: 12, 1296>}, {pipeline_mode = #tpu.pipeline_mode<synchronous>, transform_indices = @transform_10, window_bounds = array<i64: 12, 1>}, {transform_indices = @transform_11, window_bounds = array<i64: 1, 12, 256>}]} {
    %0 = tpu.iota {dimensions = array<i32: 1>} : vector<1x256xi32>
    %c16_i32 = arith.constant 16 : i32
    %c0_i32 = arith.constant 0 : i32
    %1 = arith.cmpi eq, %c16_i32, %c0_i32 : i32
    %c1_i32 = arith.constant 1 : i32
    %2 = arith.select %1, %c1_i32, %c16_i32 : i32
    %3 = vector.broadcast %2 : i32 to vector<1x256xi32>
    %4 = arith.remsi %0, %3 : vector<1x256xi32>
    %c0_i32_0 = arith.constant 0 : i32
    %5 = vector.broadcast %c0_i32_0 : i32 to vector<1x256xi32>
    %6 = arith.cmpi ne, %4, %5 : vector<1x256xi32>
    %c0_i32_1 = arith.constant 0 : i32
    %7 = vector.broadcast %c0_i32_1 : i32 to vector<1x256xi32>
    %8 = arith.cmpi slt, %4, %7 : vector<1x256xi32>
    %c0_i32_2 = arith.constant 0 : i32
    %9 = arith.cmpi slt, %2, %c0_i32_2 : i32
    %10 = vector.broadcast %9 : i1 to vector<1x256xi1>
    %11 = vector.broadcast %10 : vector<1x256xi1> to vector<1x256xi1>
    %12 = arith.xori %8, %11 : vector<1x256xi1>
    %13 = arith.andi %12, %6 : vector<1x256xi1>
    %14 = vector.broadcast %2 : i32 to vector<1x256xi32>
    %15 = arith.addi %4, %14 : vector<1x256xi32>
    %16 = arith.select %13, %15, %4 : vector<1x256xi1>, vector<1x256xi32>
    %c16_i32_3 = arith.constant 16 : i32
    %17 = vector.broadcast %c16_i32_3 : i32 to vector<1x256xi32>
    %18 = arith.cmpi sge, %0, %17 : vector<1x256xi32>
    %c240_i32 = arith.constant 240 : i32
    %19 = vector.broadcast %c240_i32 : i32 to vector<1x256xi32>
    %20 = arith.cmpi slt, %0, %19 : vector<1x256xi32>
    %c1_i32_4 = arith.constant 1 : i32
    %21 = vector.broadcast %c1_i32_4 : i32 to vector<1x256xi32>
    %22 = arith.cmpi sge, %16, %21 : vector<1x256xi32>
    %c14_i32 = arith.constant 14 : i32
    %23 = vector.broadcast %c14_i32 : i32 to vector<1x256xi32>
    %24 = arith.cmpi sle, %16, %23 : vector<1x256xi32>
    %25 = arith.andi %18, %22 : vector<1x256xi1>
    %26 = arith.andi %18, %24 : vector<1x256xi1>
    %27 = arith.andi %20, %22 : vector<1x256xi1>
    %28 = arith.andi %20, %24 : vector<1x256xi1>
    %c0 = arith.constant 0 : index
    %c0_5 = arith.constant 0 : index
    %c0_6 = arith.constant 0 : index
    %29 = vector.load %arg1[%c0, %c0_5, %c0_6] : memref<1x16x256xbf16, #tpu.memory_space<vmem>>, vector<1x16x256xbf16>
    %30 = vector.shape_cast %29 : vector<1x16x256xbf16> to vector<16x256xbf16>
    %cst = arith.constant 0.000000e+00 : bf16
    %31 = vector.broadcast %cst : bf16 to vector<16x256xbf16>
    %cst_7 = arith.constant 0.000000e+00 : bf16
    %32 = vector.broadcast %cst_7 : bf16 to vector<16x17xbf16>
    %33 = tpu.concatenate %32, %30, %32 in 1 : vector<16x17xbf16>, vector<16x256xbf16>, vector<16x17xbf16> -> vector<16x290xbf16>
    %34 = vector.extract_strided_slice %33 {offsets = [0, 0], sizes = [16, 256], strides = [1, 1]} : vector<16x290xbf16> to vector<16x256xbf16>
    %35 = vector.shape_cast %25 : vector<1x256xi1> to vector<1x256xi1>
    %36 = vector.broadcast %35 : vector<1x256xi1> to vector<16x256xi1>
    %37 = arith.select %36, %34, %31 : vector<16x256xi1>, vector<16x256xbf16>
    %c0_8 = arith.constant 0 : index
    %c0_9 = arith.constant 0 : index
    %38 = vector.load %arg13[%c0_8, %c0_9] : memref<1296x256xbf16, #tpu.memory_space<vmem>>, vector<16x256xbf16>
    tpu.vector_store %arg13[%c0_8, %c0_9], %37 {strides = array<i32>} : memref<1296x256xbf16, #tpu.memory_space<vmem>>, vector<16x256xbf16>,
    %39 = vector.extract_strided_slice %33 {offsets = [0, 1], sizes = [16, 256], strides = [1, 1]} : vector<16x290xbf16> to vector<16x256xbf16>
    %40 = vector.shape_cast %18 : vector<1x256xi1> to vector<1x256xi1>
    %41 = vector.broadcast %40 : vector<1x256xi1> to vector<16x256xi1>
    %42 = arith.select %41, %39, %31 : vector<16x256xi1>, vector<16x256xbf16>
    %c16 = arith.constant 16 : index
    %c0_10 = arith.constant 0 : index
    %43 = vector.load %arg13[%c16, %c0_10] : memref<1296x256xbf16, #tpu.memory_space<vmem>>, vector<16x256xbf16>
    tpu.vector_store %arg13[%c16, %c0_10], %42 {strides = array<i32>} : memref<1296x256xbf16, #tpu.memory_space<vmem>>, vector<16x256xbf16>,
    %44 = vector.extract_strided_slice %33 {offsets = [0, 2], sizes = [16, 256], strides = [1, 1]} : vector<16x290xbf16> to vector<16x256xbf16>
    %45 = vector.shape_cast %26 : vector<1x256xi1> to vector<1x256xi1>
    %46 = vector.broadcast %45 : vector<1x256xi1> to vector<16x256xi1>
    %47 = arith.select %46, %44, %31 : vector<16x256xi1>, vector<16x256xbf16>
    %c32 = arith.constant 32 : index
    %c0_11 = arith.constant 0 : index
    %48 = vector.load %arg13[%c32, %c0_11] : memref<1296x256xbf16, #tpu.memory_space<vmem>>, vector<16x256xbf16>
    tpu.vector_store %arg13[%c32, %c0_11], %47 {strides = array<i32>} : memref<1296x256xbf16, #tpu.memory_space<vmem>>, vector<16x256xbf16>,
    %49 = vector.extract_strided_slice %33 {offsets = [0, 16], sizes = [16, 256], strides = [1, 1]} : vector<16x290xbf16> to vector<16x256xbf16>
    %50 = vector.shape_cast %22 : vector<1x256xi1> to vector<1x256xi1>
    %51 = vector.broadcast %50 : vector<1x256xi1> to vector<16x256xi1>
    %52 = arith.select %51, %49, %31 : vector<16x256xi1>, vector<16x256xbf16>
    %c48 = arith.constant 48 : index
    %c0_12 = arith.constant 0 : index
    %53 = vector.load %arg13[%c48, %c0_12] : memref<1296x256xbf16, #tpu.memory_space<vmem>>, vector<16x256xbf16>
    tpu.vector_store %arg13[%c48, %c0_12], %52 {strides = array<i32>} : memref<1296x256xbf16, #tpu.memory_space<vmem>>, vector<16x256xbf16>,
    %c64 = arith.constant 64 : index
    %c0_13 = arith.constant 0 : index
    %54 = vector.load %arg13[%c64, %c0_13] : memref<1296x256xbf16, #tpu.memory_space<vmem>>, vector<16x256xbf16>
    tpu.vector_store %arg13[%c64, %c0_13], %30 {strides = array<i32>} : memref<1296x256xbf16, #tpu.memory_space<vmem>>, vector<16x256xbf16>,
    %55 = vector.extract_strided_slice %33 {offsets = [0, 18], sizes = [16, 256], strides = [1, 1]} : vector<16x290xbf16> to vector<16x256xbf16>
    %56 = vector.shape_cast %24 : vector<1x256xi1> to vector<1x256xi1>
    %57 = vector.broadcast %56 : vector<1x256xi1> to vector<16x256xi1>
    %58 = arith.select %57, %55, %31 : vector<16x256xi1>, vector<16x256xbf16>
    %c80 = arith.constant 80 : index
    %c0_14 = arith.constant 0 : index
    %59 = vector.load %arg13[%c80, %c0_14] : memref<1296x256xbf16, #tpu.memory_space<vmem>>, vector<16x256xbf16>
    tpu.vector_store %arg13[%c80, %c0_14], %58 {strides = array<i32>} : memref<1296x256xbf16, #tpu.memory_space<vmem>>, vector<16x256xbf16>,
    %60 = vector.extract_strided_slice %33 {offsets = [0, 32], sizes = [16, 256], strides = [1, 1]} : vector<16x290xbf16> to vector<16x256xbf16>
    %61 = vector.shape_cast %27 : vector<1x256xi1> to vector<1x256xi1>
    %62 = vector.broadcast %61 : vector<1x256xi1> to vector<16x256xi1>
    %63 = arith.select %62, %60, %31 : vector<16x256xi1>, vector<16x256xbf16>
    %c96 = arith.constant 96 : index
    %c0_15 = arith.constant 0 : index
    %64 = vector.load %arg13[%c96, %c0_15] : memref<1296x256xbf16, #tpu.memory_space<vmem>>, vector<16x256xbf16>
    tpu.vector_store %arg13[%c96, %c0_15], %63 {strides = array<i32>} : memref<1296x256xbf16, #tpu.memory_space<vmem>>, vector<16x256xbf16>,
    %65 = vector.extract_strided_slice %33 {offsets = [0, 33], sizes = [16, 256], strides = [1, 1]} : vector<16x290xbf16> to vector<16x256xbf16>
    %66 = vector.shape_cast %20 : vector<1x256xi1> to vector<1x256xi1>
    %67 = vector.broadcast %66 : vector<1x256xi1> to vector<16x256xi1>
    %68 = arith.select %67, %65, %31 : vector<16x256xi1>, vector<16x256xbf16>
    %c112 = arith.constant 112 : index
    %c0_16 = arith.constant 0 : index
    %69 = vector.load %arg13[%c112, %c0_16] : memref<1296x256xbf16, #tpu.memory_space<vmem>>, vector<16x256xbf16>
    tpu.vector_store %arg13[%c112, %c0_16], %68 {strides = array<i32>} : memref<1296x256xbf16, #tpu.memory_space<vmem>>, vector<16x256xbf16>,
    %70 = vector.extract_strided_slice %33 {offsets = [0, 34], sizes = [16, 256], strides = [1, 1]} : vector<16x290xbf16> to vector<16x256xbf16>
    %71 = vector.shape_cast %28 : vector<1x256xi1> to vector<1x256xi1>
    %72 = vector.broadcast %71 : vector<1x256xi1> to vector<16x256xi1>
    %73 = arith.select %72, %70, %31 : vector<16x256xi1>, vector<16x256xbf16>
    %c128 = arith.constant 128 : index
    %c0_17 = arith.constant 0 : index
    %74 = vector.load %arg13[%c128, %c0_17] : memref<1296x256xbf16, #tpu.memory_space<vmem>>, vector<16x256xbf16>
    tpu.vector_store %arg13[%c128, %c0_17], %73 {strides = array<i32>} : memref<1296x256xbf16, #tpu.memory_space<vmem>>, vector<16x256xbf16>,
    %c0_18 = arith.constant 0 : index
    %c0_19 = arith.constant 0 : index
    %75 = vector.load %arg2[%c0_18, %c0_19] : memref<32x144xbf16, #tpu.memory_space<vmem>>, vector<32x144xbf16>
    %c0_20 = arith.constant 0 : index
    %c0_21 = arith.constant 0 : index
    %76 = vector.load %arg13[%c0_20, %c0_21] : memref<1296x256xbf16, #tpu.memory_space<vmem>>, vector<144x256xbf16>
    %cst_22 = arith.constant dense<0.000000e+00> : vector<32x256xf32>
    %77 = tpu.matmul %75, %76, %cst_22 {dimension_numbers = #tpu.dot_dimension_numbers<[1], [0], [0], [1], [0, 0, 1, 1], [], []>} : vector<32x144xbf16>, vector<144x256xbf16>, vector<32x256xf32> -> vector<32x256xf32>
    %c0_23 = arith.constant 0 : index
    %c0_24 = arith.constant 0 : index
    %78 = vector.load %arg3[%c0_23, %c0_24] : memref<32x1xf32, #tpu.memory_space<vmem>>, vector<32x1xf32>
    %79 = vector.broadcast %78 : vector<32x1xf32> to vector<32x256xf32>
    %80 = arith.addf %77, %79 : vector<32x256xf32>
    %cst_25 = arith.constant 0.000000e+00 : f32
    %81 = vector.broadcast %cst_25 : f32 to vector<32x256xf32>
    %82 = arith.cmpf oge, %80, %81 : vector<32x256xf32>
    %cst_26 = arith.constant 0.00999999977 : f32
    %83 = vector.broadcast %cst_26 : f32 to vector<32x256xf32>
    %84 = arith.mulf %80, %83 : vector<32x256xf32>
    %85 = arith.select %82, %80, %84 : vector<32x256xi1>, vector<32x256xf32>
    %86 = arith.truncf %85 : vector<32x256xf32> to vector<32x256xbf16>
    %cst_27 = arith.constant 0.000000e+00 : bf16
    %87 = vector.broadcast %cst_27 : bf16 to vector<32x256xbf16>
    %cst_28 = arith.constant 0.000000e+00 : bf16
    %88 = vector.broadcast %cst_28 : bf16 to vector<32x17xbf16>
    %89 = tpu.concatenate %88, %86, %88 in 1 : vector<32x17xbf16>, vector<32x256xbf16>, vector<32x17xbf16> -> vector<32x290xbf16>
    %90 = vector.extract_strided_slice %89 {offsets = [0, 0], sizes = [32, 256], strides = [1, 1]} : vector<32x290xbf16> to vector<32x256xbf16>
    %91 = vector.shape_cast %25 : vector<1x256xi1> to vector<1x256xi1>
    %92 = vector.broadcast %91 : vector<1x256xi1> to vector<32x256xi1>
    %93 = arith.select %92, %90, %87 : vector<32x256xi1>, vector<32x256xbf16>
    %c144 = arith.constant 144 : index
    %c0_29 = arith.constant 0 : index
    %94 = vector.load %arg13[%c144, %c0_29] : memref<1296x256xbf16, #tpu.memory_space<vmem>>, vector<32x256xbf16>
    tpu.vector_store %arg13[%c144, %c0_29], %93 {strides = array<i32>} : memref<1296x256xbf16, #tpu.memory_space<vmem>>, vector<32x256xbf16>,
    %95 = vector.extract_strided_slice %89 {offsets = [0, 1], sizes = [32, 256], strides = [1, 1]} : vector<32x290xbf16> to vector<32x256xbf16>
    %96 = vector.shape_cast %18 : vector<1x256xi1> to vector<1x256xi1>
    %97 = vector.broadcast %96 : vector<1x256xi1> to vector<32x256xi1>
    %98 = arith.select %97, %95, %87 : vector<32x256xi1>, vector<32x256xbf16>
    %c176 = arith.constant 176 : index
    %c0_30 = arith.constant 0 : index
    %99 = vector.load %arg13[%c176, %c0_30] : memref<1296x256xbf16, #tpu.memory_space<vmem>>, vector<32x256xbf16>
    tpu.vector_store %arg13[%c176, %c0_30], %98 {strides = array<i32>} : memref<1296x256xbf16, #tpu.memory_space<vmem>>, vector<32x256xbf16>,
    %100 = vector.extract_strided_slice %89 {offsets = [0, 2], sizes = [32, 256], strides = [1, 1]} : vector<32x290xbf16> to vector<32x256xbf16>
    %101 = vector.shape_cast %26 : vector<1x256xi1> to vector<1x256xi1>
    %102 = vector.broadcast %101 : vector<1x256xi1> to vector<32x256xi1>
    %103 = arith.select %102, %100, %87 : vector<32x256xi1>, vector<32x256xbf16>
    %c208 = arith.constant 208 : index
    %c0_31 = arith.constant 0 : index
    %104 = vector.load %arg13[%c208, %c0_31] : memref<1296x256xbf16, #tpu.memory_space<vmem>>, vector<32x256xbf16>
    tpu.vector_store %arg13[%c208, %c0_31], %103 {strides = array<i32>} : memref<1296x256xbf16, #tpu.memory_space<vmem>>, vector<32x256xbf16>,
    %105 = vector.extract_strided_slice %89 {offsets = [0, 16], sizes = [32, 256], strides = [1, 1]} : vector<32x290xbf16> to vector<32x256xbf16>
    %106 = vector.shape_cast %22 : vector<1x256xi1> to vector<1x256xi1>
    %107 = vector.broadcast %106 : vector<1x256xi1> to vector<32x256xi1>
    %108 = arith.select %107, %105, %87 : vector<32x256xi1>, vector<32x256xbf16>
    %c240 = arith.constant 240 : index
    %c0_32 = arith.constant 0 : index
    %109 = vector.load %arg13[%c240, %c0_32] : memref<1296x256xbf16, #tpu.memory_space<vmem>>, vector<32x256xbf16>
    tpu.vector_store %arg13[%c240, %c0_32], %108 {strides = array<i32>} : memref<1296x256xbf16, #tpu.memory_space<vmem>>, vector<32x256xbf16>,
    %c272 = arith.constant 272 : index
    %c0_33 = arith.constant 0 : index
    %110 = vector.load %arg13[%c272, %c0_33] : memref<1296x256xbf16, #tpu.memory_space<vmem>>, vector<32x256xbf16>
    tpu.vector_store %arg13[%c272, %c0_33], %86 {strides = array<i32>} : memref<1296x256xbf16, #tpu.memory_space<vmem>>, vector<32x256xbf16>,
    %111 = vector.extract_strided_slice %89 {offsets = [0, 18], sizes = [32, 256], strides = [1, 1]} : vector<32x290xbf16> to vector<32x256xbf16>
    %112 = vector.shape_cast %24 : vector<1x256xi1> to vector<1x256xi1>
    %113 = vector.broadcast %112 : vector<1x256xi1> to vector<32x256xi1>
    %114 = arith.select %113, %111, %87 : vector<32x256xi1>, vector<32x256xbf16>
    %c304 = arith.constant 304 : index
    %c0_34 = arith.constant 0 : index
    %115 = vector.load %arg13[%c304, %c0_34] : memref<1296x256xbf16, #tpu.memory_space<vmem>>, vector<32x256xbf16>
    tpu.vector_store %arg13[%c304, %c0_34], %114 {strides = array<i32>} : memref<1296x256xbf16, #tpu.memory_space<vmem>>, vector<32x256xbf16>,
    %116 = vector.extract_strided_slice %89 {offsets = [0, 32], sizes = [32, 256], strides = [1, 1]} : vector<32x290xbf16> to vector<32x256xbf16>
    %117 = vector.shape_cast %27 : vector<1x256xi1> to vector<1x256xi1>
    %118 = vector.broadcast %117 : vector<1x256xi1> to vector<32x256xi1>
    %119 = arith.select %118, %116, %87 : vector<32x256xi1>, vector<32x256xbf16>
    %c336 = arith.constant 336 : index
    %c0_35 = arith.constant 0 : index
    %120 = vector.load %arg13[%c336, %c0_35] : memref<1296x256xbf16, #tpu.memory_space<vmem>>, vector<32x256xbf16>
    tpu.vector_store %arg13[%c336, %c0_35], %119 {strides = array<i32>} : memref<1296x256xbf16, #tpu.memory_space<vmem>>, vector<32x256xbf16>,
    %121 = vector.extract_strided_slice %89 {offsets = [0, 33], sizes = [32, 256], strides = [1, 1]} : vector<32x290xbf16> to vector<32x256xbf16>
    %122 = vector.shape_cast %20 : vector<1x256xi1> to vector<1x256xi1>
    %123 = vector.broadcast %122 : vector<1x256xi1> to vector<32x256xi1>
    %124 = arith.select %123, %121, %87 : vector<32x256xi1>, vector<32x256xbf16>
    %c368 = arith.constant 368 : index
    %c0_36 = arith.constant 0 : index
    %125 = vector.load %arg13[%c368, %c0_36] : memref<1296x256xbf16, #tpu.memory_space<vmem>>, vector<32x256xbf16>
    tpu.vector_store %arg13[%c368, %c0_36], %124 {strides = array<i32>} : memref<1296x256xbf16, #tpu.memory_space<vmem>>, vector<32x256xbf16>,
    %126 = vector.extract_strided_slice %89 {offsets = [0, 34], sizes = [32, 256], strides = [1, 1]} : vector<32x290xbf16> to vector<32x256xbf16>
    %127 = vector.shape_cast %28 : vector<1x256xi1> to vector<1x256xi1>
    %128 = vector.broadcast %127 : vector<1x256xi1> to vector<32x256xi1>
    %129 = arith.select %128, %126, %87 : vector<32x256xi1>, vector<32x256xbf16>
    %c400 = arith.constant 400 : index
    %c0_37 = arith.constant 0 : index
    %130 = vector.load %arg13[%c400, %c0_37] : memref<1296x256xbf16, #tpu.memory_space<vmem>>, vector<32x256xbf16>
    tpu.vector_store %arg13[%c400, %c0_37], %129 {strides = array<i32>} : memref<1296x256xbf16, #tpu.memory_space<vmem>>, vector<32x256xbf16>,
    %c0_38 = arith.constant 0 : index
    %c0_39 = arith.constant 0 : index
    %131 = vector.load %arg4[%c0_38, %c0_39] : memref<32x432xbf16, #tpu.memory_space<vmem>>, vector<32x432xbf16>
    %c0_40 = arith.constant 0 : index
    %c0_41 = arith.constant 0 : index
    %132 = vector.load %arg13[%c0_40, %c0_41] : memref<1296x256xbf16, #tpu.memory_space<vmem>>, vector<432x256xbf16>
    %cst_42 = arith.constant dense<0.000000e+00> : vector<32x256xf32>
    %133 = tpu.matmul %131, %132, %cst_42 {dimension_numbers = #tpu.dot_dimension_numbers<[1], [0], [0], [1], [0, 0, 1, 1], [], []>} : vector<32x432xbf16>, vector<432x256xbf16>, vector<32x256xf32> -> vector<32x256xf32>
    %c0_43 = arith.constant 0 : index
    %c0_44 = arith.constant 0 : index
    %134 = vector.load %arg5[%c0_43, %c0_44] : memref<32x1xf32, #tpu.memory_space<vmem>>, vector<32x1xf32>
    %135 = vector.broadcast %134 : vector<32x1xf32> to vector<32x256xf32>
    %136 = arith.addf %133, %135 : vector<32x256xf32>
    %cst_45 = arith.constant 0.000000e+00 : f32
    %137 = vector.broadcast %cst_45 : f32 to vector<32x256xf32>
    %138 = arith.cmpf oge, %136, %137 : vector<32x256xf32>
    %cst_46 = arith.constant 0.00999999977 : f32
    %139 = vector.broadcast %cst_46 : f32 to vector<32x256xf32>
    %140 = arith.mulf %136, %139 : vector<32x256xf32>
    %141 = arith.select %138, %136, %140 : vector<32x256xi1>, vector<32x256xf32>
    %142 = arith.truncf %141 : vector<32x256xf32> to vector<32x256xbf16>
    %cst_47 = arith.constant 0.000000e+00 : bf16
    %143 = vector.broadcast %cst_47 : bf16 to vector<32x256xbf16>
    %cst_48 = arith.constant 0.000000e+00 : bf16
    %144 = vector.broadcast %cst_48 : bf16 to vector<32x17xbf16>
    %145 = tpu.concatenate %144, %142, %144 in 1 : vector<32x17xbf16>, vector<32x256xbf16>, vector<32x17xbf16> -> vector<32x290xbf16>
    %146 = vector.extract_strided_slice %145 {offsets = [0, 0], sizes = [32, 256], strides = [1, 1]} : vector<32x290xbf16> to vector<32x256xbf16>
    %147 = vector.shape_cast %25 : vector<1x256xi1> to vector<1x256xi1>
    %148 = vector.broadcast %147 : vector<1x256xi1> to vector<32x256xi1>
    %149 = arith.select %148, %146, %143 : vector<32x256xi1>, vector<32x256xbf16>
    %c432 = arith.constant 432 : index
    %c0_49 = arith.constant 0 : index
    %150 = vector.load %arg13[%c432, %c0_49] : memref<1296x256xbf16, #tpu.memory_space<vmem>>, vector<32x256xbf16>
    tpu.vector_store %arg13[%c432, %c0_49], %149 {strides = array<i32>} : memref<1296x256xbf16, #tpu.memory_space<vmem>>, vector<32x256xbf16>,
    %151 = vector.extract_strided_slice %145 {offsets = [0, 1], sizes = [32, 256], strides = [1, 1]} : vector<32x290xbf16> to vector<32x256xbf16>
    %152 = vector.shape_cast %18 : vector<1x256xi1> to vector<1x256xi1>
    %153 = vector.broadcast %152 : vector<1x256xi1> to vector<32x256xi1>
    %154 = arith.select %153, %151, %143 : vector<32x256xi1>, vector<32x256xbf16>
    %c464 = arith.constant 464 : index
    %c0_50 = arith.constant 0 : index
    %155 = vector.load %arg13[%c464, %c0_50] : memref<1296x256xbf16, #tpu.memory_space<vmem>>, vector<32x256xbf16>
    tpu.vector_store %arg13[%c464, %c0_50], %154 {strides = array<i32>} : memref<1296x256xbf16, #tpu.memory_space<vmem>>, vector<32x256xbf16>,
    %156 = vector.extract_strided_slice %145 {offsets = [0, 2], sizes = [32, 256], strides = [1, 1]} : vector<32x290xbf16> to vector<32x256xbf16>
    %157 = vector.shape_cast %26 : vector<1x256xi1> to vector<1x256xi1>
    %158 = vector.broadcast %157 : vector<1x256xi1> to vector<32x256xi1>
    %159 = arith.select %158, %156, %143 : vector<32x256xi1>, vector<32x256xbf16>
    %c496 = arith.constant 496 : index
    %c0_51 = arith.constant 0 : index
    %160 = vector.load %arg13[%c496, %c0_51] : memref<1296x256xbf16, #tpu.memory_space<vmem>>, vector<32x256xbf16>
    tpu.vector_store %arg13[%c496, %c0_51], %159 {strides = array<i32>} : memref<1296x256xbf16, #tpu.memory_space<vmem>>, vector<32x256xbf16>,
    %161 = vector.extract_strided_slice %145 {offsets = [0, 16], sizes = [32, 256], strides = [1, 1]} : vector<32x290xbf16> to vector<32x256xbf16>
    %162 = vector.shape_cast %22 : vector<1x256xi1> to vector<1x256xi1>
    %163 = vector.broadcast %162 : vector<1x256xi1> to vector<32x256xi1>
    %164 = arith.select %163, %161, %143 : vector<32x256xi1>, vector<32x256xbf16>
    %c528 = arith.constant 528 : index
    %c0_52 = arith.constant 0 : index
    %165 = vector.load %arg13[%c528, %c0_52] : memref<1296x256xbf16, #tpu.memory_space<vmem>>, vector<32x256xbf16>
    tpu.vector_store %arg13[%c528, %c0_52], %164 {strides = array<i32>} : memref<1296x256xbf16, #tpu.memory_space<vmem>>, vector<32x256xbf16>,
    %c560 = arith.constant 560 : index
    %c0_53 = arith.constant 0 : index
    %166 = vector.load %arg13[%c560, %c0_53] : memref<1296x256xbf16, #tpu.memory_space<vmem>>, vector<32x256xbf16>
    tpu.vector_store %arg13[%c560, %c0_53], %142 {strides = array<i32>} : memref<1296x256xbf16, #tpu.memory_space<vmem>>, vector<32x256xbf16>,
    %167 = vector.extract_strided_slice %145 {offsets = [0, 18], sizes = [32, 256], strides = [1, 1]} : vector<32x290xbf16> to vector<32x256xbf16>
    %168 = vector.shape_cast %24 : vector<1x256xi1> to vector<1x256xi1>
    %169 = vector.broadcast %168 : vector<1x256xi1> to vector<32x256xi1>
    %170 = arith.select %169, %167, %143 : vector<32x256xi1>, vector<32x256xbf16>
    %c592 = arith.constant 592 : index
    %c0_54 = arith.constant 0 : index
    %171 = vector.load %arg13[%c592, %c0_54] : memref<1296x256xbf16, #tpu.memory_space<vmem>>, vector<32x256xbf16>
    tpu.vector_store %arg13[%c592, %c0_54], %170 {strides = array<i32>} : memref<1296x256xbf16, #tpu.memory_space<vmem>>, vector<32x256xbf16>,
    %172 = vector.extract_strided_slice %145 {offsets = [0, 32], sizes = [32, 256], strides = [1, 1]} : vector<32x290xbf16> to vector<32x256xbf16>
    %173 = vector.shape_cast %27 : vector<1x256xi1> to vector<1x256xi1>
    %174 = vector.broadcast %173 : vector<1x256xi1> to vector<32x256xi1>
    %175 = arith.select %174, %172, %143 : vector<32x256xi1>, vector<32x256xbf16>
    %c624 = arith.constant 624 : index
    %c0_55 = arith.constant 0 : index
    %176 = vector.load %arg13[%c624, %c0_55] : memref<1296x256xbf16, #tpu.memory_space<vmem>>, vector<32x256xbf16>
    tpu.vector_store %arg13[%c624, %c0_55], %175 {strides = array<i32>} : memref<1296x256xbf16, #tpu.memory_space<vmem>>, vector<32x256xbf16>,
    %177 = vector.extract_strided_slice %145 {offsets = [0, 33], sizes = [32, 256], strides = [1, 1]} : vector<32x290xbf16> to vector<32x256xbf16>
    %178 = vector.shape_cast %20 : vector<1x256xi1> to vector<1x256xi1>
    %179 = vector.broadcast %178 : vector<1x256xi1> to vector<32x256xi1>
    %180 = arith.select %179, %177, %143 : vector<32x256xi1>, vector<32x256xbf16>
    %c656 = arith.constant 656 : index
    %c0_56 = arith.constant 0 : index
    %181 = vector.load %arg13[%c656, %c0_56] : memref<1296x256xbf16, #tpu.memory_space<vmem>>, vector<32x256xbf16>
    tpu.vector_store %arg13[%c656, %c0_56], %180 {strides = array<i32>} : memref<1296x256xbf16, #tpu.memory_space<vmem>>, vector<32x256xbf16>,
    %182 = vector.extract_strided_slice %145 {offsets = [0, 34], sizes = [32, 256], strides = [1, 1]} : vector<32x290xbf16> to vector<32x256xbf16>
    %183 = vector.shape_cast %28 : vector<1x256xi1> to vector<1x256xi1>
    %184 = vector.broadcast %183 : vector<1x256xi1> to vector<32x256xi1>
    %185 = arith.select %184, %182, %143 : vector<32x256xi1>, vector<32x256xbf16>
    %c688 = arith.constant 688 : index
    %c0_57 = arith.constant 0 : index
    %186 = vector.load %arg13[%c688, %c0_57] : memref<1296x256xbf16, #tpu.memory_space<vmem>>, vector<32x256xbf16>
    tpu.vector_store %arg13[%c688, %c0_57], %185 {strides = array<i32>} : memref<1296x256xbf16, #tpu.memory_space<vmem>>, vector<32x256xbf16>,
    %c0_58 = arith.constant 0 : index
    %c0_59 = arith.constant 0 : index
    %187 = vector.load %arg6[%c0_58, %c0_59] : memref<32x720xbf16, #tpu.memory_space<vmem>>, vector<32x720xbf16>
    %c0_60 = arith.constant 0 : index
    %c0_61 = arith.constant 0 : index
    %188 = vector.load %arg13[%c0_60, %c0_61] : memref<1296x256xbf16, #tpu.memory_space<vmem>>, vector<720x256xbf16>
    %cst_62 = arith.constant dense<0.000000e+00> : vector<32x256xf32>
    %189 = tpu.matmul %187, %188, %cst_62 {dimension_numbers = #tpu.dot_dimension_numbers<[1], [0], [0], [1], [0, 0, 1, 1], [], []>} : vector<32x720xbf16>, vector<720x256xbf16>, vector<32x256xf32> -> vector<32x256xf32>
    %c0_63 = arith.constant 0 : index
    %c0_64 = arith.constant 0 : index
    %190 = vector.load %arg7[%c0_63, %c0_64] : memref<32x1xf32, #tpu.memory_space<vmem>>, vector<32x1xf32>
    %191 = vector.broadcast %190 : vector<32x1xf32> to vector<32x256xf32>
    %192 = arith.addf %189, %191 : vector<32x256xf32>
    %cst_65 = arith.constant 0.000000e+00 : f32
    %193 = vector.broadcast %cst_65 : f32 to vector<32x256xf32>
    %194 = arith.cmpf oge, %192, %193 : vector<32x256xf32>
    %cst_66 = arith.constant 0.00999999977 : f32
    %195 = vector.broadcast %cst_66 : f32 to vector<32x256xf32>
    %196 = arith.mulf %192, %195 : vector<32x256xf32>
    %197 = arith.select %194, %192, %196 : vector<32x256xi1>, vector<32x256xf32>
    %198 = arith.truncf %197 : vector<32x256xf32> to vector<32x256xbf16>
    %cst_67 = arith.constant 0.000000e+00 : bf16
    %199 = vector.broadcast %cst_67 : bf16 to vector<32x256xbf16>
    %cst_68 = arith.constant 0.000000e+00 : bf16
    %200 = vector.broadcast %cst_68 : bf16 to vector<32x17xbf16>
    %201 = tpu.concatenate %200, %198, %200 in 1 : vector<32x17xbf16>, vector<32x256xbf16>, vector<32x17xbf16> -> vector<32x290xbf16>
    %202 = vector.extract_strided_slice %201 {offsets = [0, 0], sizes = [32, 256], strides = [1, 1]} : vector<32x290xbf16> to vector<32x256xbf16>
    %203 = vector.shape_cast %25 : vector<1x256xi1> to vector<1x256xi1>
    %204 = vector.broadcast %203 : vector<1x256xi1> to vector<32x256xi1>
    %205 = arith.select %204, %202, %199 : vector<32x256xi1>, vector<32x256xbf16>
    %c720 = arith.constant 720 : index
    %c0_69 = arith.constant 0 : index
    %206 = vector.load %arg13[%c720, %c0_69] : memref<1296x256xbf16, #tpu.memory_space<vmem>>, vector<32x256xbf16>
    tpu.vector_store %arg13[%c720, %c0_69], %205 {strides = array<i32>} : memref<1296x256xbf16, #tpu.memory_space<vmem>>, vector<32x256xbf16>,
    %207 = vector.extract_strided_slice %201 {offsets = [0, 1], sizes = [32, 256], strides = [1, 1]} : vector<32x290xbf16> to vector<32x256xbf16>
    %208 = vector.shape_cast %18 : vector<1x256xi1> to vector<1x256xi1>
    %209 = vector.broadcast %208 : vector<1x256xi1> to vector<32x256xi1>
    %210 = arith.select %209, %207, %199 : vector<32x256xi1>, vector<32x256xbf16>
    %c752 = arith.constant 752 : index
    %c0_70 = arith.constant 0 : index
    %211 = vector.load %arg13[%c752, %c0_70] : memref<1296x256xbf16, #tpu.memory_space<vmem>>, vector<32x256xbf16>
    tpu.vector_store %arg13[%c752, %c0_70], %210 {strides = array<i32>} : memref<1296x256xbf16, #tpu.memory_space<vmem>>, vector<32x256xbf16>,
    %212 = vector.extract_strided_slice %201 {offsets = [0, 2], sizes = [32, 256], strides = [1, 1]} : vector<32x290xbf16> to vector<32x256xbf16>
    %213 = vector.shape_cast %26 : vector<1x256xi1> to vector<1x256xi1>
    %214 = vector.broadcast %213 : vector<1x256xi1> to vector<32x256xi1>
    %215 = arith.select %214, %212, %199 : vector<32x256xi1>, vector<32x256xbf16>
    %c784 = arith.constant 784 : index
    %c0_71 = arith.constant 0 : index
    %216 = vector.load %arg13[%c784, %c0_71] : memref<1296x256xbf16, #tpu.memory_space<vmem>>, vector<32x256xbf16>
    tpu.vector_store %arg13[%c784, %c0_71], %215 {strides = array<i32>} : memref<1296x256xbf16, #tpu.memory_space<vmem>>, vector<32x256xbf16>,
    %217 = vector.extract_strided_slice %201 {offsets = [0, 16], sizes = [32, 256], strides = [1, 1]} : vector<32x290xbf16> to vector<32x256xbf16>
    %218 = vector.shape_cast %22 : vector<1x256xi1> to vector<1x256xi1>
    %219 = vector.broadcast %218 : vector<1x256xi1> to vector<32x256xi1>
    %220 = arith.select %219, %217, %199 : vector<32x256xi1>, vector<32x256xbf16>
    %c816 = arith.constant 816 : index
    %c0_72 = arith.constant 0 : index
    %221 = vector.load %arg13[%c816, %c0_72] : memref<1296x256xbf16, #tpu.memory_space<vmem>>, vector<32x256xbf16>
    tpu.vector_store %arg13[%c816, %c0_72], %220 {strides = array<i32>} : memref<1296x256xbf16, #tpu.memory_space<vmem>>, vector<32x256xbf16>,
    %c848 = arith.constant 848 : index
    %c0_73 = arith.constant 0 : index
    %222 = vector.load %arg13[%c848, %c0_73] : memref<1296x256xbf16, #tpu.memory_space<vmem>>, vector<32x256xbf16>
    tpu.vector_store %arg13[%c848, %c0_73], %198 {strides = array<i32>} : memref<1296x256xbf16, #tpu.memory_space<vmem>>, vector<32x256xbf16>,
    %223 = vector.extract_strided_slice %201 {offsets = [0, 18], sizes = [32, 256], strides = [1, 1]} : vector<32x290xbf16> to vector<32x256xbf16>
    %224 = vector.shape_cast %24 : vector<1x256xi1> to vector<1x256xi1>
    %225 = vector.broadcast %224 : vector<1x256xi1> to vector<32x256xi1>
    %226 = arith.select %225, %223, %199 : vector<32x256xi1>, vector<32x256xbf16>
    %c880 = arith.constant 880 : index
    %c0_74 = arith.constant 0 : index
    %227 = vector.load %arg13[%c880, %c0_74] : memref<1296x256xbf16, #tpu.memory_space<vmem>>, vector<32x256xbf16>
    tpu.vector_store %arg13[%c880, %c0_74], %226 {strides = array<i32>} : memref<1296x256xbf16, #tpu.memory_space<vmem>>, vector<32x256xbf16>,
    %228 = vector.extract_strided_slice %201 {offsets = [0, 32], sizes = [32, 256], strides = [1, 1]} : vector<32x290xbf16> to vector<32x256xbf16>
    %229 = vector.shape_cast %27 : vector<1x256xi1> to vector<1x256xi1>
    %230 = vector.broadcast %229 : vector<1x256xi1> to vector<32x256xi1>
    %231 = arith.select %230, %228, %199 : vector<32x256xi1>, vector<32x256xbf16>
    %c912 = arith.constant 912 : index
    %c0_75 = arith.constant 0 : index
    %232 = vector.load %arg13[%c912, %c0_75] : memref<1296x256xbf16, #tpu.memory_space<vmem>>, vector<32x256xbf16>
    tpu.vector_store %arg13[%c912, %c0_75], %231 {strides = array<i32>} : memref<1296x256xbf16, #tpu.memory_space<vmem>>, vector<32x256xbf16>,
    %233 = vector.extract_strided_slice %201 {offsets = [0, 33], sizes = [32, 256], strides = [1, 1]} : vector<32x290xbf16> to vector<32x256xbf16>
    %234 = vector.shape_cast %20 : vector<1x256xi1> to vector<1x256xi1>
    %235 = vector.broadcast %234 : vector<1x256xi1> to vector<32x256xi1>
    %236 = arith.select %235, %233, %199 : vector<32x256xi1>, vector<32x256xbf16>
    %c944 = arith.constant 944 : index
    %c0_76 = arith.constant 0 : index
    %237 = vector.load %arg13[%c944, %c0_76] : memref<1296x256xbf16, #tpu.memory_space<vmem>>, vector<32x256xbf16>
    tpu.vector_store %arg13[%c944, %c0_76], %236 {strides = array<i32>} : memref<1296x256xbf16, #tpu.memory_space<vmem>>, vector<32x256xbf16>,
    %238 = vector.extract_strided_slice %201 {offsets = [0, 34], sizes = [32, 256], strides = [1, 1]} : vector<32x290xbf16> to vector<32x256xbf16>
    %239 = vector.shape_cast %28 : vector<1x256xi1> to vector<1x256xi1>
    %240 = vector.broadcast %239 : vector<1x256xi1> to vector<32x256xi1>
    %241 = arith.select %240, %238, %199 : vector<32x256xi1>, vector<32x256xbf16>
    %c976 = arith.constant 976 : index
    %c0_77 = arith.constant 0 : index
    %242 = vector.load %arg13[%c976, %c0_77] : memref<1296x256xbf16, #tpu.memory_space<vmem>>, vector<32x256xbf16>
    tpu.vector_store %arg13[%c976, %c0_77], %241 {strides = array<i32>} : memref<1296x256xbf16, #tpu.memory_space<vmem>>, vector<32x256xbf16>,
    %c0_78 = arith.constant 0 : index
    %c0_79 = arith.constant 0 : index
    %243 = vector.load %arg8[%c0_78, %c0_79] : memref<32x1008xbf16, #tpu.memory_space<vmem>>, vector<32x1008xbf16>
    %c0_80 = arith.constant 0 : index
    %c0_81 = arith.constant 0 : index
    %244 = vector.load %arg13[%c0_80, %c0_81] : memref<1296x256xbf16, #tpu.memory_space<vmem>>, vector<1008x256xbf16>
    %cst_82 = arith.constant dense<0.000000e+00> : vector<32x256xf32>
    %245 = tpu.matmul %243, %244, %cst_82 {dimension_numbers = #tpu.dot_dimension_numbers<[1], [0], [0], [1], [0, 0, 1, 1], [], []>} : vector<32x1008xbf16>, vector<1008x256xbf16>, vector<32x256xf32> -> vector<32x256xf32>
    %c0_83 = arith.constant 0 : index
    %c0_84 = arith.constant 0 : index
    %246 = vector.load %arg9[%c0_83, %c0_84] : memref<32x1xf32, #tpu.memory_space<vmem>>, vector<32x1xf32>
    %247 = vector.broadcast %246 : vector<32x1xf32> to vector<32x256xf32>
    %248 = arith.addf %245, %247 : vector<32x256xf32>
    %cst_85 = arith.constant 0.000000e+00 : f32
    %249 = vector.broadcast %cst_85 : f32 to vector<32x256xf32>
    %250 = arith.cmpf oge, %248, %249 : vector<32x256xf32>
    %cst_86 = arith.constant 0.00999999977 : f32
    %251 = vector.broadcast %cst_86 : f32 to vector<32x256xf32>
    %252 = arith.mulf %248, %251 : vector<32x256xf32>
    %253 = arith.select %250, %248, %252 : vector<32x256xi1>, vector<32x256xf32>
    %254 = arith.truncf %253 : vector<32x256xf32> to vector<32x256xbf16>
    %cst_87 = arith.constant 0.000000e+00 : bf16
    %255 = vector.broadcast %cst_87 : bf16 to vector<32x256xbf16>
    %cst_88 = arith.constant 0.000000e+00 : bf16
    %256 = vector.broadcast %cst_88 : bf16 to vector<32x17xbf16>
    %257 = tpu.concatenate %256, %254, %256 in 1 : vector<32x17xbf16>, vector<32x256xbf16>, vector<32x17xbf16> -> vector<32x290xbf16>
    %258 = vector.extract_strided_slice %257 {offsets = [0, 0], sizes = [32, 256], strides = [1, 1]} : vector<32x290xbf16> to vector<32x256xbf16>
    %259 = vector.shape_cast %25 : vector<1x256xi1> to vector<1x256xi1>
    %260 = vector.broadcast %259 : vector<1x256xi1> to vector<32x256xi1>
    %261 = arith.select %260, %258, %255 : vector<32x256xi1>, vector<32x256xbf16>
    %c1008 = arith.constant 1008 : index
    %c0_89 = arith.constant 0 : index
    %262 = vector.load %arg13[%c1008, %c0_89] : memref<1296x256xbf16, #tpu.memory_space<vmem>>, vector<32x256xbf16>
    tpu.vector_store %arg13[%c1008, %c0_89], %261 {strides = array<i32>} : memref<1296x256xbf16, #tpu.memory_space<vmem>>, vector<32x256xbf16>,
    %263 = vector.extract_strided_slice %257 {offsets = [0, 1], sizes = [32, 256], strides = [1, 1]} : vector<32x290xbf16> to vector<32x256xbf16>
    %264 = vector.shape_cast %18 : vector<1x256xi1> to vector<1x256xi1>
    %265 = vector.broadcast %264 : vector<1x256xi1> to vector<32x256xi1>
    %266 = arith.select %265, %263, %255 : vector<32x256xi1>, vector<32x256xbf16>
    %c1040 = arith.constant 1040 : index
    %c0_90 = arith.constant 0 : index
    %267 = vector.load %arg13[%c1040, %c0_90] : memref<1296x256xbf16, #tpu.memory_space<vmem>>, vector<32x256xbf16>
    tpu.vector_store %arg13[%c1040, %c0_90], %266 {strides = array<i32>} : memref<1296x256xbf16, #tpu.memory_space<vmem>>, vector<32x256xbf16>,
    %268 = vector.extract_strided_slice %257 {offsets = [0, 2], sizes = [32, 256], strides = [1, 1]} : vector<32x290xbf16> to vector<32x256xbf16>
    %269 = vector.shape_cast %26 : vector<1x256xi1> to vector<1x256xi1>
    %270 = vector.broadcast %269 : vector<1x256xi1> to vector<32x256xi1>
    %271 = arith.select %270, %268, %255 : vector<32x256xi1>, vector<32x256xbf16>
    %c1072 = arith.constant 1072 : index
    %c0_91 = arith.constant 0 : index
    %272 = vector.load %arg13[%c1072, %c0_91] : memref<1296x256xbf16, #tpu.memory_space<vmem>>, vector<32x256xbf16>
    tpu.vector_store %arg13[%c1072, %c0_91], %271 {strides = array<i32>} : memref<1296x256xbf16, #tpu.memory_space<vmem>>, vector<32x256xbf16>,
    %273 = vector.extract_strided_slice %257 {offsets = [0, 16], sizes = [32, 256], strides = [1, 1]} : vector<32x290xbf16> to vector<32x256xbf16>
    %274 = vector.shape_cast %22 : vector<1x256xi1> to vector<1x256xi1>
    %275 = vector.broadcast %274 : vector<1x256xi1> to vector<32x256xi1>
    %276 = arith.select %275, %273, %255 : vector<32x256xi1>, vector<32x256xbf16>
    %c1104 = arith.constant 1104 : index
    %c0_92 = arith.constant 0 : index
    %277 = vector.load %arg13[%c1104, %c0_92] : memref<1296x256xbf16, #tpu.memory_space<vmem>>, vector<32x256xbf16>
    tpu.vector_store %arg13[%c1104, %c0_92], %276 {strides = array<i32>} : memref<1296x256xbf16, #tpu.memory_space<vmem>>, vector<32x256xbf16>,
    %c1136 = arith.constant 1136 : index
    %c0_93 = arith.constant 0 : index
    %278 = vector.load %arg13[%c1136, %c0_93] : memref<1296x256xbf16, #tpu.memory_space<vmem>>, vector<32x256xbf16>
    tpu.vector_store %arg13[%c1136, %c0_93], %254 {strides = array<i32>} : memref<1296x256xbf16, #tpu.memory_space<vmem>>, vector<32x256xbf16>,
    %279 = vector.extract_strided_slice %257 {offsets = [0, 18], sizes = [32, 256], strides = [1, 1]} : vector<32x290xbf16> to vector<32x256xbf16>
    %280 = vector.shape_cast %24 : vector<1x256xi1> to vector<1x256xi1>
    %281 = vector.broadcast %280 : vector<1x256xi1> to vector<32x256xi1>
    %282 = arith.select %281, %279, %255 : vector<32x256xi1>, vector<32x256xbf16>
    %c1168 = arith.constant 1168 : index
    %c0_94 = arith.constant 0 : index
    %283 = vector.load %arg13[%c1168, %c0_94] : memref<1296x256xbf16, #tpu.memory_space<vmem>>, vector<32x256xbf16>
    tpu.vector_store %arg13[%c1168, %c0_94], %282 {strides = array<i32>} : memref<1296x256xbf16, #tpu.memory_space<vmem>>, vector<32x256xbf16>,
    %284 = vector.extract_strided_slice %257 {offsets = [0, 32], sizes = [32, 256], strides = [1, 1]} : vector<32x290xbf16> to vector<32x256xbf16>
    %285 = vector.shape_cast %27 : vector<1x256xi1> to vector<1x256xi1>
    %286 = vector.broadcast %285 : vector<1x256xi1> to vector<32x256xi1>
    %287 = arith.select %286, %284, %255 : vector<32x256xi1>, vector<32x256xbf16>
    %c1200 = arith.constant 1200 : index
    %c0_95 = arith.constant 0 : index
    %288 = vector.load %arg13[%c1200, %c0_95] : memref<1296x256xbf16, #tpu.memory_space<vmem>>, vector<32x256xbf16>
    tpu.vector_store %arg13[%c1200, %c0_95], %287 {strides = array<i32>} : memref<1296x256xbf16, #tpu.memory_space<vmem>>, vector<32x256xbf16>,
    %289 = vector.extract_strided_slice %257 {offsets = [0, 33], sizes = [32, 256], strides = [1, 1]} : vector<32x290xbf16> to vector<32x256xbf16>
    %290 = vector.shape_cast %20 : vector<1x256xi1> to vector<1x256xi1>
    %291 = vector.broadcast %290 : vector<1x256xi1> to vector<32x256xi1>
    %292 = arith.select %291, %289, %255 : vector<32x256xi1>, vector<32x256xbf16>
    %c1232 = arith.constant 1232 : index
    %c0_96 = arith.constant 0 : index
    %293 = vector.load %arg13[%c1232, %c0_96] : memref<1296x256xbf16, #tpu.memory_space<vmem>>, vector<32x256xbf16>
    tpu.vector_store %arg13[%c1232, %c0_96], %292 {strides = array<i32>} : memref<1296x256xbf16, #tpu.memory_space<vmem>>, vector<32x256xbf16>,
    %294 = vector.extract_strided_slice %257 {offsets = [0, 34], sizes = [32, 256], strides = [1, 1]} : vector<32x290xbf16> to vector<32x256xbf16>
    %295 = vector.shape_cast %28 : vector<1x256xi1> to vector<1x256xi1>
    %296 = vector.broadcast %295 : vector<1x256xi1> to vector<32x256xi1>
    %297 = arith.select %296, %294, %255 : vector<32x256xi1>, vector<32x256xbf16>
    %c1264 = arith.constant 1264 : index
    %c0_97 = arith.constant 0 : index
    %298 = vector.load %arg13[%c1264, %c0_97] : memref<1296x256xbf16, #tpu.memory_space<vmem>>, vector<32x256xbf16>
    tpu.vector_store %arg13[%c1264, %c0_97], %297 {strides = array<i32>} : memref<1296x256xbf16, #tpu.memory_space<vmem>>, vector<32x256xbf16>,
    %c0_98 = arith.constant 0 : index
    %c0_99 = arith.constant 0 : index
    %299 = vector.load %arg10[%c0_98, %c0_99] : memref<12x1296xbf16, #tpu.memory_space<vmem>>, vector<12x1296xbf16>
    %c0_100 = arith.constant 0 : index
    %c0_101 = arith.constant 0 : index
    %300 = vector.load %arg13[%c0_100, %c0_101] : memref<1296x256xbf16, #tpu.memory_space<vmem>>, vector<1296x256xbf16>
    %cst_102 = arith.constant dense<0.000000e+00> : vector<12x256xf32>
    %301 = tpu.matmul %299, %300, %cst_102 {dimension_numbers = #tpu.dot_dimension_numbers<[1], [0], [0], [1], [0, 0, 1, 1], [], []>} : vector<12x1296xbf16>, vector<1296x256xbf16>, vector<12x256xf32> -> vector<12x256xf32>
    %c0_103 = arith.constant 0 : index
    %c0_104 = arith.constant 0 : index
    %302 = vector.load %arg11[%c0_103, %c0_104] : memref<12x1xf32, #tpu.memory_space<vmem>>, vector<12x1xf32>
    %303 = vector.broadcast %302 : vector<12x1xf32> to vector<12x256xf32>
    %304 = arith.addf %301, %303 : vector<12x256xf32>
    %c0_105 = arith.constant 0 : index
    %c0_106 = arith.constant 0 : index
    %c0_107 = arith.constant 0 : index
    %305 = vector.load %arg12[%c0_105, %c0_106, %c0_107] : memref<1x12x256xf32, #tpu.memory_space<vmem>>, vector<1x12x256xf32>
    %306 = vector.shape_cast %305 : vector<1x12x256xf32> to vector<12x256xf32>
    %307 = vector.shape_cast %304 : vector<12x256xf32> to vector<1x12x256xf32>
    tpu.vector_store %arg12[%c0_105, %c0_106, %c0_107], %307 {strides = array<i32>} : memref<1x12x256xf32, #tpu.memory_space<vmem>>, vector<1x12x256xf32>,
    return
  }
  func.func @transform_0(%arg0: i32) -> (i32, i32, i32) {
    %c0_i32 = arith.constant 0 : i32
    %c0_i32_0 = arith.constant 0 : i32
    %c0_i32_1 = arith.constant 0 : i32
    return %arg0, %c0_i32, %c0_i32_0 : i32, i32, i32
  }
  func.func @transform_1(%arg0: i32) -> (i32, i32) {
    %c0_i32 = arith.constant 0 : i32
    %c0_i32_0 = arith.constant 0 : i32
    %c0_i32_1 = arith.constant 0 : i32
    return %c0_i32, %c0_i32_0 : i32, i32
  }
  func.func @transform_2(%arg0: i32) -> (i32, i32) {
    %c0_i32 = arith.constant 0 : i32
    %c0_i32_0 = arith.constant 0 : i32
    %c0_i32_1 = arith.constant 0 : i32
    return %c0_i32, %c0_i32_0 : i32, i32
  }
  func.func @transform_3(%arg0: i32) -> (i32, i32) {
    %c0_i32 = arith.constant 0 : i32
    %c0_i32_0 = arith.constant 0 : i32
    %c0_i32_1 = arith.constant 0 : i32
    return %c0_i32, %c0_i32_0 : i32, i32
  }
  func.func @transform_4(%arg0: i32) -> (i32, i32) {
    %c0_i32 = arith.constant 0 : i32
    %c0_i32_0 = arith.constant 0 : i32
    %c0_i32_1 = arith.constant 0 : i32
    return %c0_i32, %c0_i32_0 : i32, i32
  }
  func.func @transform_5(%arg0: i32) -> (i32, i32) {
    %c0_i32 = arith.constant 0 : i32
    %c0_i32_0 = arith.constant 0 : i32
    %c0_i32_1 = arith.constant 0 : i32
    return %c0_i32, %c0_i32_0 : i32, i32
  }
  func.func @transform_6(%arg0: i32) -> (i32, i32) {
    %c0_i32 = arith.constant 0 : i32
    %c0_i32_0 = arith.constant 0 : i32
    %c0_i32_1 = arith.constant 0 : i32
    return %c0_i32, %c0_i32_0 : i32, i32
  }
  func.func @transform_7(%arg0: i32) -> (i32, i32) {
    %c0_i32 = arith.constant 0 : i32
    %c0_i32_0 = arith.constant 0 : i32
    %c0_i32_1 = arith.constant 0 : i32
    return %c0_i32, %c0_i32_0 : i32, i32
  }
  func.func @transform_8(%arg0: i32) -> (i32, i32) {
    %c0_i32 = arith.constant 0 : i32
    %c0_i32_0 = arith.constant 0 : i32
    %c0_i32_1 = arith.constant 0 : i32
    return %c0_i32, %c0_i32_0 : i32, i32
  }
  func.func @transform_9(%arg0: i32) -> (i32, i32) {
    %c0_i32 = arith.constant 0 : i32
    %c0_i32_0 = arith.constant 0 : i32
    %c0_i32_1 = arith.constant 0 : i32
    return %c0_i32, %c0_i32_0 : i32, i32
  }
  func.func @transform_10(%arg0: i32) -> (i32, i32) {
    %c0_i32 = arith.constant 0 : i32
    %c0_i32_0 = arith.constant 0 : i32
    %c0_i32_1 = arith.constant 0 : i32
    return %c0_i32, %c0_i32_0 : i32, i32
  }
  func.func @transform_11(%arg0: i32) -> (i32, i32, i32) {
    %c0_i32 = arith.constant 0 : i32
    %c0_i32_0 = arith.constant 0 : i32
    %c0_i32_1 = arith.constant 0 : i32
    return %arg0, %c0_i32, %c0_i32_0 : i32, i32, i32
  }
}

</mosaic_0001>

<bundles_post_ra>
// kernel: residual_dense_block_out.1
= control target key start
LH: loop header
LB: loop body
LE: loop exit
PB: predicated region body
PF: predicated region fallthrough
CT: control target
= control target key end

     0   :  { %s4156_s17 = smov 0   ;;  %s6232_s0 = inlined_call_operand.vmem [shape: bf16[2,16,256], index: 0, kind: input, shape index: {}]   ;;  %s6233_s1 = inlined_call_operand.vmem [shape: bf16[32,144], index: 1, kind: input, shape index: {}]   ;;  %s6234_s2 = inlined_call_operand.vmem [shape: f32[32,1], index: 2, kind: input, shape index: {}]   ;;  %s6235_s3 = inlined_call_operand.vmem [shape: bf16[32,432], index: 3, kind: input, shape index: {}]   ;;  %s6236_s4 = inlined_call_operand.vmem [shape: f32[32,1], index: 4, kind: input, shape index: {}]   ;;  %s6237_s5 = inlined_call_operand.vmem [shape: bf16[32,720], index: 5, kind: input, shape index: {}]   ;;  %s6238_s6 = inlined_call_operand.vmem [shape: f32[32,1], index: 6, kind: input, shape index: {}]   ;;  %s6239_s7 = inlined_call_operand.vmem [shape: bf16[32,1008], index: 7, kind: input, shape index: {}]   ;;  %s6240_s8 = inlined_call_operand.vmem [shape: f32[32,1], index: 8, kind: input, shape index: {}]   ;;  %s6241_s9 = inlined_call_operand.vmem [shape: bf16[12,1296], index: 9, kind: input, shape index: {}]   ;;  %s6242_s10 = inlined_call_operand.vmem [shape: f32[12,1], index: 10, kind: input, shape index: {}]   ;;  %s6243_s11 = inlined_call_operand.vmem [shape: f32[2,12,256], index: 11, kind: output, shape index: {}]  }
   0x1 LB: > { %s3791_s18 = sadd.s32 4294967295, %s4077_s17   ;;  %p3795_p0 = scmp.ge.s32.totalorder %s4077_s17, 1  ;;  %s4077_s17 = sphi %s4156_s17, %s21_s17  }
   0x2   : > { %p337_p1 = scmp.lt.s32.totalorder %s4077_s17, 3 }
   0x4   : > { %p338_p2 = pnand %p3795_p0, %p337_p1 }
   0x6   : > { %341 = sbr.rel (%p338_p2) target bundleno = 2679 (0xa77), region = 64 }
   0xd   : > { %v390_v0 = vlaneseq  ;;  %p377_p3 = scmp.lt.s32.totalorder %s3791_s18, 1  ;;  %v6264_v1 = vmov 0   ;;  %vm4080_vm1 = vmmov 1   ;;  %s4081_s23 = smov 17   ;;  %v6371_v43 = vmov 0 }
   0xe   : > { %4012 = vset.pattern.permute.xlu1 %v6264_v1  ;;  %4013 = vset.pattern.permute.xlu0 %v6264_v1  ;;  %s4082_s24 = smov 1   ;;  %s4083_s25 = smov 2  }
   0xf   : > { %v391_v2 = vand.u32 127, %v390_v0  ;;  %v465_v3 = vshrl.u32 %v390_v0, 7  ;;  %s6728_s18 = smov (!%p377_p3, %s3791_s18), 1  ;;  %s4084_s26 = smov 16  }
  0x10   : > { %s3864_s19 = sshll.u32 %s6728_s18, 4  ;;  %s4085_s27 = smov 18  }
  0x11   : > { %vm417_vm0 = vcmp.ge.s32.totalorder %v391_v2, 16  ;;  %v4168_v4 = vsub.s32 0, %v465_v3  ;;  %v392_v5 = vadd.s32 128, %v391_v2  ;;  %v4171_v6 = vsub.s32 4, %v465_v3  ;;  %s4178_s22 = scalar_lea.vmem %s6232_s0, %s3864_s19  ;;  %s4086_s28 = smov 32  }
  0x12   : > { %vm482_vm2 = vmpackc.low %vm4080_vm1, %vm417_vm0  ;;  %v397_v7 = vand.u32 15, %v391_v2  ;;  %v4182_v9 = vld [vmem:[%s4178_s22] ss:$8 sps:$4 sm:$0xff]   ;;  %v4190_v12 = vld [vmem:[%s4178_s22 + $0x4] ss:$8 sps:$4 sm:$0xff]   ;;  %s4087_s29 = smov 33  }
  0x13   : > { %v483_v8 = vsel %vm482_vm2, 65537, %v6264_v1  ;;  %v404_v13 = vand.u32 15, %v392_v5  ;;  %443 = vrot.lane.b32.xlu1 %v4182_v9, %s4081_s23  ;;  %vm420_vm10 = vcmp.lt.s32.totalorder %v392_v5, 240  ;;  %s4088_s30 = smov 34   ;;  %s4089_s12 = smov 127  }
  0x14   : > { %v487_v10 = vrot.slane %v483_v8, %v4168_v4  ;;  %vm4185_vm3 = vcmp.ge.s32.totalorder %v397_v7, 1  ;;  %vm4201_vm5 = vcmp.le.s32.totalorder %v397_v7, 14  ;;  %v491_v16 = vrot.slane %v483_v8, %v4171_v6  ;;  %s4090_s13 = smov 126   ;;  %s4091_s14 = smov 112  }
  0x15   : > { %vm4195_vm4 = vmand %vm417_vm0, %vm4185_vm3  ;;  %vm4206_vm6 = vcmp.le.s32.totalorder %v404_v13, 14  ;;  %vm4213_vm8 = vcmp.ge.s32.totalorder %v404_v13, 1  ;;  %s4092_s15 = smov 110   ;;  %s4093_s16 = smov 96  }
  0x16   : > { %492 = vrot.lane.b32.xlu0 %v487_v10, %s4082_s24  ;;  %vm427_vm7 = vmand %vm417_vm0, %vm4201_vm5  ;;  %s4094_s19 = smov 95   ;;  %s3865_s20 = sshll.u32 %s6728_s18, 5 }
  0x17   : > { %vm524_vm9 = vmpackc.low %vm4206_vm6, %vm427_vm7  ;;  %445 = vrot.lane.b32.xlu1 %v4190_v12, %s4081_s23  ;;  %vm496_vm7 = vcmask 7168  }
  0x18   : > { %v525_v19 = vsel %vm524_vm9, 65537, %v6264_v1  ;;  %vm566_vm11 = vmpackc.low %vm4213_vm8, %vm4185_vm3 }
  0x19   : > { %v533_v20 = vrot.slane %v525_v19, %v4171_v6  ;;  %vm462_vm12 = vmpackc.low %vm4213_vm8, %vm4195_vm4  ;;  %v529_v21 = vrot.slane %v525_v19, %v4168_v4  ;;  %v567_v22 = vsel %vm566_vm11, 65537, %v6264_v1 }
  0x1a   : > { %494 = vrot.lane.b32.xlu0 %v491_v16, %s4082_s24  ;;  %v463_v23 = vsel %vm462_vm12, 65537, %v6264_v1  ;;  %vm612_vm13 = vmpackc.low %vm4206_vm6, %vm4201_vm5  ;;  %v575_v26 = vrot.slane %v567_v22, %v4171_v6  ;;  %v571_v27 = vrot.slane %v567_v22, %v4168_v4  ;;  %vm538_vm12 = vcmask 15360   ;;  %s4095_s24 = smov 94  }
  0x1b   : > { %v467_v24 = vrot.slane %v463_v23, %v4168_v4  ;;  %v471_v25 = vrot.slane %v463_v23, %v4171_v6  ;;  %vm430_vm14 = vmand %vm420_vm10, %vm4213_vm8  ;;  %536 = vrot.lane.b32.xlu1 %v533_v20, %s4083_s25  ;;  %v613_v28 = vsel %vm612_vm13, 65537, %v6264_v1  ;;  %vm6260_vm13 = vcmask 130048   ;;  %v4019_v23 = vld [vmem:[%s6233_s1 + $0x4] ss:$8 sps:$4 sm:$0xff]  }
  0x1c   : > { %vm654_vm15 = vmpackc.low %vm430_vm14, %vm4185_vm3  ;;  %v621_v29 = vrot.slane %v613_v28, %v4171_v6  ;;  %v617_v30 = vrot.slane %v613_v28, %v4168_v4  ;;  %3806 = vmatprep.mubr.msk.bf16.mxu1 %vm6260_vm13, %v4019_v23 }
  0x1d   : > { %v655_v31 = vsel %vm654_vm15, 65537, %v6264_v1  ;;  %vm696_vm0 = vmpackc.low %vm420_vm10, %vm4080_vm1  ;;  %vm447_vm1 = vcmask 138240  }
  0x1e   : > { %534 = vrot.lane.b32.xlu0 %v529_v21, %s4083_s25  ;;  %vm432_vm2 = vmand %vm420_vm10, %vm4206_vm6  ;;  %v663_v32 = vrot.slane %v655_v31, %v4171_v6  ;;  %v659_v33 = vrot.slane %v655_v31, %v4168_v4  ;;  %v697_v34 = vsel %vm696_vm0, 65537, %v6264_v1  ;;  %vm4276_vm6 = vcmp.ne.s16.totalorder %v471_v25, 0  ;;  %v799_v31 = vld [vmem:[%s6234_s2 + $0x8] sm:$0xff]  ;;  %s386_s25 = scalar_lea.vmem %s6243_s11, %s3865_s20 }
  0x1f   : > { %578 = vrot.lane.b32.xlu1 %v575_v26, %s4084_s26  ;;  %vm738_vm3 = vmpackc.low %vm432_vm2, %vm4201_vm5  ;;  %v705_v35 = vrot.slane %v697_v34, %v4171_v6  ;;  %v701_v36 = vrot.slane %v697_v34, %v4168_v4  ;;  %vm4272_vm5 = vcmp.ne.s16.totalorder %v467_v24, 0 }
  0x20   : > { %v739_v37 = vsel %vm738_vm3, 65537, %v6264_v1  ;;  %v6372_v43 = vsel %vm4272_vm5, 4294967295, %v6371_v43 }
  0x21   : > { %v747_v38 = vrot.slane %v739_v37, %v4171_v6  ;;  %v743_v39 = vrot.slane %v739_v37, %v4168_v4  ;;  %6373 = vst [vmem:[#allocation4_spill] sm:$0xff] %v6372_v43 }
  0x22   : > { %576 = vrot.lane.b32.xlu0 %v571_v27, %s4084_s26 }
  0x23   : > { %624 = vrot.lane.b32.xlu1 %v621_v29, %s4085_s27 }
  0x26   : > { %622 = vrot.lane.b32.xlu0 %v617_v30, %s4085_s27  ;;  %v798_v30 = vld [vmem:[%s6234_s2] sm:$0xff] }
  0x27   : > { %666 = vrot.lane.b32.xlu1 %v663_v32, %s4086_s28  ;;  %v800_v32 = vld [vmem:[%s6234_s2 + $0x10] sm:$0xff] }
  0x2a   : > { %664 = vrot.lane.b32.xlu0 %v659_v33, %s4086_s28  ;;  %v801_v33 = vld [vmem:[%s6234_s2 + $0x18] sm:$0xff] }
  0x2b   : > { %708 = vrot.lane.b32.xlu1 %v705_v35, %s4087_s29 }
  0x2e   : > { %706 = vrot.lane.b32.xlu0 %v701_v36, %s4087_s29 }
  0x2f   : > { %750 = vrot.lane.b32.xlu1 %v747_v38, %s4088_s30 }
  0x32   : > { %748 = vrot.lane.b32.xlu0 %v743_v39, %s4088_s30 }
  0x85   : > { %v444_v40 = vpop.permute.xlu1 %443 }
  0x86   : > { %v4269_v42 = vsel %vm447_vm1, 0, %v444_v40 }
  0x87   : > { %v4303_v51 = vsel %vm4272_vm5, %v4269_v42, 0 }
  0x88   : > { %v4266_v41 = vpop.permute.xlu0 %492 }
  0x89   : > { %6370 = vst [vmem:[#allocation3_spill] sm:$0xff] %v4266_v41  ;;  %vm498_vm4 = vcmp.ne.s16.totalorder %v4266_v41, 0  ;;  %v446_v46 = vpop.permute.xlu1 %445 }
  0x8a   : > { %v501_v45 = vsel %vm498_vm4, %v4269_v42, 0  ;;  %v4287_v48 = vsel %vm447_vm1, %v444_v40, %v446_v46  ;;  %v4290_v49 = vsel %vm447_vm1, %v446_v46, 0 }
  0x8b   : > { %507 = vrot.lane.b32.xlu0 %v501_v45, %s4089_s12  ;;  %3866 = vmatprep.subr.msk.bf16.mxu1 %vm4276_vm6, %v4287_v48 }
  0x8c   : > { %v4284_v47 = vpop.permute.xlu0 %494  ;;  %848 = vmatpush1.bf16.msra.mxu1 %v4303_v51 }
  0x8d   : > { %6376 = vst [vmem:[#allocation5_spill] sm:$0xff] %v4284_v47  ;;  %v4294_v50 = vsel %vm496_vm7, %v4266_v41, %v4284_v47  ;;  %vm500_vm8 = vcmp.ne.s16.totalorder %v4284_v47, 0  ;;  %v4314_v54 = vpop.permute.xlu1 %536 }
  0x8e   : > { %6377 = vst [vmem:[#allocation6_spill] sm:$0xff] %v4294_v50  ;;  %vm6244_vm9 = vcmp.ne.s16.totalorder %v4294_v50, 0  ;;  %v503_v52 = vsel %vm500_vm8, %v4290_v49, 0  ;;  %6378 = vst [vmem:[#allocation7_spill] sm:$0xff] %v4314_v54  ;;  %vm542_vm10 = vcmp.ne.s16.totalorder %v4314_v54, 0 }
  0x8f   : > { %511 = vrot.lane.b32.xlu1 %v503_v52, %s4089_s12  ;;  %v502_v53 = vsel %vm6244_vm9, %v4287_v48, 0  ;;  %v545_v57 = vsel %vm542_vm10, %v4290_v49, 0  ;;  %vm668_vm9 = vcmask 261120  }
  0x90   : > { %v4316_v55 = vpop.permute.xlu0 %534  ;;  %509 = vrot.lane.b32.xlu0 %v502_v53, %s4089_s12 }
  0x91   : > { %6379 = vst [vmem:[#allocation8_spill] sm:$0xff] %v4316_v55  ;;  %vm540_vm11 = vcmp.ne.s16.totalorder %v4316_v55, 0  ;;  %v4328_v58 = vpop.permute.xlu1 %578  ;;  %v4332_v59 = vsel %vm538_vm12, %v4316_v55, %v4314_v54  ;;  %vm626_vm12 = vcmask 146432   ;;  %v4040_v54 = vld [vmem:[%s6237_s5 + $0x30] ss:$24 sps:$4 sm:$0xff]  }
  0x92   : > { %v543_v56 = vsel %vm540_vm11, %v4269_v42, 0  ;;  %6380 = vst [vmem:[#allocation9_spill] sm:$0xff] %v4328_v58  ;;  %6381 = vst [vmem:[#allocation10_spill] sm:$0xff] %v4332_v59  ;;  %vm584_vm14 = vcmp.ne.s16.totalorder %v4328_v58, 0  ;;  %vm6245_vm0 = vcmp.ne.s16.totalorder %v4332_v59, 0 }
  0x93   : > { %549 = vrot.lane.b32.xlu1 %v543_v56, %s4090_s13  ;;  %v587_v62 = vsel %vm584_vm14, %v4290_v49, 0  ;;  %v544_v3 = vsel %vm6245_vm0, %v4287_v48, 0  ;;  %vm710_vm0 = vcmask 269312  }
  0x94   : > { %v4334_v60 = vpop.permute.xlu0 %576  ;;  %553 = vrot.lane.b32.xlu0 %v545_v57, %s4090_s13 }
  0x95   : > { %6382 = vst [vmem:[#allocation11_spill] sm:$0xff] %v4334_v60  ;;  %vm582_vm15 = vcmp.ne.s16.totalorder %v4334_v60, 0  ;;  %v4342_v61 = vsel %vm6260_vm13, %v4334_v60, %v4328_v58  ;;  %v4352_v0 = vpop.permute.xlu1 %624  ;;  %v2451_v60 = vld [vmem:[%s6239_s7 + $0x20] sm:$0xff] }
  0x96   : > { %6383 = vst [vmem:[#allocation12_spill] sm:$0xff] %v4342_v61  ;;  %v585_v63 = vsel %vm582_vm15, %v4269_v42, 0  ;;  %6384 = vst [vmem:[#allocation13_spill] sm:$0xff] %v4352_v0  ;;  %vm6246_vm2 = vcmp.ne.s16.totalorder %v4342_v61, 0  ;;  %vm6248_vm7 = vcmp.ne.s16.totalorder %v4352_v0, 0 }
  0x97   : > { %595 = vrot.lane.b32.xlu1 %v587_v62, %s4091_s14  ;;  %v586_v4 = vsel %vm6246_vm2, %v4287_v48, 0  ;;  %v633_v8 = vsel %vm6248_vm7, %v4290_v49, 0 }
  0x98   : > { %v4355_v2 = vpop.permute.xlu0 %622  ;;  %591 = vrot.lane.b32.xlu0 %v585_v63, %s4091_s14 }
  0x99   : > { %6385 = vst [vmem:[#allocation14_spill] sm:$0xff] %v4355_v2  ;;  %vm6247_vm3 = vcmp.ne.s16.totalorder %v4355_v2, 0  ;;  %v4366_v5 = vpop.permute.xlu1 %666  ;;  %v4387_v13 = vsel %vm626_vm12, %v4355_v2, %v4352_v0 }
  0x9a   : > { %6386 = vst [vmem:[#allocation15_spill] sm:$0xff] %v4366_v5  ;;  %v631_v7 = vsel %vm6247_vm3, %v4269_v42, 0  ;;  %6390 = vst [vmem:[#allocation19_spill] sm:$0xff] %v4387_v13  ;;  %vm629_vm12 = vcmp.ne.s16.totalorder %v4387_v13, 0 }
  0x9b   : > { %551 = vrot.lane.b32.xlu1 %v544_v3, %s4090_s13  ;;  %v632_v21 = vsel %vm629_vm12, %v4287_v48, 0 }
  0x9c   : > { %v4369_v6 = vpop.permute.xlu0 %664  ;;  %593 = vrot.lane.b32.xlu0 %v586_v4, %s4091_s14 }
  0x9d   : > { %6387 = vst [vmem:[#allocation16_spill] sm:$0xff] %v4369_v6  ;;  %v4379_v10 = vpop.permute.xlu1 %708  ;;  %vm6250_vm2 = vcmp.ne.s16.totalorder %v4369_v6, 0  ;;  %v4391_v14 = vsel %vm668_vm9, %v4369_v6, %v4366_v5  ;;  %vm752_vm9 = vcmask 277504   ;;  %v6474_v41 = vld [vmem:[#allocation12_spill] sm:$0xff] }
  0x9e   : > { %6388 = vst [vmem:[#allocation17_spill] sm:$0xff] %v4379_v10  ;;  %6391 = vst [vmem:[#allocation20_spill] sm:$0xff] %v4391_v14  ;;  %v673_v16 = vsel %vm6250_vm2, %v4269_v42, 0  ;;  %vm6251_vm7 = vcmp.ne.s16.totalorder %v4391_v14, 0 }
  0x9f   : > { %637 = vrot.lane.b32.xlu1 %v631_v7, %s4092_s15  ;;  %v674_v20 = vsel %vm6251_vm7, %v4287_v48, 0 }
  0xa0   : > { %v4382_v11 = vpop.permute.xlu0 %706  ;;  %641 = vrot.lane.b32.xlu0 %v633_v8, %s4092_s15 }
  0xa1   : > { %6389 = vst [vmem:[#allocation18_spill] sm:$0xff] %v4382_v11  ;;  %v4395_v15 = vsel %vm710_vm0, %v4382_v11, %v4379_v10  ;;  %v4410_v19 = vpop.permute.xlu1 %750  ;;  %vm672_vm0 = vcmp.ne.s16.totalorder %v4366_v5, 0  ;;  %vm6287_vm2 = vcmp.ne.s16.totalorder %v4382_v11, 0 }
  0xa2   : > { %6392 = vst [vmem:[#allocation21_spill] sm:$0xff] %v4395_v15  ;;  %vm6249_vm3 = vcmp.ne.s16.totalorder %v4395_v15, 0  ;;  %6394 = vst [vmem:[#allocation23_spill] sm:$0xff] %v4410_v19  ;;  %v675_v25 = vsel %vm672_vm0, %v4290_v49, 0  ;;  %v715_v26 = vsel %vm6287_vm2, %v4269_v42, 0 }
  0xa3   : > { %v716_v17 = vsel %vm6249_vm3, %v4287_v48, 0  ;;  %vm6252_vm3 = vcmp.ne.s16.totalorder %v4379_v10, 0 }
  0xa4   : > { %679 = vrot.lane.b32.xlu0 %v673_v16, %s4093_s16  ;;  %723 = vrot.lane.b32.xlu1 %v716_v17, %s4094_s19  ;;  %v4408_v18 = vpop.permute.xlu0 %748  ;;  %v717_v24 = vsel %vm6252_vm3, %v4290_v49, 0  ;;  %vm6254_vm3 = vcmp.ne.s16.totalorder %v4410_v19, 0 }
  0xa5   : > { %6393 = vst [vmem:[#allocation22_spill] sm:$0xff] %v4408_v18  ;;  %v4424_v22 = vsel %vm752_vm9, %v4408_v18, %v4410_v19  ;;  %vm6253_vm9 = vcmp.ne.s16.totalorder %v4408_v18, 0  ;;  %v759_v28 = vsel %vm6254_vm3, %v4290_v49, 0  ;;  %vm6256_vm3 = vcmask 1031168  }
  0xa6   : > { %6395 = vst [vmem:[#allocation24_spill] sm:$0xff] %v4424_v22  ;;  %vm6255_vm7 = vcmp.ne.s16.totalorder %v4424_v22, 0  ;;  %v757_v29 = vsel %vm6253_vm9, %v4269_v42, 0  ;;  %vm6258_vm9 = vcmask 1039360  }
  0xa7   : > { %v758_v27 = vsel %vm6255_vm7, %v4287_v48, 0  ;;  %vm6257_vm7 = vcmask 916480  }
  0xa8   : > { %681 = vrot.lane.b32.xlu0 %v674_v20, %s4093_s16  ;;  %639 = vrot.lane.b32.xlu1 %v632_v21, %s4092_s15 }
  0xac   : > { %725 = vrot.lane.b32.xlu0 %v717_v24, %s4094_s19  ;;  %683 = vrot.lane.b32.xlu1 %v675_v25, %s4093_s16 }
  0xb0   : > { %721 = vrot.lane.b32.xlu1 %v715_v26, %s4094_s19  ;;  %765 = vrot.lane.b32.xlu0 %v758_v27, %s4095_s24 }
  0xb4   : > { %767 = vrot.lane.b32.xlu1 %v759_v28, %s4095_s24  ;;  %763 = vrot.lane.b32.xlu0 %v757_v29, %s4095_s24 }
  0xb8   : > { %804 = vperm.xlu1 %4012, %v798_v30   ;;  %809 = vperm.xlu0 %4013, %v799_v31  }
  0xbc   : > { %814 = vperm.xlu1 %4012, %v800_v32  }
  0xc0   : > { %819 = vperm.xlu1 %4012, %v801_v33   ;;  %v4017_v33 = vld [vmem:[%s6233_s1] ss:$8 sps:$4 sm:$0xff]  }
  0xfd   : > { %v508_v34 = vpop.permute.xlu0 %507 }
 0x101   : > { %v512_v35 = vpop.permute.xlu1 %511 }
 0x102   : > { %v510_v36 = vpop.permute.xlu0 %509 }
 0x103   : > { %v4471_v37 = vsel %vm6258_vm9, %v508_v34, %v510_v36  ;;  %v4474_v38 = vsel %vm6258_vm9, %v510_v36, %v512_v35  ;;  %vm6262_vm9 = vcmask 777216   ;;  %v4020_v34 = vld [vmem:[%s6233_s1 + $0x14] ss:$8 sps:$4 sm:$0xff]   ;;  %v4022_v35 = vld [vmem:[%s6233_s1 + $0x10] ss:$8 sps:$4 sm:$0xff]  }
 0x104   : > { %849 = vmatprep.subr.bf16.mxu1 %v4474_v38 }
 0x105   : > { %850 = vmatpush1.bf16.msra.mxu1 %v4471_v37  ;;  %v550_v39 = vpop.permute.xlu1 %549 }
 0x106   : > { %v554_v40 = vpop.permute.xlu0 %553 }
 0x109   : > { %v596_v42 = vpop.permute.xlu1 %595 }
 0x10a   : > { %v592_v45 = vpop.permute.xlu0 %591 }
 0x10d   : > { %v552_v46 = vpop.permute.xlu1 %551 }
 0x10e   : > { %v4479_v49 = vsel %vm6256_vm3, %v550_v39, %v552_v46  ;;  %v4482_v52 = vsel %vm6256_vm3, %v552_v46, %v554_v40  ;;  %v594_v53 = vpop.permute.xlu0 %593  ;;  %vm6259_vm3 = vcmask 900096  }
 0x10f   : > { %v4485_v56 = vsel %vm6257_vm7, %v594_v53, %v596_v42  ;;  %851 = vmatprep.subr.bf16.mxu1 %v4482_v52  ;;  %v4491_v63 = vsel %vm6257_vm7, %v592_v45, %v594_v53  ;;  %vm6263_vm7 = vcmask 785408  }
 0x110   : > { %852 = vmatpush1.bf16.msra.mxu1 %v4479_v49 }
 0x111   : > { %853 = vmatprep.subr.bf16.mxu1 %v4485_v56  ;;  %v638_v57 = vpop.permute.xlu1 %637 }
 0x112   : > { %v642_v62 = vpop.permute.xlu0 %641 }
 0x114   : > { %854 = vmatpush1.bf16.msra.mxu1 %v4491_v63 }
 0x115   : > { %855 = vmatprep.subr.bf16.mxu1 %v4190_v12 }
 0x116   : > { %v680_v3 = vpop.permute.xlu0 %679  ;;  %v724_v4 = vpop.permute.xlu1 %723 }
 0x118   : > { %856 = vmatpush1.bf16.msra.mxu1 %v4182_v9 }
 0x11a   : > { %v682_v7 = vpop.permute.xlu0 %681  ;;  %v640_v8 = vpop.permute.xlu1 %639 }
 0x11b   : > { %v4497_v16 = vsel %vm6259_vm3, %v638_v57, %v640_v8  ;;  %v4500_v17 = vsel %vm6259_vm3, %v640_v8, %v642_v62  ;;  %v4508_v24 = vsel %vm6263_vm7, %v680_v3, %v682_v7  ;;  %vm6261_vm3 = vcmask 769024  }
 0x11c   : > { %857 = vmatprep.subr.bf16.mxu1 %v4500_v17 }
 0x11d   : > { %858 = vmatpush1.bf16.msra.mxu1 %v4497_v16 }
 0x11e   : > { %v726_v20 = vpop.permute.xlu0 %725  ;;  %v684_v21 = vpop.permute.xlu1 %683 }
 0x11f   : > { %v4505_v23 = vsel %vm6263_vm7, %v682_v7, %v684_v21  ;;  %v4512_v25 = vsel %vm6262_vm9, %v724_v4, %v726_v20 }
 0x120   : > { %859 = vmatprep.subr.bf16.mxu1 %v4505_v23 }
 0x121   : > { %860 = vmatpush1.bf16.msra.mxu1 %v4508_v24 }
 0x122   : > { %v766_v26 = vpop.permute.xlu0 %765  ;;  %861 = vmatprep.subr.bf16.mxu1 %v4512_v25  ;;  %v722_v27 = vpop.permute.xlu1 %721 }
 0x123   : > { %v4517_v28 = vsel %vm6262_vm9, %v722_v27, %v724_v4 }
 0x125   : > { %862 = vmatpush1.bf16.msra.mxu1 %v4517_v28 }
 0x126   : > { %v764_v29 = vpop.permute.xlu0 %763  ;;  %v768_v30 = vpop.permute.xlu1 %767 }
 0x127   : > { %v4521_v31 = vsel %vm6261_vm3, %v764_v29, %v766_v26  ;;  %v4524_v32 = vsel %vm6261_vm3, %v766_v26, %v768_v30 }
 0x128   : > { %863 = vmatprep.subr.bf16.mxu1 %v4524_v32 }
 0x129   : > { %864 = vmatpush1.bf16.msra.mxu1 %v4521_v31 }
 0x12a   : > { %3867 = vmatprep.subr.msk.bf16.mxu1 %vm4276_vm6, %v4287_v48 }
 0x12c   : > { %880 = vmatmul.mubr.bf16.vlgmr.msra.gmra.mrb[0].mxu1 %v4017_v33 }
 0x12d   : > { %1352 = vmatpush1.bf16.msra.mxu1 %v4303_v51  ;;  %3807 = vmatprep.mubr.msk.bf16.mxu1 %vm6260_vm13, %v4020_v34 }
 0x12e   : > { %1353 = vmatprep.subr.bf16.mxu1 %v4474_v38 }
 0x131   : > { %1354 = vmatpush1.bf16.msra.mxu1 %v4471_v37 }
 0x132   : > { %1355 = vmatprep.subr.bf16.mxu1 %v4482_v52 }
 0x134   : > { %890 = vmatmul.mubr.bf16.gmra.mrb[4].mxu1 %v4022_v35 }
 0x135   : > { %1356 = vmatpush1.bf16.msra.mxu1 %v4479_v49 }
 0x136   : > { %1357 = vmatprep.subr.bf16.mxu1 %v4485_v56 }
 0x137   : > { %v805_v36 = vpop.permute.xlu1 %804  ;;  %v810_v39 = vpop.permute.xlu0 %809 }
 0x139   : > { %1358 = vmatpush1.bf16.msra.mxu1 %v4491_v63 }
 0x13a   : > { %1359 = vmatprep.subr.bf16.mxu1 %v4190_v12 }
 0x13b   : > { %v815_v62 = vpop.permute.xlu1 %814 }
 0x13d   : > { %1360 = vmatpush1.bf16.msra.mxu1 %v4182_v9 }
 0x13e   : > { %1361 = vmatprep.subr.bf16.mxu1 %v4500_v17 }
 0x141   : > { %1362 = vmatpush1.bf16.msra.mxu1 %v4497_v16 }
 0x142   : > { %1363 = vmatprep.subr.bf16.mxu1 %v4505_v23 }
 0x145   : > { %1364 = vmatpush1.bf16.msra.mxu1 %v4508_v24 }
 0x146   : > { %1365 = vmatprep.subr.bf16.mxu1 %v4512_v25 }
 0x149   : > { %1366 = vmatpush1.bf16.msra.mxu1 %v4517_v28 }
 0x14a   : > { %1367 = vmatprep.subr.bf16.mxu1 %v4524_v32 }
 0x14d   : > { %1368 = vmatpush1.bf16.msra.mxu1 %v4521_v31 }
 0x1ff   : > { %v881_v12 = vpop.f32.mrb[0].mxu1 }
 0x200   : > { %v882_v9 = vadd.f32 %v881_v12, %v805_v36  ;;  %v883_v40 = vpop.f32.mrb[1].mxu1 }
 0x201   : > { %v884_v42 = vadd.f32 %v883_v40, %v805_v36  ;;  %v885_v45 = vpop.f32.mrb[2].mxu1  ;;  %v820_v36 = vpop.permute.xlu1 %819 }
 0x202   : > { %v908_v46 = vmul.f32 0.01, %v882_v9  ;;  %v886_v53 = vadd.f32 %v885_v45, %v810_v39  ;;  %v887_v57 = vpop.f32.mrb[3].mxu1  ;;  %vm900_vm13 = vcmp.ge.f32.partialorder %v882_v9, 0.0 }
 0x203   : > { %v909_v3 = vmul.f32 0.01, %v884_v42  ;;  %v888_v4 = vadd.f32 %v887_v57, %v810_v39  ;;  %vm901_vm3 = vcmp.ge.f32.partialorder %v884_v42, 0.0 }
 0x204   : > { %vm902_vm9 = vcmp.ge.f32.partialorder %v886_v53, 0.0  ;;  %v910_v7 = vmul.f32 0.01, %v886_v53  ;;  %v916_v20 = vsel %vm900_vm13, %v882_v9, %v908_v46 }
 0x205   : > { %vm903_vm7 = vcmp.ge.f32.partialorder %v888_v4, 0.0  ;;  %v911_v8 = vmul.f32 0.01, %v888_v4  ;;  %v917_v26 = vsel %vm901_vm3, %v884_v42, %v909_v3 }
 0x206   : > { %v918_v21 = vsel %vm902_vm9, %v886_v53, %v910_v7 }
 0x207   : > { %v4558_v27 = vpack.c.bf16 %v918_v21, %v916_v20  ;;  %v919_v29 = vsel %vm903_vm7, %v888_v4, %v911_v8  ;;  %v891_v30 = vpop.f32.mrb[4].mxu1 }
 0x208   : > { %v4560_v33 = vpack.c.bf16 %v919_v29, %v917_v26  ;;  %v892_v34 = vadd.f32 %v891_v30, %v815_v62  ;;  %v893_v35 = vpop.f32.mrb[5].mxu1 }
 0x209   : > { %v894_v12 = vadd.f32 %v893_v35, %v815_v62  ;;  %v895_v40 = vpop.f32.mrb[6].mxu1  ;;  %932 = vrot.lane.b32.xlu0 %v4558_v27, %s4081_s23 }
 0x20a   : > { %v912_v39 = vmul.f32 0.01, %v892_v34  ;;  %v896_v45 = vadd.f32 %v895_v40, %v820_v36  ;;  %v897_v57 = vpop.f32.mrb[7].mxu1  ;;  %934 = vrot.lane.b32.xlu1 %v4560_v33, %s4081_s23  ;;  %vm904_vm13 = vcmp.ge.f32.partialorder %v892_v34, 0.0 }
 0x20b   : > { %v913_v9 = vmul.f32 0.01, %v894_v12  ;;  %v898_v42 = vadd.f32 %v897_v57, %v820_v36  ;;  %vm905_vm3 = vcmp.ge.f32.partialorder %v894_v12, 0.0 }
 0x20c   : > { %vm906_vm7 = vcmp.ge.f32.partialorder %v896_v45, 0.0  ;;  %v914_v46 = vmul.f32 0.01, %v896_v45  ;;  %v920_v3 = vsel %vm904_vm13, %v892_v34, %v912_v39  ;;  %vm6398_vm13 = vcmp.ne.s16.totalorder %v4294_v50, 0 }
 0x20d   : > { %vm907_vm9 = vcmp.ge.f32.partialorder %v898_v42, 0.0  ;;  %v915_v53 = vmul.f32 0.01, %v898_v42  ;;  %v921_v4 = vsel %vm905_vm3, %v894_v12, %v913_v9  ;;  %vm6399_vm3 = vcmp.ne.s16.totalorder %v4332_v59, 0 }
 0x20e   : > { %v922_v62 = vsel %vm906_vm7, %v896_v45, %v914_v46  ;;  %vm6400_vm7 = vcmp.ne.s16.totalorder %v4342_v61, 0 }
 0x20f   : > { %v4566_v7 = vpack.c.bf16 %v922_v62, %v920_v3  ;;  %v923_v8 = vsel %vm907_vm9, %v898_v42, %v915_v53  ;;  %vm6401_vm9 = vmmov %vm6398_vm13 }
 0x210   : > { %v4568_v20 = vpack.c.bf16 %v923_v8, %v921_v4 }
 0x211   : > { %6396 = vst [vmem:[#allocation25_spill] sm:$0xff] %v4566_v7  ;;  %936 = vrot.lane.b32.xlu0 %v4566_v7, %s4081_s23 }
 0x212   : > { %6397 = vst [vmem:[#allocation26_spill] sm:$0xff] %v4568_v20  ;;  %938 = vrot.lane.b32.xlu1 %v4568_v20, %s4081_s23 }
 0x27b   : > { %v933_v21 = vpop.permute.xlu0 %932 }
 0x27c   : > { %v4575_v26 = vsel %vm447_vm1, 0, %v933_v21  ;;  %v935_v29 = vpop.permute.xlu1 %934 }
 0x27d   : > { %v4578_v30 = vsel %vm447_vm1, %v933_v21, %v935_v29  ;;  %v4581_v34 = vsel %vm447_vm1, %v935_v29, 0  ;;  %v964_v35 = vsel %vm498_vm4, %v4575_v26, 0  ;;  %v4589_v36 = vsel %vm4272_vm5, %v4575_v26, 0 }
 0x27e   : > { %976 = vrot.lane.b32.xlu0 %v964_v35, %s4089_s12  ;;  %3868 = vmatprep.subr.msk.bf16.mxu1 %vm4276_vm6, %v4578_v30  ;;  %v966_v12 = vsel %vm500_vm8, %v4581_v34, 0  ;;  %v1000_v40 = vsel %vm540_vm11, %v4575_v26, 0  ;;  %v1002_v39 = vsel %vm542_vm10, %v4581_v34, 0  ;;  %v1036_v46 = vsel %vm582_vm15, %v4575_v26, 0 }
 0x27f   : > { %980 = vrot.lane.b32.xlu1 %v966_v12, %s4089_s12  ;;  %1370 = vmatpush1.bf16.msra.mxu1 %v4589_v36  ;;  %v1038_v3 = vsel %vm584_vm14, %v4581_v34, 0  ;;  %v965_v62 = vsel %vm6398_vm13, %v4578_v30, 0  ;;  %v1001_v8 = vsel %vm6399_vm3, %v4578_v30, 0  ;;  %v1037_v29 = vsel %vm6400_vm7, %v4578_v30, 0  ;;  %vm6402_vm13 = vmmov %vm6399_vm3 }
 0x280   : > { %vm6403_vm3 = vcmp.ne.s16.totalorder %v4352_v0, 0  ;;  %vm6404_vm7 = vcmp.ne.s16.totalorder %v4355_v2, 0 }
 0x282   : > { %1012 = vrot.lane.b32.xlu0 %v1000_v40, %s4090_s13 }
 0x283   : > { %v937_v45 = vpop.permute.xlu0 %936  ;;  %1016 = vrot.lane.b32.xlu1 %v1002_v39, %s4090_s13 }
 0x284   : > { %v4609_v57 = vsel %vm447_vm1, 0, %v937_v45  ;;  %v939_v9 = vpop.permute.xlu1 %938 }
 0x285   : > { %v4612_v42 = vsel %vm447_vm1, %v937_v45, %v939_v9  ;;  %v4620_v53 = vsel %vm4272_vm5, %v4609_v57, 0  ;;  %v967_v4 = vsel %vm498_vm4, %v4609_v57, 0  ;;  %v1003_v21 = vsel %vm540_vm11, %v4609_v57, 0 }
 0x286   : > { %1048 = vrot.lane.b32.xlu0 %v1036_v46, %s4091_s14  ;;  %3869 = vmatprep.subr.msk.bf16.mxu1 %vm4276_vm6, %v4612_v42  ;;  %v954_v35 = vsel %vm447_vm1, %v939_v9, 0  ;;  %v968_v12 = vsel %vm6401_vm9, %v4612_v42, 0  ;;  %v1039_v39 = vsel %vm582_vm15, %v4609_v57, 0  ;;  %v1077_v45 = vsel %vm629_vm12, %v4578_v30, 0  ;;  %v4025_v9 = vld [vmem:[%s6235_s3 + $0x4] ss:$16 sps:$4 sm:$0xff]  }
 0x287   : > { %1052 = vrot.lane.b32.xlu1 %v1038_v3, %s4091_s14  ;;  %1372 = vmatpush1.bf16.msra.mxu1 %v4620_v53  ;;  %v969_v40 = vsel %vm500_vm8, %v954_v35, 0  ;;  %v1004_v46 = vsel %vm6402_vm13, %v4612_v42, 0  ;;  %v1005_v3 = vsel %vm542_vm10, %v954_v35, 0  ;;  %vm6405_vm9 = vcmp.ne.s16.totalorder %v4342_v61, 0  ;;  %vm6406_vm13 = vmmov %vm6404_vm7 }
 0x288   : > { %1383 = vmatprep.mubr.bf16.mxu1 %v4025_v9 }
 0x28a   : > { %978 = vrot.lane.b32.xlu0 %v965_v62, %s4089_s12  ;;  %v1078_v62 = vsel %vm6403_vm3, %v4581_v34, 0  ;;  %vm6407_vm3 = vcmp.ne.s16.totalorder %v4391_v14, 0 }
 0x28b   : > { %982 = vrot.lane.b32.xlu1 %v967_v4, %s4089_s12  ;;  %v1076_v4 = vsel %vm6404_vm7, %v4575_v26, 0  ;;  %vm6408_vm7 = vcmp.ne.s16.totalorder %v4369_v6, 0 }
 0x28e   : > { %1014 = vrot.lane.b32.xlu0 %v1001_v8, %s4090_s13  ;;  %v1040_v8 = vsel %vm6405_vm9, %v4612_v42, 0  ;;  %vm6409_vm9 = vmmov %vm6408_vm7 }
 0x28f   : > { %1018 = vrot.lane.b32.xlu1 %v1003_v21, %s4090_s13  ;;  %v1041_v21 = vsel %vm584_vm14, %v954_v35, 0 }
 0x292   : > { %1050 = vrot.lane.b32.xlu0 %v1037_v29, %s4091_s14  ;;  %v1079_v29 = vsel %vm6406_vm13, %v4609_v57, 0  ;;  %vm6410_vm13 = vcmp.ne.s16.totalorder %v4395_v15, 0 }
 0x293   : > { %984 = vrot.lane.b32.xlu1 %v968_v12, %s4089_s12  ;;  %v1113_v12 = vsel %vm6407_vm3, %v4578_v30, 0  ;;  %v1149_v9 = vsel %vm6410_vm13, %v4578_v30, 0  ;;  %vm6411_vm3 = vcmp.ne.s16.totalorder %v4352_v0, 0  ;;  %vm6414_vm13 = vcmp.ne.s16.totalorder %v4424_v22, 0 }
 0x296   : > { %986 = vrot.lane.b32.xlu0 %v969_v40, %s4089_s12  ;;  %v1114_v40 = vsel %vm672_vm0, %v4581_v34, 0 }
 0x297   : > { %1054 = vrot.lane.b32.xlu1 %v1039_v39, %s4091_s14  ;;  %v1112_v39 = vsel %vm6408_vm7, %v4575_v26, 0  ;;  %vm6412_vm7 = vcmp.ne.s16.totalorder %v4379_v10, 0 }
 0x29a   : > { %1090 = vrot.lane.b32.xlu0 %v1077_v45, %s4092_s15  ;;  %v1115_v45 = vsel %vm6409_vm9, %v4609_v57, 0  ;;  %vm6413_vm9 = vcmp.ne.s16.totalorder %v4391_v14, 0 }
 0x29b   : > { %1020 = vrot.lane.b32.xlu1 %v1004_v46, %s4090_s13  ;;  %v1080_v46 = vsel %vm629_vm12, %v4612_v42, 0 }
 0x29e   : > { %1022 = vrot.lane.b32.xlu0 %v1005_v3, %s4090_s13  ;;  %v1081_v3 = vsel %vm6411_vm3, %v954_v35, 0  ;;  %vm6415_vm3 = vcmp.ne.s16.totalorder %v4395_v15, 0  ;;  %v4028_v15 = vld [vmem:[%s6235_s3 + $0x20] ss:$16 sps:$4 sm:$0xff]  }
 0x29f   : > { %1092 = vrot.lane.b32.xlu1 %v1078_v62, %s4092_s15  ;;  %v1150_v62 = vsel %vm6412_vm7, %v4581_v34, 0 }
 0x2a2   : > { %1088 = vrot.lane.b32.xlu0 %v1076_v4, %s4092_s15  ;;  %v1148_v4 = vsel %vm6287_vm2, %v4575_v26, 0 }
 0x2a3   : > { %1056 = vrot.lane.b32.xlu1 %v1040_v8, %s4091_s14  ;;  %v1116_v8 = vsel %vm6413_vm9, %v4612_v42, 0  ;;  %vm6416_vm9 = vcmp.ne.s16.totalorder %v4410_v19, 0 }
 0x2a6   : > { %1058 = vrot.lane.b32.xlu0 %v1041_v21, %s4091_s14  ;;  %v1117_v21 = vsel %vm672_vm0, %v954_v35, 0 }
 0x2a7   : > { %1094 = vrot.lane.b32.xlu1 %v1079_v29, %s4092_s15  ;;  %v1151_v29 = vsel %vm6287_vm2, %v4609_v57, 0  ;;  %vm6440_vm2 = vcmask 785408  }
 0x2aa   : > { %1126 = vrot.lane.b32.xlu0 %v1113_v12, %s4093_s16  ;;  %v1185_v12 = vsel %vm6414_vm13, %v4578_v30, 0  ;;  %vm6417_vm13 = vcmp.ne.s16.totalorder %v4408_v18, 0 }
 0x2ab   : > { %1128 = vrot.lane.b32.xlu1 %v1114_v40, %s4093_s16  ;;  %v1152_v40 = vsel %vm6415_vm3, %v4612_v42, 0  ;;  %vm6418_vm3 = vcmp.ne.s16.totalorder %v4424_v22, 0 }
 0x2ae   : > { %1124 = vrot.lane.b32.xlu0 %v1112_v39, %s4093_s16  ;;  %v1153_v39 = vsel %vm6412_vm7, %v954_v35, 0  ;;  %vm6419_vm7 = vmmov %vm6416_vm9 }
 0x2af   : > { %1130 = vrot.lane.b32.xlu1 %v1115_v45, %s4093_s16  ;;  %v1186_v45 = vsel %vm6416_vm9, %v4581_v34, 0  ;;  %vm6420_vm9 = vmmov %vm6417_vm13 }
 0x2b0   : > { %v1187_v34 = vsel %vm6420_vm9, %v4609_v57, 0  ;;  %v1285_v57 = vld [vmem:[%s6236_s4 + $0x18] sm:$0xff] }
 0x2b2   : > { %1162 = vrot.lane.b32.xlu0 %v1149_v9, %s4094_s19  ;;  %v1184_v9 = vsel %vm6417_vm13, %v4575_v26, 0  ;;  %v1282_v26 = vld [vmem:[%s6236_s4] sm:$0xff]  ;;  %vm6421_vm13 = vcmask 1039360  }
 0x2b3   : > { %1096 = vrot.lane.b32.xlu1 %v1080_v46, %s4092_s15  ;;  %v1188_v46 = vsel %vm6418_vm3, %v4612_v42, 0  ;;  %vm6422_vm3 = vmmov %vm6421_vm13 }
 0x2b4   : > { %vm6424_vm9 = vmmov %vm6422_vm3 }
 0x2b6   : > { %1098 = vrot.lane.b32.xlu0 %v1081_v3, %s4092_s15  ;;  %v1189_v3 = vsel %vm6419_vm7, %v954_v35, 0  ;;  %v1284_v35 = vld [vmem:[%s6236_s4 + $0x10] sm:$0xff]  ;;  %vm6423_vm7 = vmmov %vm6422_vm3 }
 0x2b7   : > { %1164 = vrot.lane.b32.xlu1 %v1150_v62, %s4094_s19  ;;  %v1283_v62 = vld [vmem:[%s6236_s4 + $0x8] sm:$0xff] }
 0x2ba   : > { %1160 = vrot.lane.b32.xlu0 %v1148_v4, %s4094_s19 }
 0x2bb   : > { %1132 = vrot.lane.b32.xlu1 %v1116_v8, %s4093_s16 }
 0x2be   : > { %1134 = vrot.lane.b32.xlu0 %v1117_v21, %s4093_s16 }
 0x2bf   : > { %1166 = vrot.lane.b32.xlu1 %v1151_v29, %s4094_s19 }
 0x2c2   : > { %1198 = vrot.lane.b32.xlu0 %v1185_v12, %s4095_s24 }
 0x2c3   : > { %1168 = vrot.lane.b32.xlu1 %v1152_v40, %s4094_s19 }
 0x2c6   : > { %1170 = vrot.lane.b32.xlu0 %v1153_v39, %s4094_s19 }
 0x2c7   : > { %1200 = vrot.lane.b32.xlu1 %v1186_v45, %s4095_s24 }
 0x2ca   : > { %1196 = vrot.lane.b32.xlu0 %v1184_v9, %s4095_s24 }
 0x2cb   : > { %1204 = vrot.lane.b32.xlu1 %v1188_v46, %s4095_s24 }
 0x2ce   : > { %1206 = vrot.lane.b32.xlu0 %v1189_v3, %s4095_s24 }
 0x2cf   : > { %1202 = vrot.lane.b32.xlu1 %v1187_v34, %s4095_s24 }
 0x2d2   : > { %1288 = vperm.xlu0 %4013, %v1282_v26  }
 0x2d3   : > { %1293 = vperm.xlu1 %4012, %v1283_v62  }
 0x2d6   : > { %1298 = vperm.xlu0 %4013, %v1284_v35  }
 0x2d7   : > { %1303 = vperm.xlu1 %4012, %v1285_v57  }
 0x2f0   : > { %v977_v4 = vpop.permute.xlu0 %976 }
 0x2f1   : > { %v981_v8 = vpop.permute.xlu1 %980 }
 0x2f4   : > { %v1013_v21 = vpop.permute.xlu0 %1012 }
 0x2f5   : > { %v1017_v29 = vpop.permute.xlu1 %1016 }
 0x2f8   : > { %v1049_v12 = vpop.permute.xlu0 %1048 }
 0x2f9   : > { %v1053_v40 = vpop.permute.xlu1 %1052 }
 0x2fc   : > { %v979_v39 = vpop.permute.xlu0 %978 }
 0x2fd   : > { %v983_v45 = vpop.permute.xlu1 %982  ;;  %v4785_v9 = vsel %vm6421_vm13, %v979_v39, %v981_v8  ;;  %v4788_v46 = vsel %vm6422_vm3, %v977_v4, %v979_v39  ;;  %vm6425_vm13 = vcmask 1031168  }
 0x2fe   : > { %1373 = vmatprep.subr.bf16.mxu1 %v4785_v9  ;;  %vm6426_vm3 = vmmov %vm6425_vm13 }
 0x2ff   : > { %1374 = vmatpush1.bf16.msra.mxu1 %v4788_v46 }
 0x300   : > { %v1015_v3 = vpop.permute.xlu0 %1014 }
 0x301   : > { %v1019_v34 = vpop.permute.xlu1 %1018  ;;  %v4801_v4 = vsel %vm6425_vm13, %v1015_v3, %v1017_v29  ;;  %v4805_v19 = vsel %vm6426_vm3, %v1013_v21, %v1015_v3  ;;  %vm6429_vm13 = vcmask 916480  }
 0x304   : > { %v1051_v26 = vpop.permute.xlu0 %1050 }
 0x305   : > { %v985_v62 = vpop.permute.xlu1 %984  ;;  %v4817_v29 = vsel %vm6429_vm13, %v1051_v26, %v1053_v40  ;;  %v4026_v40 = vld [vmem:[%s6235_s3 + $0x24] ss:$16 sps:$4 sm:$0xff]  }
 0x306   : > { %v4797_v8 = vsel %vm6424_vm9, %v983_v45, %v985_v62  ;;  %vm6428_vm9 = vmmov %vm6426_vm3 }
 0x308   : > { %v987_v35 = vpop.permute.xlu0 %986 }
 0x309   : > { %v4793_v57 = vsel %vm6423_vm7, %v985_v62, %v987_v35  ;;  %v1055_v1 = vpop.permute.xlu1 %1054  ;;  %vm6427_vm7 = vmmov %vm6426_vm3 }
 0x30a   : > { %1375 = vmatprep.subr.bf16.mxu1 %v4793_v57  ;;  %vm6430_vm3 = vmmov %vm6429_vm13  ;;  %vm1344_vm13 = vcmask 392192  }
 0x30b   : > { %1376 = vmatpush1.bf16.msra.mxu1 %v4797_v8  ;;  %v4821_v3 = vsel %vm6430_vm3, %v1049_v12, %v1051_v26 }
 0x30c   : > { %v1091_v39 = vpop.permute.xlu0 %1090  ;;  %1377 = vmatprep.subr.bf16.mxu1 %v4801_v4 }
 0x30d   : > { %v1021_v18 = vpop.permute.xlu1 %1020 }
 0x30e   : > { %v4813_v62 = vsel %vm6428_vm9, %v1019_v34, %v1021_v18  ;;  %vm6432_vm9 = vmmov %vm6430_vm3 }
 0x30f   : > { %1378 = vmatpush1.bf16.msra.mxu1 %v4805_v19 }
 0x310   : > { %v1023_v35 = vpop.permute.xlu0 %1022 }
 0x311   : > { %v4809_v22 = vsel %vm6427_vm7, %v1021_v18, %v1023_v35  ;;  %v1093_v45 = vpop.permute.xlu1 %1092  ;;  %v4023_v35 = vld [vmem:[%s6235_s3] ss:$16 sps:$4 sm:$0xff]   ;;  %vm6431_vm7 = vmmov %vm6430_vm3  ;;  %vm6433_vm3 = vcmask 900096  }
 0x312   : > { %1379 = vmatprep.subr.bf16.mxu1 %v4809_v22 }
 0x313   : > { %1380 = vmatpush1.bf16.msra.mxu1 %v4813_v62 }
 0x314   : > { %v1089_v11 = vpop.permute.xlu0 %1088  ;;  %1381 = vmatprep.subr.bf16.mxu1 %v4817_v29 }
 0x315   : > { %v1057_v21 = vpop.permute.xlu1 %1056 }
 0x316   : > { %v4836_v12 = vsel %vm6432_vm9, %v1055_v1, %v1057_v21  ;;  %vm6437_vm9 = vmmov %vm6433_vm3 }
 0x317   : > { %1382 = vmatpush1.bf16.msra.mxu1 %v4821_v3 }
 0x318   : > { %v1059_v18 = vpop.permute.xlu0 %1058 }
 0x319   : > { %v4828_v34 = vsel %vm6431_vm7, %v1057_v21, %v1059_v18  ;;  %v1095_v10 = vpop.permute.xlu1 %1094  ;;  %vm6435_vm7 = vmmov %vm6433_vm3 }
 0x31a   : > { %1404 = vmatprep.subr.bf16.mxu1 %v4828_v34  ;;  %2021 = vmatprep.subr.bf16.mxu0 %v4828_v34  ;;  %v4861_v14 = vsel %vm6435_vm7, %v1089_v11, %v1091_v39  ;;  %vm6442_vm7 = vmmov %vm6440_vm2 }
 0x31b   : > { %1384 = vmatmul.mubr.bf16.vlgmr.msra.gmra.mrb[8].mxu1 %v4023_v35  ;;  %2022 = vmatpush1.bf16.msra.mxu0 %v4836_v12  ;;  %v4031_v35 = vld [vmem:[%s6235_s3 + $0xc] ss:$16 sps:$4 sm:$0xff]   ;;  %6436 = vst [vmem:[#allocation28_spill] sm:$0xff] %v4861_v14 }
 0x31c   : > { %1405 = vmatpush1.bf16.msra.mxu1 %v4836_v12  ;;  %v1127_v26 = vpop.permute.xlu0 %1126  ;;  %2023 = vmatprep.subr.bf16.mxu0 %v4560_v33 }
 0x31d   : > { %1406 = vmatprep.subr.bf16.mxu1 %v4560_v33  ;;  %v1129_v18 = vpop.permute.xlu1 %1128  ;;  %1393 = vmatprep.mubr.bf16.mxu1 %v4026_v40  ;;  %v4853_v40 = vsel %vm6433_vm3, %v1091_v39, %v1093_v45 }
 0x31e   : > { %6434 = vst [vmem:[#allocation27_spill] sm:$0xff] %v4853_v40 }
 0x31f   : > { %2024 = vmatpush1.bf16.msra.mxu0 %v4558_v27 }
 0x320   : > { %1407 = vmatpush1.bf16.msra.mxu1 %v4558_v27  ;;  %v1125_v1 = vpop.permute.xlu0 %1124  ;;  %2025 = vmatprep.subr.bf16.mxu0 %v4568_v20 }
 0x321   : > { %1408 = vmatprep.subr.bf16.mxu1 %v4568_v20  ;;  %v1131_v21 = vpop.permute.xlu1 %1130 }
 0x323   : > { %2026 = vmatpush1.bf16.msra.mxu0 %v4566_v7  ;;  %1394 = vmatmul.mubr.bf16.gmra.mrb[12].mxu1 %v4028_v15 }
 0x324   : > { %1409 = vmatpush1.bf16.msra.mxu1 %v4566_v7  ;;  %v1163_v6 = vpop.permute.xlu0 %1162  ;;  %2027 = vmatprep.subr.bf16.mxu0 %v4853_v40 }
 0x325   : > { %1410 = vmatprep.subr.bf16.mxu1 %v4853_v40  ;;  %v1097_v5 = vpop.permute.xlu1 %1096  ;;  %3816 = vmatprep.mubr.msk.bf16.mxu1 %vm1344_vm13, %v4031_v35  ;;  %v4874_v35 = vsel %vm6440_vm2, %v1127_v26, %v1129_v18 }
 0x326   : > { %v4871_v0 = vsel %vm6433_vm3, %v1095_v10, %v1097_v5  ;;  %6441 = vst [vmem:[#allocation31_spill] sm:$0xff] %v4874_v35  ;;  %vm6447_vm3 = vcmask 777216  }
 0x327   : > { %2028 = vmatpush1.bf16.msra.mxu0 %v4861_v14  ;;  %6439 = vst [vmem:[#allocation30_spill] sm:$0xff] %v4871_v0 }
 0x328   : > { %1411 = vmatpush1.bf16.msra.mxu1 %v4861_v14  ;;  %v1099_v45 = vpop.permute.xlu0 %1098 }
 0x329   : > { %v4866_v15 = vsel %vm6437_vm9, %v1097_v5, %v1099_v45  ;;  %v1165_v2 = vpop.permute.xlu1 %1164  ;;  %v4881_v45 = vsel %vm6442_vm7, %v1125_v1, %v1127_v26  ;;  %vm6445_vm9 = vmmov %vm6440_vm2 }
 0x32a   : > { %6438 = vst [vmem:[#allocation29_spill] sm:$0xff] %v4866_v15  ;;  %1412 = vmatprep.subr.bf16.mxu1 %v4866_v15  ;;  %2029 = vmatprep.subr.bf16.mxu0 %v4866_v15  ;;  %6443 = vst [vmem:[#allocation32_spill] sm:$0xff] %v4881_v45  ;;  %v4894_v61 = vsel %vm6447_vm3, %v1163_v6, %v1165_v2 }
 0x32b   : > { %2030 = vmatpush1.bf16.msra.mxu0 %v4871_v0  ;;  %6448 = vst [vmem:[#allocation35_spill] sm:$0xff] %v4894_v61  ;;  %vm6449_vm7 = vmmov %vm6447_vm3 }
 0x32c   : > { %1413 = vmatpush1.bf16.msra.mxu1 %v4871_v0  ;;  %v1161_v11 = vpop.permute.xlu0 %1160  ;;  %2031 = vmatprep.subr.bf16.mxu0 %v4874_v35 }
 0x32d   : > { %1414 = vmatprep.subr.bf16.mxu1 %v4874_v35  ;;  %v1133_v39 = vpop.permute.xlu1 %1132 }
 0x32e   : > { %v4891_v13 = vsel %vm6445_vm9, %v1131_v21, %v1133_v39  ;;  %vm6453_vm9 = vcmask 769024  }
 0x32f   : > { %2032 = vmatpush1.bf16.msra.mxu0 %v4881_v45  ;;  %6446 = vst [vmem:[#allocation34_spill] sm:$0xff] %v4891_v13 }
 0x330   : > { %1415 = vmatpush1.bf16.msra.mxu1 %v4881_v45  ;;  %v1135_v5 = vpop.permute.xlu0 %1134 }
 0x331   : > { %v4886_v10 = vsel %vm6440_vm2, %v1133_v39, %v1135_v5  ;;  %v1167_v18 = vpop.permute.xlu1 %1166  ;;  %v4901_v5 = vsel %vm6449_vm7, %v1161_v11, %v1163_v6  ;;  %vm6451_vm2 = vmmov %vm6447_vm3 }
 0x332   : > { %6444 = vst [vmem:[#allocation33_spill] sm:$0xff] %v4886_v10  ;;  %1416 = vmatprep.subr.bf16.mxu1 %v4886_v10  ;;  %2033 = vmatprep.subr.bf16.mxu0 %v4886_v10  ;;  %6450 = vst [vmem:[#allocation36_spill] sm:$0xff] %v4901_v5 }
 0x333   : > { %2034 = vmatpush1.bf16.msra.mxu0 %v4891_v13  ;;  %vm6455_vm3 = vmmov %vm6451_vm2 }
 0x334   : > { %1417 = vmatpush1.bf16.msra.mxu1 %v4891_v13  ;;  %v1199_v26 = vpop.permute.xlu0 %1198  ;;  %2035 = vmatprep.subr.bf16.mxu0 %v4894_v61  ;;  %vm6457_vm7 = vmmov %vm6453_vm9 }
 0x335   : > { %1418 = vmatprep.subr.bf16.mxu1 %v4894_v61  ;;  %v1169_v1 = vpop.permute.xlu1 %1168 }
 0x336   : > { %v4914_v50 = vsel %vm6455_vm3, %v1167_v18, %v1169_v1 }
 0x337   : > { %2036 = vmatpush1.bf16.msra.mxu0 %v4901_v5  ;;  %6456 = vst [vmem:[#allocation39_spill] sm:$0xff] %v4914_v50 }
 0x338   : > { %1419 = vmatpush1.bf16.msra.mxu1 %v4901_v5  ;;  %v1171_v21 = vpop.permute.xlu0 %1170 }
 0x339   : > { %v4906_v2 = vsel %vm6451_vm2, %v1169_v1, %v1171_v21  ;;  %v1201_v39 = vpop.permute.xlu1 %1200  ;;  %vm6459_vm2 = vmmov %vm6457_vm7 }
 0x33a   : > { %6452 = vst [vmem:[#allocation37_spill] sm:$0xff] %v4906_v2  ;;  %v4909_v59 = vsel %vm6453_vm9, %v1199_v26, %v1201_v39  ;;  %1420 = vmatprep.subr.bf16.mxu1 %v4906_v2  ;;  %2037 = vmatprep.subr.bf16.mxu0 %v4906_v2  ;;  %vm6461_vm9 = vmmov %vm6459_vm2 }
 0x33b   : > { %6454 = vst [vmem:[#allocation38_spill] sm:$0xff] %v4909_v59  ;;  %2038 = vmatpush1.bf16.msra.mxu0 %v4914_v50 }
 0x33c   : > { %1421 = vmatpush1.bf16.msra.mxu1 %v4914_v50  ;;  %v1197_v6 = vpop.permute.xlu0 %1196  ;;  %2039 = vmatprep.subr.bf16.mxu0 %v4909_v59 }
 0x33d   : > { %v4920_v11 = vsel %vm6457_vm7, %v1197_v6, %v1199_v26  ;;  %1422 = vmatprep.subr.bf16.mxu1 %v4909_v59  ;;  %v1205_v21 = vpop.permute.xlu1 %1204  ;;  %v4029_v26 = vld [vmem:[%s6235_s3 + $0x8] ss:$16 sps:$4 sm:$0xff]   ;;  %v4032_v6 = vld [vmem:[%s6235_s3 + $0x2c] ss:$16 sps:$4 sm:$0xff]  }
 0x33e   : > { %6458 = vst [vmem:[#allocation40_spill] sm:$0xff] %v4920_v11 }
 0x33f   : > { %2040 = vmatpush1.bf16.msra.mxu0 %v4920_v11 }
 0x340   : > { %1423 = vmatpush1.bf16.msra.mxu1 %v4920_v11  ;;  %v1207_v39 = vpop.permute.xlu0 %1206 }
 0x341   : > { %v4926_v18 = vsel %vm6459_vm2, %v1205_v21, %v1207_v39  ;;  %v1203_v1 = vpop.permute.xlu1 %1202  ;;  %v4037_v39 = vld [vmem:[%s6237_s5 + $0x4] ss:$24 sps:$4 sm:$0xff]  }
 0x342   : > { %6460 = vst [vmem:[#allocation41_spill] sm:$0xff] %v4926_v18  ;;  %v4929_v58 = vsel %vm6461_vm9, %v1203_v1, %v1205_v21  ;;  %1424 = vmatprep.subr.bf16.mxu1 %v4926_v18  ;;  %2041 = vmatprep.subr.bf16.mxu0 %v4926_v18  ;;  %v4034_v21 = vld [vmem:[%s6235_s3 + $0x28] ss:$16 sps:$4 sm:$0xff]   ;;  %v4959_v1 = vld [vmem:[%s4178_s22 + $0x4] ss:$8 sps:$4 sm:$0xff]  }
 0x343   : > { %6462 = vst [vmem:[#allocation42_spill] sm:$0xff] %v4929_v58  ;;  %2042 = vmatpush1.bf16.msra.mxu0 %v4929_v58 }
 0x344   : > { %1425 = vmatpush1.bf16.msra.mxu1 %v4929_v58 }
 0x345   : > { %3870 = vmatprep.subr.msk.bf16.mxu1 %vm4276_vm6, %v4287_v48 }
 0x347   : > { %1437 = vmatmul.mubr.bf16.vlgmr.msra.gmra.mrb[8].mxu1 %v4029_v26  ;;  %v4963_v26 = vld [vmem:[%s4178_s22] ss:$8 sps:$4 sm:$0xff]  }
 0x348   : > { %1969 = vmatpush1.bf16.msra.mxu1 %v4303_v51  ;;  %3817 = vmatprep.mubr.msk.bf16.mxu1 %vm1344_vm13, %v4032_v6  ;;  %v4035_v6 = vld [vmem:[%s6237_s5] ss:$24 sps:$4 sm:$0xff]  }
 0x349   : > { %1970 = vmatprep.subr.bf16.mxu1 %v4474_v38 }
 0x34c   : > { %1971 = vmatpush1.bf16.msra.mxu1 %v4471_v37 }
 0x34d   : > { %1972 = vmatprep.subr.bf16.mxu1 %v4482_v52 }
 0x34f   : > { %1447 = vmatmul.mubr.bf16.gmra.mrb[12].mxu1 %v4034_v21  ;;  %v4038_v21 = vld [vmem:[%s6237_s5 + $0x34] ss:$24 sps:$4 sm:$0xff]  }
 0x350   : > { %1973 = vmatpush1.bf16.msra.mxu1 %v4479_v49  ;;  %2000 = vmatprep.mubr.bf16.mxu1 %v4037_v39  ;;  %v2447_v39 = vld [vmem:[%s6239_s7] sm:$0xff] }
 0x351   : > { %1974 = vmatprep.subr.bf16.mxu1 %v4485_v56 }
 0x354   : > { %1975 = vmatpush1.bf16.msra.mxu1 %v4491_v63 }
 0x355   : > { %1976 = vmatprep.subr.bf16.mxu1 %v4959_v1 }
 0x358   : > { %1977 = vmatpush1.bf16.msra.mxu1 %v4963_v26 }
 0x359   : > { %1978 = vmatprep.subr.bf16.mxu1 %v4500_v17 }
 0x35c   : > { %1979 = vmatpush1.bf16.msra.mxu1 %v4497_v16 }
 0x35d   : > { %1980 = vmatprep.subr.bf16.mxu1 %v4505_v23 }
 0x360   : > { %1981 = vmatpush1.bf16.msra.mxu1 %v4508_v24 }
 0x361   : > { %1982 = vmatprep.subr.bf16.mxu1 %v4512_v25 }
 0x364   : > { %1983 = vmatpush1.bf16.msra.mxu1 %v4517_v28 }
 0x365   : > { %1984 = vmatprep.subr.bf16.mxu1 %v4524_v32 }
 0x368   : > { %1985 = vmatpush1.bf16.msra.mxu1 %v4521_v31 }
 0x369   : > { %3871 = vmatprep.subr.msk.bf16.mxu1 %vm4276_vm6, %v4578_v30 }
 0x36c   : > { %1987 = vmatpush1.bf16.msra.mxu1 %v4589_v36 }
 0x36d   : > { %3872 = vmatprep.subr.msk.bf16.mxu1 %vm4276_vm6, %v4612_v42 }
 0x370   : > { %1989 = vmatpush1.bf16.msra.mxu1 %v4620_v53 }
 0x371   : > { %1990 = vmatprep.subr.bf16.mxu1 %v4785_v9 }
 0x374   : > { %1991 = vmatpush1.bf16.msra.mxu1 %v4788_v46 }
 0x375   : > { %1992 = vmatprep.subr.bf16.mxu1 %v4793_v57 }
 0x378   : > { %1993 = vmatpush1.bf16.msra.mxu1 %v4797_v8 }
 0x379   : > { %1994 = vmatprep.subr.bf16.mxu1 %v4801_v4 }
 0x37c   : > { %1995 = vmatpush1.bf16.msra.mxu1 %v4805_v19 }
 0x37d   : > { %1996 = vmatprep.subr.bf16.mxu1 %v4809_v22 }
 0x380   : > { %1997 = vmatpush1.bf16.msra.mxu1 %v4813_v62 }
 0x381   : > { %1998 = vmatprep.subr.bf16.mxu1 %v4817_v29 }
 0x384   : > { %1999 = vmatpush1.bf16.msra.mxu1 %v4821_v3 }
 0x385   : > { %3875 = vmatprep.subr.msk.bf16.mxu1 %vm4276_vm6, %v4287_v48 }
 0x387   : > { %2001 = vmatmul.mubr.bf16.vlgmr.msra.gmra.mrb[16].mxu1 %v4035_v6  ;;  %v3833_v6 = vcombine.high %v2447_v39, %v2451_v60 }
 0x388   : > { %2699 = vmatpush1.bf16.msra.mxu1 %v4303_v51  ;;  %2010 = vmatprep.mubr.bf16.mxu1 %v4038_v21 }
 0x389   : > { %2700 = vmatprep.subr.bf16.mxu1 %v4474_v38 }
 0x38c   : > { %2701 = vmatpush1.bf16.msra.mxu1 %v4471_v37 }
 0x38d   : > { %2702 = vmatprep.subr.bf16.mxu1 %v4482_v52 }
 0x38f   : > { %2011 = vmatmul.mubr.bf16.gmra.mrb[20].mxu1 %v4040_v54  ;;  %v3832_v54 = vcombine.low %v2447_v39, %v2451_v60  ;;  %v1289_v60 = vpop.permute.xlu0 %1288 }
 0x390   : > { %2703 = vmatpush1.bf16.msra.mxu1 %v4479_v49  ;;  %2730 = vmatprep.mubr.bf16.mxu1 %v3833_v6 }
 0x391   : > { %2704 = vmatprep.subr.bf16.mxu1 %v4485_v56 }
 0x394   : > { %2705 = vmatpush1.bf16.msra.mxu1 %v4491_v63 }
 0x395   : > { %2706 = vmatprep.subr.bf16.mxu1 %v4959_v1 }
 0x398   : > { %2707 = vmatpush1.bf16.msra.mxu1 %v4963_v26 }
 0x399   : > { %2708 = vmatprep.subr.bf16.mxu1 %v4500_v17 }
 0x39c   : > { %2709 = vmatpush1.bf16.msra.mxu1 %v4497_v16 }
 0x39d   : > { %2710 = vmatprep.subr.bf16.mxu1 %v4505_v23 }
 0x3a0   : > { %2711 = vmatpush1.bf16.msra.mxu1 %v4508_v24 }
 0x3a1   : > { %2712 = vmatprep.subr.bf16.mxu1 %v4512_v25 }
 0x3a4   : > { %2713 = vmatpush1.bf16.msra.mxu1 %v4517_v28 }
 0x3a5   : > { %2714 = vmatprep.subr.bf16.mxu1 %v4524_v32 }
 0x3a8   : > { %2715 = vmatpush1.bf16.msra.mxu1 %v4521_v31 }
 0x3a9   : > { %3876 = vmatprep.subr.msk.bf16.mxu1 %vm4276_vm6, %v4578_v30 }
 0x3ac   : > { %2717 = vmatpush1.bf16.msra.mxu1 %v4589_v36 }
 0x3ad   : > { %3877 = vmatprep.subr.msk.bf16.mxu1 %vm4276_vm6, %v4612_v42 }
 0x3b0   : > { %2719 = vmatpush1.bf16.msra.mxu1 %v4620_v53 }
 0x3b1   : > { %2720 = vmatprep.subr.bf16.mxu1 %v4785_v9 }
 0x3b4   : > { %2721 = vmatpush1.bf16.msra.mxu1 %v4788_v46 }
 0x3b5   : > { %2722 = vmatprep.subr.bf16.mxu1 %v4793_v57 }
 0x3b8   : > { %2723 = vmatpush1.bf16.msra.mxu1 %v4797_v8 }
 0x3b9   : > { %2724 = vmatprep.subr.bf16.mxu1 %v4801_v4 }
 0x3bc   : > { %2725 = vmatpush1.bf16.msra.mxu1 %v4805_v19 }
 0x3bd   : > { %2726 = vmatprep.subr.bf16.mxu1 %v4809_v22 }
 0x3c0   : > { %2727 = vmatpush1.bf16.msra.mxu1 %v4813_v62 }
 0x3c1   : > { %2728 = vmatprep.subr.bf16.mxu1 %v4817_v29 }
 0x3c4   : > { %2729 = vmatpush1.bf16.msra.mxu1 %v4821_v3 }
 0x3c5   : > { %2751 = vmatprep.subr.bf16.mxu1 %v4828_v34 }
 0x3c7   : > { %2731 = vmatmul.mubr.bf16.vlgmr.msra.gmra.mrb[24].mxu1 %v3832_v54  ;;  %v1294_v54 = vpop.permute.xlu1 %1293 }
 0x3c8   : > { %2752 = vmatpush1.bf16.msra.mxu1 %v4836_v12 }
 0x3c9   : > { %2753 = vmatprep.subr.bf16.mxu1 %v4560_v33 }
 0x3cc   : > { %2754 = vmatpush1.bf16.msra.mxu1 %v4558_v27 }
 0x3cd   : > { %2755 = vmatprep.subr.bf16.mxu1 %v4568_v20 }
 0x3d0   : > { %2756 = vmatpush1.bf16.msra.mxu1 %v4566_v7 }
 0x3d1   : > { %2757 = vmatprep.subr.bf16.mxu1 %v4853_v40  ;;  %v1304_v40 = vpop.permute.xlu1 %1303 }
 0x3d4   : > { %2758 = vmatpush1.bf16.msra.mxu1 %v4861_v14 }
 0x3d5   : > { %2759 = vmatprep.subr.bf16.mxu1 %v4866_v15 }
 0x3d8   : > { %2760 = vmatpush1.bf16.msra.mxu1 %v4871_v0 }
 0x3d9   : > { %2761 = vmatprep.subr.bf16.mxu1 %v4874_v35  ;;  %v1299_v35 = vpop.permute.xlu0 %1298 }
 0x3dc   : > { %2762 = vmatpush1.bf16.msra.mxu1 %v4881_v45 }
 0x3dd   : > { %2763 = vmatprep.subr.bf16.mxu1 %v4886_v10 }
 0x3e0   : > { %2764 = vmatpush1.bf16.msra.mxu1 %v4891_v13 }
 0x3e1   : > { %2765 = vmatprep.subr.bf16.mxu1 %v4894_v61 }
 0x3e4   : > { %2766 = vmatpush1.bf16.msra.mxu1 %v4901_v5 }
 0x3e5   : > { %2767 = vmatprep.subr.bf16.mxu1 %v4906_v2 }
 0x3e8   : > { %2768 = vmatpush1.bf16.msra.mxu1 %v4914_v50 }
 0x3e9   : > { %2769 = vmatprep.subr.bf16.mxu1 %v4909_v59 }
 0x3ec   : > { %2770 = vmatpush1.bf16.msra.mxu1 %v4920_v11 }
 0x3ed   : > { %2771 = vmatprep.subr.bf16.mxu1 %v4926_v18 }
 0x3f0   : > { %2772 = vmatpush1.bf16.msra.mxu1 %v4929_v58 }
 0x41a   : > { %v1438_v21 = vpop.f32.mrb[8].mxu1 }
 0x41b   : > { %v3891_v39 = vadd.f32 %v1438_v21, %v1289_v60  ;;  %v1440_v6 = vpop.f32.mrb[9].mxu1 }
 0x41c   : > { %v3892_v61 = vadd.f32 %v1440_v6, %v1289_v60  ;;  %v1442_v13 = vpop.f32.mrb[10].mxu1 }
 0x41d   : > { %v1465_v5 = vmul.f32 0.01, %v3891_v39  ;;  %v3893_v10 = vadd.f32 %v1442_v13, %v1294_v54  ;;  %v1444_v2 = vpop.f32.mrb[11].mxu1  ;;  %vm1457_vm13 = vcmp.ge.f32.partialorder %v3891_v39, 0.0 }
 0x41e   : > { %v1466_v50 = vmul.f32 0.01, %v3892_v61  ;;  %v3894_v45 = vadd.f32 %v1444_v2, %v1294_v54  ;;  %vm1458_vm3 = vcmp.ge.f32.partialorder %v3892_v61, 0.0 }
 0x41f   : > { %vm1459_vm7 = vcmp.ge.f32.partialorder %v3893_v10, 0.0  ;;  %v1467_v11 = vmul.f32 0.01, %v3893_v10  ;;  %v1473_v59 = vsel %vm1457_vm13, %v3891_v39, %v1465_v5 }
 0x420   : > { %vm1460_vm2 = vcmp.ge.f32.partialorder %v3894_v45, 0.0  ;;  %v1468_v18 = vmul.f32 0.01, %v3894_v45  ;;  %v1474_v0 = vsel %vm1458_vm3, %v3892_v61, %v1466_v50 }
 0x421   : > { %v1475_v58 = vsel %vm1459_vm7, %v3893_v10, %v1467_v11 }
 0x422   : > { %v5067_v21 = vpack.c.bf16 %v1475_v58, %v1473_v59  ;;  %v1476_v15 = vsel %vm1460_vm2, %v3894_v45, %v1468_v18  ;;  %v1448_v60 = vpop.f32.mrb[12].mxu1 }
 0x423   : > { %v5069_v6 = vpack.c.bf16 %v1476_v15, %v1474_v0  ;;  %v3895_v13 = vadd.f32 %v1448_v60, %v1299_v35  ;;  %v1450_v14 = vpop.f32.mrb[13].mxu1 }
 0x424   : > { %6463 = vst [vmem:[#allocation43_spill] sm:$0xff] %v5067_v21  ;;  %v3896_v7 = vadd.f32 %v1450_v14, %v1299_v35  ;;  %v1452_v2 = vpop.f32.mrb[14].mxu1  ;;  %1489 = vrot.lane.b32.xlu0 %v5067_v21, %s4081_s23 }
 0x425   : > { %6464 = vst [vmem:[#allocation44_spill] sm:$0xff] %v5069_v6  ;;  %v1469_v54 = vmul.f32 0.01, %v3895_v13  ;;  %v3897_v20 = vadd.f32 %v1452_v2, %v1304_v40  ;;  %v1454_v5 = vpop.f32.mrb[15].mxu1  ;;  %1491 = vrot.lane.b32.xlu1 %v5069_v6, %s4081_s23  ;;  %vm1461_vm9 = vcmp.ge.f32.partialorder %v3895_v13, 0.0 }
 0x426   : > { %v1470_v50 = vmul.f32 0.01, %v3896_v7  ;;  %v3898_v58 = vadd.f32 %v1454_v5, %v1304_v40  ;;  %vm1462_vm13 = vcmp.ge.f32.partialorder %v3896_v7, 0.0 }
 0x427   : > { %vm1463_vm3 = vcmp.ge.f32.partialorder %v3897_v20, 0.0  ;;  %v1471_v59 = vmul.f32 0.01, %v3897_v20  ;;  %v1477_v0 = vsel %vm1461_vm9, %v3895_v13, %v1469_v54 }
 0x428   : > { %vm1464_vm7 = vcmp.ge.f32.partialorder %v3898_v58, 0.0  ;;  %v1472_v61 = vmul.f32 0.01, %v3898_v58  ;;  %v1478_v15 = vsel %vm1462_vm13, %v3896_v7, %v1470_v50  ;;  %vm6475_vm13 = vcmp.ne.s16.totalorder %v6474_v41, 0 }
 0x429   : > { %v1479_v14 = vsel %vm1463_vm3, %v3897_v20, %v1471_v59 }
 0x42a   : > { %v5075_v35 = vpack.c.bf16 %v1479_v14, %v1477_v0  ;;  %v1480_v45 = vsel %vm1464_vm7, %v3898_v58, %v1472_v61 }
 0x42b   : > { %v5077_v10 = vpack.c.bf16 %v1480_v45, %v1478_v15 }
 0x42c   : > { %6465 = vst [vmem:[#allocation45_spill] sm:$0xff] %v5075_v35  ;;  %1493 = vrot.lane.b32.xlu0 %v5075_v35, %s4081_s23 }
 0x42d   : > { %6466 = vst [vmem:[#allocation46_spill] sm:$0xff] %v5077_v10  ;;  %1495 = vrot.lane.b32.xlu1 %v5077_v10, %s4081_s23 }
 0x496   : > { %v1490_v40 = vpop.permute.xlu0 %1489 }
 0x497   : > { %v5084_v11 = vsel %vm447_vm1, 0, %v1490_v40  ;;  %v1492_v18 = vpop.permute.xlu1 %1491 }
 0x498   : > { %v5087_v39 = vsel %vm447_vm1, %v1490_v40, %v1492_v18  ;;  %v5090_v7 = vsel %vm447_vm1, %v1492_v18, 0  ;;  %v1521_v20 = vsel %vm498_vm4, %v5084_v11, 0  ;;  %v5098_v60 = vsel %vm4272_vm5, %v5084_v11, 0  ;;  %v6470_v18 = vld [vmem:[#allocation6_spill] sm:$0xff] }
 0x499   : > { %1533 = vrot.lane.b32.xlu0 %v1521_v20, %s4089_s12  ;;  %3873 = vmatprep.subr.msk.bf16.mxu0 %vm4276_vm6, %v5087_v39  ;;  %v1523_v13 = vsel %vm500_vm8, %v5090_v7, 0  ;;  %v1557_v2 = vsel %vm540_vm11, %v5084_v11, 0  ;;  %v1559_v5 = vsel %vm542_vm10, %v5090_v7, 0  ;;  %v1593_v14 = vsel %vm582_vm15, %v5084_v11, 0 }
 0x49a   : > { %3878 = vmatprep.subr.msk.bf16.mxu1 %vm4276_vm6, %v5087_v39  ;;  %1537 = vrot.lane.b32.xlu1 %v1523_v13, %s4089_s12  ;;  %v1595_v40 = vsel %vm584_vm14, %v5090_v7, 0  ;;  %vm6471_vm2 = vcmp.ne.s16.totalorder %v6470_v18, 0  ;;  %v1671_v41 = vsel %vm672_vm0, %v5090_v7, 0 }
 0x49b   : > { %2044 = vmatpush1.bf16.msra.mxu0 %v5098_v60  ;;  %2774 = vmatpush1.bf16.msra.mxu1 %v5098_v60  ;;  %v1522_v20 = vsel %vm6471_vm2, %v5087_v39, 0  ;;  %vm6476_vm3 = vmmov %vm6471_vm2 }
 0x49d   : > { %1569 = vrot.lane.b32.xlu0 %v1557_v2, %s4090_s13  ;;  %v2455_v2 = vld [vmem:[%s6239_s7 + $0x40] sm:$0xff] }
 0x49e   : > { %v1494_v50 = vpop.permute.xlu0 %1493  ;;  %1573 = vrot.lane.b32.xlu1 %v1559_v5, %s4090_s13  ;;  %v2459_v5 = vld [vmem:[%s6239_s7 + $0x60] sm:$0xff] }
 0x49f   : > { %v5122_v58 = vsel %vm447_vm1, 0, %v1494_v50  ;;  %v1496_v59 = vpop.permute.xlu1 %1495 }
 0x4a0   : > { %v5125_v61 = vsel %vm447_vm1, %v1494_v50, %v1496_v59  ;;  %v5133_v15 = vsel %vm4272_vm5, %v5122_v58, 0  ;;  %v1524_v13 = vsel %vm498_vm4, %v5122_v58, 0  ;;  %v3841_v50 = vcombine.high %v2455_v2, %v2459_v5 }
 0x4a1   : > { %1605 = vrot.lane.b32.xlu0 %v1593_v14, %s4091_s14  ;;  %3874 = vmatprep.subr.msk.bf16.mxu0 %vm4276_vm6, %v5125_v61  ;;  %v3840_v14 = vcombine.low %v2455_v2, %v2459_v5  ;;  %v1560_v43 = vsel %vm540_vm11, %v5122_v58, 0  ;;  %v4043_v2 = vld [vmem:[%s6237_s5 + $0xc] ss:$24 sps:$4 sm:$0xff]   ;;  %v5177_v5 = vsel %vm447_vm1, %v1496_v59, 0  ;;  %v1596_v18 = vsel %vm582_vm15, %v5122_v58, 0 }
 0x4a2   : > { %3879 = vmatprep.subr.msk.bf16.mxu1 %vm4276_vm6, %v5125_v61  ;;  %1609 = vrot.lane.b32.xlu1 %v1595_v40, %s4091_s14  ;;  %v6472_v40 = vld [vmem:[#allocation10_spill] sm:$0xff] }
 0x4a3   : > { %2046 = vmatpush1.bf16.msra.mxu0 %v5133_v15  ;;  %2776 = vmatpush1.bf16.msra.mxu1 %v5133_v15  ;;  %vm6473_vm9 = vcmp.ne.s16.totalorder %v6472_v40, 0 }
 0x4a4   : > { %2740 = vmatprep.mubr.bf16.mxu1 %v3841_v50  ;;  %v1525_v50 = vsel %vm6476_vm3, %v5125_v61, 0  ;;  %2053 = vmatprep.mubr.bf16.mxu0 %v4043_v2  ;;  %vm6478_vm7 = vmmov %vm6473_vm9 }
 0x4a5   : > { %1535 = vrot.lane.b32.xlu0 %v1522_v20, %s4089_s12  ;;  %v1558_v20 = vsel %vm6473_vm9, %v5087_v39, 0  ;;  %2741 = vmatmul.mubr.bf16.gmra.mrb[28].mxu1 %v3840_v14  ;;  %v5191_v14 = vld [vmem:[%s6239_s7 + $0x28] sm:$0xff]  ;;  %v1561_v59 = vsel %vm6478_vm7, %v5125_v61, 0 }
 0x4a6   : > { %1539 = vrot.lane.b32.xlu1 %v1524_v13, %s4089_s12  ;;  %v1594_v13 = vsel %vm6475_vm13, %v5087_v39, 0 }
 0x4a9   : > { %1571 = vrot.lane.b32.xlu0 %v1558_v20, %s4090_s13 }
 0x4aa   : > { %1575 = vrot.lane.b32.xlu1 %v1560_v43, %s4090_s13  ;;  %v5186_v43 = vld [vmem:[%s6239_s7 + $0x8] sm:$0xff] }
 0x4ab   : > { %v3835_v20 = vcombine.high %v5186_v43, %v5191_v14 }
 0x4ad   : > { %1607 = vrot.lane.b32.xlu0 %v1594_v13, %s4091_s14  ;;  %v1526_v13 = vsel %vm500_vm8, %v5177_v5, 0  ;;  %2783 = vmatprep.mubr.bf16.mxu1 %v3835_v20  ;;  %v1562_v20 = vsel %vm542_vm10, %v5177_v5, 0 }
 0x4ae   : > { %1541 = vrot.lane.b32.xlu1 %v1525_v50, %s4089_s12  ;;  %v1634_v50 = vsel %vm629_vm12, %v5087_v39, 0 }
 0x4b1   : > { %1543 = vrot.lane.b32.xlu0 %v1526_v13, %s4089_s12 }
 0x4b2   : > { %1611 = vrot.lane.b32.xlu1 %v1596_v18, %s4091_s14  ;;  %v6479_v18 = vld [vmem:[#allocation13_spill] sm:$0xff] }
 0x4b3   : > { %vm6480_vm2 = vcmp.ne.s16.totalorder %v6479_v18, 0 }
 0x4b4   : > { %v1635_v13 = vsel %vm6480_vm2, %v5090_v7, 0 }
 0x4b5   : > { %1647 = vrot.lane.b32.xlu0 %v1634_v50, %s4092_s15  ;;  %v6481_v50 = vld [vmem:[#allocation14_spill] sm:$0xff] }
 0x4b6   : > { %1577 = vrot.lane.b32.xlu1 %v1561_v59, %s4090_s13  ;;  %vm6482_vm9 = vcmp.ne.s16.totalorder %v6481_v50, 0  ;;  %v1597_v59 = vsel %vm6475_vm13, %v5125_v61, 0 }
 0x4b7   : > { %v1633_v0 = vsel %vm6482_vm9, %v5084_v11, 0  ;;  %vm6483_vm3 = vmmov %vm6482_vm9 }
 0x4b9   : > { %1579 = vrot.lane.b32.xlu0 %v1562_v20, %s4090_s13  ;;  %v1598_v20 = vsel %vm584_vm14, %v5177_v5, 0 }
 0x4ba   : > { %1649 = vrot.lane.b32.xlu1 %v1635_v13, %s4092_s15  ;;  %v1636_v13 = vsel %vm6483_vm3, %v5122_v58, 0  ;;  %vm6492_vm3 = vcmp.ne.s16.totalorder %v6479_v18, 0 }
 0x4bd   : > { %1645 = vrot.lane.b32.xlu0 %v1633_v0, %s4092_s15  ;;  %v6484_v0 = vld [vmem:[#allocation20_spill] sm:$0xff] }
 0x4be   : > { %1613 = vrot.lane.b32.xlu1 %v1597_v59, %s4091_s14  ;;  %vm6485_vm7 = vcmp.ne.s16.totalorder %v6484_v0, 0 }
 0x4bf   : > { %v1670_v40 = vsel %vm6485_vm7, %v5087_v39, 0 }
 0x4c1   : > { %1615 = vrot.lane.b32.xlu0 %v1598_v20, %s4091_s14  ;;  %v6487_v20 = vld [vmem:[#allocation16_spill] sm:$0xff] }
 0x4c2   : > { %1651 = vrot.lane.b32.xlu1 %v1636_v13, %s4092_s15  ;;  %vm6488_vm2 = vcmp.ne.s16.totalorder %v6487_v20, 0 }
 0x4c3   : > { %v1669_v45 = vsel %vm6488_vm2, %v5084_v11, 0  ;;  %vm6489_vm9 = vmmov %vm6488_vm2 }
 0x4c4   : > { %v1672_v13 = vsel %vm6489_vm9, %v5122_v58, 0  ;;  %vm6497_vm9 = vcmp.ne.s16.totalorder %v6484_v0, 0 }
 0x4c5   : > { %1683 = vrot.lane.b32.xlu0 %v1670_v40, %s4093_s16  ;;  %v6490_v40 = vld [vmem:[#allocation21_spill] sm:$0xff] }
 0x4c6   : > { %1685 = vrot.lane.b32.xlu1 %v1671_v41, %s4093_s16  ;;  %vm6491_vm13 = vcmp.ne.s16.totalorder %v6490_v40, 0  ;;  %v1637_v41 = vsel %vm629_vm12, %v5125_v61, 0 }
 0x4c7   : > { %v1706_v50 = vsel %vm6491_vm13, %v5087_v39, 0 }
 0x4c9   : > { %1681 = vrot.lane.b32.xlu0 %v1669_v45, %s4093_s16  ;;  %v1638_v45 = vsel %vm6492_vm3, %v5177_v5, 0 }
 0x4ca   : > { %1687 = vrot.lane.b32.xlu1 %v1672_v13, %s4093_s16  ;;  %v6493_v13 = vld [vmem:[#allocation17_spill] sm:$0xff] }
 0x4cb   : > { %vm6494_vm7 = vcmp.ne.s16.totalorder %v6493_v13, 0 }
 0x4cc   : > { %v1707_v20 = vsel %vm6494_vm7, %v5090_v7, 0  ;;  %vm6501_vm7 = vcmp.ne.s16.totalorder %v6490_v40, 0 }
 0x4cd   : > { %1719 = vrot.lane.b32.xlu0 %v1706_v50, %s4094_s19  ;;  %v6495_v50 = vld [vmem:[#allocation18_spill] sm:$0xff] }
 0x4ce   : > { %1653 = vrot.lane.b32.xlu1 %v1637_v41, %s4092_s15  ;;  %vm6496_vm2 = vcmp.ne.s16.totalorder %v6495_v50, 0  ;;  %v1673_v41 = vsel %vm6497_vm9, %v5125_v61, 0 }
 0x4cf   : > { %v1705_v54 = vsel %vm6496_vm2, %v5084_v11, 0  ;;  %vm6498_vm13 = vmmov %vm6496_vm2  ;;  %vm6502_vm2 = vcmp.ne.s16.totalorder %v6493_v13, 0 }
 0x4d1   : > { %1655 = vrot.lane.b32.xlu0 %v1638_v45, %s4092_s15  ;;  %v1674_v45 = vsel %vm672_vm0, %v5177_v5, 0 }
 0x4d2   : > { %1721 = vrot.lane.b32.xlu1 %v1707_v20, %s4094_s19  ;;  %v1708_v20 = vsel %vm6498_vm13, %v5122_v58, 0 }
 0x4d5   : > { %1717 = vrot.lane.b32.xlu0 %v1705_v54, %s4094_s19  ;;  %v6499_v54 = vld [vmem:[#allocation24_spill] sm:$0xff] }
 0x4d6   : > { %1689 = vrot.lane.b32.xlu1 %v1673_v41, %s4093_s16  ;;  %vm6500_vm3 = vcmp.ne.s16.totalorder %v6499_v54, 0  ;;  %v1709_v41 = vsel %vm6501_vm7, %v5125_v61, 0 }
 0x4d7   : > { %v1742_v18 = vsel %vm6500_vm3, %v5087_v39, 0 }
 0x4d9   : > { %1691 = vrot.lane.b32.xlu0 %v1674_v45, %s4093_s16  ;;  %v1710_v45 = vsel %vm6502_vm2, %v5177_v5, 0 }
 0x4da   : > { %1723 = vrot.lane.b32.xlu1 %v1708_v20, %s4094_s19  ;;  %v6503_v20 = vld [vmem:[#allocation23_spill] sm:$0xff] }
 0x4db   : > { %vm6504_vm9 = vcmp.ne.s16.totalorder %v6503_v20, 0 }
 0x4dc   : > { %v1743_v50 = vsel %vm6504_vm9, %v5090_v7, 0  ;;  %vm6507_vm7 = vmmov %vm6504_vm9  ;;  %vm6517_vm9 = vcmask 1039360  }
 0x4dd   : > { %1755 = vrot.lane.b32.xlu0 %v1742_v18, %s4095_s24  ;;  %v6505_v18 = vld [vmem:[#allocation22_spill] sm:$0xff] }
 0x4de   : > { %1725 = vrot.lane.b32.xlu1 %v1709_v41, %s4094_s19  ;;  %vm6506_vm13 = vcmp.ne.s16.totalorder %v6505_v18, 0  ;;  %v1745_v41 = vsel %vm6500_vm3, %v5125_v61, 0  ;;  %v1882_v18 = vld [vmem:[%s6238_s6 + $0x18] sm:$0xff]  ;;  %vm6520_vm3 = vmmov %vm6517_vm9 }
 0x4df   : > { %v1741_v59 = vsel %vm6506_vm13, %v5084_v11, 0  ;;  %vm6508_vm2 = vmmov %vm6506_vm13  ;;  %v1879_v11 = vld [vmem:[%s6238_s6] sm:$0xff] }
 0x4e0   : > { %v1744_v7 = vsel %vm6508_vm2, %v5122_v58, 0  ;;  %v1881_v58 = vld [vmem:[%s6238_s6 + $0x10] sm:$0xff]  ;;  %vm6518_vm13 = vmmov %vm6517_vm9  ;;  %vm6523_vm2 = vcmask 1031168  }
 0x4e1   : > { %1727 = vrot.lane.b32.xlu0 %v1710_v45, %s4094_s19  ;;  %v1746_v45 = vsel %vm6507_vm7, %v5177_v5, 0  ;;  %vm6521_vm7 = vmmov %vm6520_vm3 }
 0x4e2   : > { %1757 = vrot.lane.b32.xlu1 %v1743_v50, %s4095_s24  ;;  %v1880_v50 = vld [vmem:[%s6238_s6 + $0x8] sm:$0xff] }
 0x4e5   : > { %1753 = vrot.lane.b32.xlu0 %v1741_v59, %s4095_s24  ;;  %v5321_v59 = vpop.f32.mrb[16].mxu1 }
 0x4e6   : > { %1761 = vrot.lane.b32.xlu1 %v1745_v41, %s4095_s24  ;;  %6509 = vst [vmem:[#allocation47_spill] sm:$0xff] %v5321_v59  ;;  %v5326_v41 = vpop.f32.mrb[17].mxu1 }
 0x4e7   : > { %6510 = vst [vmem:[#allocation48_spill] sm:$0xff] %v5326_v41  ;;  %v5328_v5 = vpop.f32.mrb[18].mxu1 }
 0x4e8   : > { %6511 = vst [vmem:[#allocation49_spill] sm:$0xff] %v5328_v5 }
 0x4e9   : > { %1763 = vrot.lane.b32.xlu0 %v1746_v45, %s4095_s24  ;;  %v5330_v45 = vpop.f32.mrb[19].mxu1 }
 0x4ea   : > { %1759 = vrot.lane.b32.xlu1 %v1744_v7, %s4095_s24  ;;  %6512 = vst [vmem:[#allocation50_spill] sm:$0xff] %v5330_v45  ;;  %v5335_v7 = vpop.f32.mrb[20].mxu1 }
 0x4eb   : > { %6513 = vst [vmem:[#allocation51_spill] sm:$0xff] %v5335_v7  ;;  %v5340_v20 = vpop.f32.mrb[21].mxu1 }
 0x4ec   : > { %6514 = vst [vmem:[#allocation52_spill] sm:$0xff] %v5340_v20  ;;  %v5342_v54 = vpop.f32.mrb[22].mxu1 }
 0x4ed   : > { %1885 = vperm.xlu0 %4013, %v1879_v11   ;;  %6515 = vst [vmem:[#allocation53_spill] sm:$0xff] %v5342_v54  ;;  %v5344_v13 = vpop.f32.mrb[23].mxu1 }
 0x4ee   : > { %1890 = vperm.xlu1 %4012, %v1880_v50   ;;  %6516 = vst [vmem:[#allocation54_spill] sm:$0xff] %v5344_v13 }
 0x4f1   : > { %1895 = vperm.xlu0 %4013, %v1881_v58  }
 0x4f2   : > { %1900 = vperm.xlu1 %4012, %v1882_v18  }
 0x50b   : > { %v1534_v11 = vpop.permute.xlu0 %1533 }
 0x50c   : > { %v1538_v50 = vpop.permute.xlu1 %1537 }
 0x50f   : > { %v1570_v40 = vpop.permute.xlu0 %1569 }
 0x510   : > { %v1574_v0 = vpop.permute.xlu1 %1573 }
 0x513   : > { %v1606_v2 = vpop.permute.xlu0 %1605 }
 0x514   : > { %v1610_v55 = vpop.permute.xlu1 %1609 }
 0x517   : > { %v1536_v47 = vpop.permute.xlu0 %1535 }
 0x518   : > { %v1540_v7 = vpop.permute.xlu1 %1539  ;;  %v5347_v45 = vsel %vm6517_vm9, %v1536_v47, %v1538_v50  ;;  %v5350_v5 = vsel %vm6518_vm13, %v1534_v11, %v1536_v47  ;;  %vm6525_vm9 = vmmov %vm6523_vm2 }
 0x519   : > { %6519 = vst [vmem:[#allocation55_spill] sm:$0xff] %v5350_v5  ;;  %2047 = vmatprep.subr.bf16.mxu0 %v5347_v45  ;;  %2777 = vmatprep.subr.bf16.mxu1 %v5347_v45  ;;  %vm6527_vm13 = vmmov %vm6523_vm2 }
 0x51a   : > { %2048 = vmatpush1.bf16.msra.mxu0 %v5350_v5  ;;  %2778 = vmatpush1.bf16.msra.mxu1 %v5350_v5 }
 0x51b   : > { %v1572_v18 = vpop.permute.xlu0 %1571 }
 0x51c   : > { %v1576_v58 = vpop.permute.xlu1 %1575  ;;  %v5367_v11 = vsel %vm6523_vm2, %v1572_v18, %v1574_v0  ;;  %v5372_v5 = vsel %vm6525_vm9, %v1570_v40, %v1572_v18  ;;  %v4044_v40 = vld [vmem:[%s6237_s5 + $0x3c] ss:$24 sps:$4 sm:$0xff]  }
 0x51d   : > { %6524 = vst [vmem:[#allocation57_spill] sm:$0xff] %v5367_v11  ;;  %6526 = vst [vmem:[#allocation58_spill] sm:$0xff] %v5372_v5 }
 0x51f   : > { %v1608_v13 = vpop.permute.xlu0 %1607 }
 0x520   : > { %v1542_v54 = vpop.permute.xlu1 %1541 }
 0x521   : > { %v5362_v47 = vsel %vm6521_vm7, %v1540_v7, %v1542_v54  ;;  %vm6530_vm7 = vcmask 916480  }
 0x522   : > { %6522 = vst [vmem:[#allocation56_spill] sm:$0xff] %v5362_v47 }
 0x523   : > { %v1544_v20 = vpop.permute.xlu0 %1543 }
 0x524   : > { %v1612_v41 = vpop.permute.xlu1 %1611  ;;  %v5357_v50 = vsel %vm6520_vm3, %v1542_v54, %v1544_v20  ;;  %v4041_v54 = vld [vmem:[%s6237_s5 + $0x8] ss:$24 sps:$4 sm:$0xff]   ;;  %vm6528_vm3 = vmmov %vm6523_vm2 }
 0x525   : > { %2049 = vmatprep.subr.bf16.mxu0 %v5357_v50  ;;  %2779 = vmatprep.subr.bf16.mxu1 %v5357_v50  ;;  %vm6531_vm2 = vmmov %vm6530_vm7 }
 0x526   : > { %2050 = vmatpush1.bf16.msra.mxu0 %v5362_v47  ;;  %2780 = vmatpush1.bf16.msra.mxu1 %v5362_v47  ;;  %vm6532_vm9 = vmmov %vm6531_vm2 }
 0x527   : > { %v1648_v59 = vpop.permute.xlu0 %1647  ;;  %2051 = vmatprep.subr.bf16.mxu0 %v5367_v11  ;;  %2781 = vmatprep.subr.bf16.mxu1 %v5367_v11  ;;  %v5396_v11 = vsel %vm6530_vm7, %v1608_v13, %v1610_v55  ;;  %vm6534_vm7 = vcmask 900096  }
 0x528   : > { %v1578_v20 = vpop.permute.xlu1 %1577 }
 0x529   : > { %v5388_v18 = vsel %vm6528_vm3, %v1576_v58, %v1578_v20  ;;  %v5401_v58 = vsel %vm6531_vm2, %v1606_v2, %v1608_v13  ;;  %v4049_v2 = vld [vmem:[%s6237_s5 + $0x14] ss:$24 sps:$4 sm:$0xff]   ;;  %vm1961_vm3 = vcmask 654336  }
 0x52a   : > { %2052 = vmatpush1.bf16.msra.mxu0 %v5372_v5  ;;  %2782 = vmatpush1.bf16.msra.mxu1 %v5372_v5  ;;  %v6529_v5 = vcombine.low %v5186_v43, %v5191_v14  ;;  %v4046_v43 = vld [vmem:[%s6237_s5 + $0x38] ss:$24 sps:$4 sm:$0xff]  }
 0x52b   : > { %v1580_v7 = vpop.permute.xlu0 %1579 }
 0x52c   : > { %v1650_v0 = vpop.permute.xlu1 %1649  ;;  %v5380_v47 = vsel %vm6527_vm13, %v1578_v20, %v1580_v7  ;;  %vm6533_vm13 = vmmov %vm6531_vm2 }
 0x52d   : > { %2074 = vmatprep.subr.bf16.mxu0 %v5380_v47  ;;  %2804 = vmatprep.subr.bf16.mxu1 %v5380_v47  ;;  %vm6535_vm2 = vmmov %vm6534_vm7 }
 0x52e   : > { %2054 = vmatmul.mubr.bf16.vlgmr.msra.gmra.mrb[0].mxu0 %v4041_v54  ;;  %2784 = vmatmul.mubr.bf16.vlgmr.msra.gmra.mrb[24].mxu1 %v6529_v5 }
 0x52f   : > { %2075 = vmatpush1.bf16.msra.mxu0 %v5388_v18  ;;  %2805 = vmatpush1.bf16.msra.mxu1 %v5388_v18  ;;  %v1646_v7 = vpop.permute.xlu0 %1645 }
 0x530   : > { %2076 = vmatprep.subr.bf16.mxu0 %v5396_v11  ;;  %2806 = vmatprep.subr.bf16.mxu1 %v5396_v11  ;;  %v1614_v54 = vpop.permute.xlu1 %1613 }
 0x531   : > { %2063 = vmatprep.mubr.bf16.mxu0 %v4044_v40  ;;  %v5417_v13 = vsel %vm6533_vm13, %v1612_v41, %v1614_v54  ;;  %vm6538_vm13 = vmmov %vm6535_vm2 }
 0x533   : > { %2077 = vmatpush1.bf16.msra.mxu0 %v5401_v58  ;;  %2807 = vmatpush1.bf16.msra.mxu1 %v5401_v58  ;;  %v1616_v14 = vpop.permute.xlu0 %1615 }
 0x534   : > { %v1652_v55 = vpop.permute.xlu1 %1651  ;;  %v5409_v5 = vsel %vm6532_vm9, %v1614_v54, %v1616_v14  ;;  %v5431_v14 = vsel %vm6534_vm7, %v1648_v59, %v1650_v0  ;;  %vm6537_vm9 = vmmov %vm6535_vm2  ;;  %vm6540_vm7 = vcmask 785408  }
 0x535   : > { %2078 = vmatprep.subr.bf16.mxu0 %v5409_v5  ;;  %2808 = vmatprep.subr.bf16.mxu1 %v5409_v5 }
 0x536   : > { %2064 = vmatmul.mubr.bf16.gmra.mrb[4].mxu0 %v4046_v43 }
 0x537   : > { %2079 = vmatpush1.bf16.msra.mxu0 %v5417_v13  ;;  %2809 = vmatpush1.bf16.msra.mxu1 %v5417_v13  ;;  %v1684_v20 = vpop.permute.xlu0 %1683 }
 0x538   : > { %2080 = vmatprep.subr.bf16.mxu0 %v5069_v6  ;;  %2810 = vmatprep.subr.bf16.mxu1 %v5069_v6  ;;  %v1686_v40 = vpop.permute.xlu1 %1685 }
 0x539   : > { %3830 = vmatprep.mubr.msk.bf16.mxu0 %vm1961_vm3, %v4049_v2 }
 0x53b   : > { %2081 = vmatpush1.bf16.msra.mxu0 %v5067_v21  ;;  %2811 = vmatpush1.bf16.msra.mxu1 %v5067_v21  ;;  %v1682_v41 = vpop.permute.xlu0 %1681  ;;  %v5436_v21 = vsel %vm6535_vm2, %v1646_v7, %v1648_v59  ;;  %v5451_v7 = vsel %vm6540_vm7, %v1684_v20, %v1686_v40  ;;  %vm6541_vm2 = vmmov %vm6540_vm7  ;;  %vm6546_vm7 = vcmask 777216  }
 0x53c   : > { %2082 = vmatprep.subr.bf16.mxu0 %v5077_v10  ;;  %2812 = vmatprep.subr.bf16.mxu1 %v5077_v10  ;;  %v1688_v54 = vpop.permute.xlu1 %1687  ;;  %6536 = vst [vmem:[#allocation59_spill] sm:$0xff] %v5436_v21 }
 0x53f   : > { %2083 = vmatpush1.bf16.msra.mxu0 %v5075_v35  ;;  %2813 = vmatpush1.bf16.msra.mxu1 %v5075_v35  ;;  %v1720_v43 = vpop.permute.xlu0 %1719 }
 0x540   : > { %2084 = vmatprep.subr.bf16.mxu0 %v5431_v14  ;;  %2814 = vmatprep.subr.bf16.mxu1 %v5431_v14  ;;  %v1654_v2 = vpop.permute.xlu1 %1653 }
 0x541   : > { %v5446_v0 = vsel %vm6538_vm13, %v1652_v55, %v1654_v2  ;;  %vm6544_vm13 = vmmov %vm6541_vm2 }
 0x542   : > { %6539 = vst [vmem:[#allocation60_spill] sm:$0xff] %v5446_v0 }
 0x543   : > { %2085 = vmatpush1.bf16.msra.mxu0 %v5436_v21  ;;  %2815 = vmatpush1.bf16.msra.mxu1 %v5436_v21  ;;  %v1656_v10 = vpop.permute.xlu0 %1655  ;;  %v5456_v21 = vsel %vm6541_vm2, %v1682_v41, %v1684_v20 }
 0x544   : > { %v1722_v6 = vpop.permute.xlu1 %1721  ;;  %v5441_v35 = vsel %vm6537_vm9, %v1654_v2, %v1656_v10  ;;  %6542 = vst [vmem:[#allocation61_spill] sm:$0xff] %v5456_v21  ;;  %vm6543_vm9 = vmmov %vm6541_vm2 }
 0x545   : > { %2086 = vmatprep.subr.bf16.mxu0 %v5441_v35  ;;  %2816 = vmatprep.subr.bf16.mxu1 %v5441_v35  ;;  %v5471_v41 = vsel %vm6546_vm7, %v1720_v43, %v1722_v6  ;;  %vm6548_vm2 = vmmov %vm6546_vm7 }
 0x546   : > { %6547 = vst [vmem:[#allocation63_spill] sm:$0xff] %v5471_v41  ;;  %vm6551_vm7 = vmmov %vm6548_vm2 }
 0x547   : > { %2087 = vmatpush1.bf16.msra.mxu0 %v5446_v0  ;;  %2817 = vmatpush1.bf16.msra.mxu1 %v5446_v0  ;;  %v1718_v59 = vpop.permute.xlu0 %1717 }
 0x548   : > { %2088 = vmatprep.subr.bf16.mxu0 %v5451_v7  ;;  %2818 = vmatprep.subr.bf16.mxu1 %v5451_v7  ;;  %v1690_v10 = vpop.permute.xlu1 %1689 }
 0x549   : > { %v5466_v40 = vsel %vm6544_vm13, %v1688_v54, %v1690_v10  ;;  %vm6550_vm13 = vcmask 769024  }
 0x54a   : > { %6545 = vst [vmem:[#allocation62_spill] sm:$0xff] %v5466_v40 }
 0x54b   : > { %2089 = vmatpush1.bf16.msra.mxu0 %v5456_v21  ;;  %2819 = vmatpush1.bf16.msra.mxu1 %v5456_v21  ;;  %v1692_v55 = vpop.permute.xlu0 %1691  ;;  %v5476_v21 = vsel %vm6548_vm2, %v1718_v59, %v1720_v43 }
 0x54c   : > { %v1724_v2 = vpop.permute.xlu1 %1723  ;;  %v5461_v0 = vsel %vm6543_vm9, %v1690_v10, %v1692_v55  ;;  %vm6549_vm9 = vmmov %vm6548_vm2 }
 0x54d   : > { %2090 = vmatprep.subr.bf16.mxu0 %v5461_v0  ;;  %2820 = vmatprep.subr.bf16.mxu1 %v5461_v0  ;;  %vm6553_vm2 = vmmov %vm6550_vm13 }
 0x54f   : > { %2091 = vmatpush1.bf16.msra.mxu0 %v5466_v40  ;;  %2821 = vmatpush1.bf16.msra.mxu1 %v5466_v40  ;;  %v1756_v20 = vpop.permute.xlu0 %1755 }
 0x550   : > { %2092 = vmatprep.subr.bf16.mxu0 %v5471_v41  ;;  %2822 = vmatprep.subr.bf16.mxu1 %v5471_v41  ;;  %v1726_v55 = vpop.permute.xlu1 %1725 }
 0x551   : > { %v5489_v41 = vsel %vm6551_vm7, %v1724_v2, %v1726_v55 }
 0x552   : > { %6552 = vst [vmem:[#allocation64_spill] sm:$0xff] %v5489_v41 }
 0x553   : > { %2093 = vmatpush1.bf16.msra.mxu0 %v5476_v21  ;;  %2823 = vmatpush1.bf16.msra.mxu1 %v5476_v21  ;;  %v1728_v54 = vpop.permute.xlu0 %1727 }
 0x554   : > { %v1758_v10 = vpop.permute.xlu1 %1757  ;;  %v5481_v40 = vsel %vm6549_vm9, %v1726_v55, %v1728_v54  ;;  %vm6554_vm9 = vmmov %vm6553_vm2 }
 0x555   : > { %2094 = vmatprep.subr.bf16.mxu0 %v5481_v40  ;;  %2824 = vmatprep.subr.bf16.mxu1 %v5481_v40  ;;  %v5486_v6 = vsel %vm6550_vm13, %v1756_v20, %v1758_v10  ;;  %vm6555_vm13 = vmmov %vm6553_vm2 }
 0x557   : > { %2095 = vmatpush1.bf16.msra.mxu0 %v5489_v41  ;;  %2825 = vmatpush1.bf16.msra.mxu1 %v5489_v41  ;;  %v1754_v43 = vpop.permute.xlu0 %1753 }
 0x558   : > { %v5494_v59 = vsel %vm6553_vm2, %v1754_v43, %v1756_v20  ;;  %2096 = vmatprep.subr.bf16.mxu0 %v5486_v6  ;;  %2826 = vmatprep.subr.bf16.mxu1 %v5486_v6  ;;  %v1762_v54 = vpop.permute.xlu1 %1761  ;;  %v4047_v20 = vld [vmem:[%s6237_s5 + $0x10] ss:$24 sps:$4 sm:$0xff]   ;;  %v4050_v43 = vld [vmem:[%s6237_s5 + $0x44] ss:$24 sps:$4 sm:$0xff]  }
 0x55b   : > { %2097 = vmatpush1.bf16.msra.mxu0 %v5494_v59  ;;  %2827 = vmatpush1.bf16.msra.mxu1 %v5494_v59  ;;  %v1764_v10 = vpop.permute.xlu0 %1763 }
 0x55c   : > { %v1760_v2 = vpop.permute.xlu1 %1759  ;;  %v5501_v55 = vsel %vm6554_vm9, %v1762_v54, %v1764_v10  ;;  %v4055_v10 = vld [vmem:[%s6241_s9 + $0x4] ss:$44 sps:$4 sm:$0x3f]  }
 0x55d   : > { %v5504_v41 = vsel %vm6555_vm13, %v1760_v2, %v1762_v54  ;;  %2098 = vmatprep.subr.bf16.mxu0 %v5501_v55  ;;  %2828 = vmatprep.subr.bf16.mxu1 %v5501_v55  ;;  %v4052_v54 = vld [vmem:[%s6237_s5 + $0x40] ss:$24 sps:$4 sm:$0xff]  }
 0x55f   : > { %2099 = vmatpush1.bf16.msra.mxu0 %v5504_v41  ;;  %2829 = vmatpush1.bf16.msra.mxu1 %v5504_v41 }
 0x560   : > { %3882 = vmatprep.subr.msk.bf16.mxu0 %vm4276_vm6, %v4287_v48  ;;  %v4053_v48 = vld [vmem:[%s6241_s9] ss:$44 sps:$4 sm:$0x3f]  }
 0x562   : > { %2107 = vmatmul.mubr.bf16.vlgmr.msra.gmra.mrb[0].mxu0 %v4047_v20 }
 0x563   : > { %3475 = vmatpush1.bf16.msra.mxu0 %v4303_v51  ;;  %3831 = vmatprep.mubr.msk.bf16.mxu0 %vm1961_vm3, %v4050_v43  ;;  %v4058_v51 = vld [vmem:[%s6241_s9 + $0xc] ss:$44 sps:$4 sm:$0x3f]  }
 0x564   : > { %3476 = vmatprep.subr.bf16.mxu0 %v4474_v38  ;;  %v6559_v38 = vld [vmem:[#allocation28_spill] sm:$0xff] }
 0x567   : > { %3477 = vmatpush1.bf16.msra.mxu0 %v4471_v37  ;;  %v6558_v37 = vld [vmem:[#allocation27_spill] sm:$0xff] }
 0x568   : > { %3478 = vmatprep.subr.bf16.mxu0 %v4482_v52  ;;  %v6561_v52 = vld [vmem:[#allocation30_spill] sm:$0xff] }
 0x56a   : > { %2117 = vmatmul.mubr.bf16.gmra.mrb[4].mxu0 %v4052_v54  ;;  %v6592_v54 = vld [vmem:[#allocation51_spill] sm:$0xff] }
 0x56b   : > { %3479 = vmatpush1.bf16.msra.mxu0 %v4479_v49  ;;  %3506 = vmatprep.mubr.bf16.mxu0 %v4055_v10  ;;  %v6560_v49 = vld [vmem:[#allocation29_spill] sm:$0xff] }
 0x56c   : > { %3480 = vmatprep.subr.bf16.mxu0 %v4485_v56  ;;  %v6562_v56 = vld [vmem:[#allocation31_spill] sm:$0xff] }
 0x56f   : > { %3481 = vmatpush1.bf16.msra.mxu0 %v4491_v63  ;;  %v6563_v63 = vld [vmem:[#allocation32_spill] sm:$0xff] }
 0x570   : > { %3482 = vmatprep.subr.bf16.mxu0 %v4959_v1  ;;  %v6587_v1 = vld [vmem:[#allocation64_spill] sm:$0xff] }
 0x573   : > { %3483 = vmatpush1.bf16.msra.mxu0 %v4963_v26  ;;  %v1886_v26 = vpop.permute.xlu0 %1885 }
 0x574   : > { %3484 = vmatprep.subr.bf16.mxu0 %v4500_v17  ;;  %v6565_v17 = vld [vmem:[#allocation34_spill] sm:$0xff] }
 0x577   : > { %3485 = vmatpush1.bf16.msra.mxu0 %v4497_v16  ;;  %v6564_v16 = vld [vmem:[#allocation33_spill] sm:$0xff] }
 0x578   : > { %3486 = vmatprep.subr.bf16.mxu0 %v4505_v23  ;;  %v6566_v23 = vld [vmem:[#allocation35_spill] sm:$0xff] }
 0x57b   : > { %3487 = vmatpush1.bf16.msra.mxu0 %v4508_v24  ;;  %v6567_v24 = vld [vmem:[#allocation36_spill] sm:$0xff] }
 0x57c   : > { %3488 = vmatprep.subr.bf16.mxu0 %v4512_v25  ;;  %v6568_v25 = vld [vmem:[#allocation37_spill] sm:$0xff] }
 0x57f   : > { %3489 = vmatpush1.bf16.msra.mxu0 %v4517_v28  ;;  %v6569_v28 = vld [vmem:[#allocation39_spill] sm:$0xff] }
 0x580   : > { %3490 = vmatprep.subr.bf16.mxu0 %v4524_v32  ;;  %v6571_v32 = vld [vmem:[#allocation40_spill] sm:$0xff] }
 0x583   : > { %3491 = vmatpush1.bf16.msra.mxu0 %v4521_v31  ;;  %v6570_v31 = vld [vmem:[#allocation38_spill] sm:$0xff] }
 0x584   : > { %3883 = vmatprep.subr.msk.bf16.mxu0 %vm4276_vm6, %v4578_v30  ;;  %v6574_v30 = vld [vmem:[#allocation55_spill] sm:$0xff] }
 0x587   : > { %3493 = vmatpush1.bf16.msra.mxu0 %v4589_v36  ;;  %v6575_v36 = vld [vmem:[#allocation56_spill] sm:$0xff] }
 0x588   : > { %3884 = vmatprep.subr.msk.bf16.mxu0 %vm4276_vm6, %v4612_v42  ;;  %v6576_v42 = vld [vmem:[#allocation57_spill] sm:$0xff] }
 0x58b   : > { %3495 = vmatpush1.bf16.msra.mxu0 %v4620_v53  ;;  %v4056_v53 = vld [vmem:[%s6241_s9 + $0x8] ss:$44 sps:$4 sm:$0x3f]  }
 0x58c   : > { %3496 = vmatprep.subr.bf16.mxu0 %v4785_v9  ;;  %v6577_v9 = vld [vmem:[#allocation58_spill] sm:$0xff] }
 0x58f   : > { %3497 = vmatpush1.bf16.msra.mxu0 %v4788_v46  ;;  %v6578_v46 = vld [vmem:[#allocation44_spill] sm:$0xff] }
 0x590   : > { %3498 = vmatprep.subr.bf16.mxu0 %v4793_v57  ;;  %v6579_v57 = vld [vmem:[#allocation43_spill] sm:$0xff] }
 0x593   : > { %3499 = vmatpush1.bf16.msra.mxu0 %v4797_v8  ;;  %v6580_v8 = vld [vmem:[#allocation46_spill] sm:$0xff] }
 0x594   : > { %3500 = vmatprep.subr.bf16.mxu0 %v4801_v4  ;;  %v6581_v4 = vld [vmem:[#allocation45_spill] sm:$0xff] }
 0x597   : > { %3501 = vmatpush1.bf16.msra.mxu0 %v4805_v19  ;;  %v6556_v19 = vld [vmem:[#allocation26_spill] sm:$0xff] }
 0x598   : > { %3502 = vmatprep.subr.bf16.mxu0 %v4809_v22  ;;  %v6557_v22 = vld [vmem:[#allocation25_spill] sm:$0xff] }
 0x59b   : > { %3503 = vmatpush1.bf16.msra.mxu0 %v4813_v62  ;;  %v6582_v62 = vld [vmem:[#allocation59_spill] sm:$0xff] }
 0x59c   : > { %3504 = vmatprep.subr.bf16.mxu0 %v4817_v29  ;;  %v6583_v29 = vld [vmem:[#allocation60_spill] sm:$0xff] }
 0x59f   : > { %3505 = vmatpush1.bf16.msra.mxu0 %v4821_v3  ;;  %v6584_v3 = vld [vmem:[#allocation61_spill] sm:$0xff] }
 0x5a0   : > { %3517 = vmatprep.subr.bf16.mxu0 %v4828_v34  ;;  %v6585_v34 = vld [vmem:[#allocation62_spill] sm:$0xff] }
 0x5a2   : > { %3507 = vmatmul.mubr.bf16.vlgmr.msra.gmra.mrb[8].mxu0 %v4053_v48 }
 0x5a3   : > { %3518 = vmatpush1.bf16.msra.mxu0 %v4836_v12  ;;  %3549 = vmatprep.mubr.bf16.mxu0 %v4058_v51  ;;  %v6586_v12 = vld [vmem:[#allocation63_spill] sm:$0xff] }
 0x5a4   : > { %3519 = vmatprep.subr.bf16.mxu0 %v4560_v33  ;;  %v6573_v33 = vld [vmem:[#allocation42_spill] sm:$0xff] }
 0x5a7   : > { %3520 = vmatpush1.bf16.msra.mxu0 %v4558_v27  ;;  %v6572_v27 = vld [vmem:[#allocation41_spill] sm:$0xff] }
 0x5a8   : > { %3521 = vmatprep.subr.bf16.mxu0 %v6556_v19 }
 0x5ab   : > { %3522 = vmatpush1.bf16.msra.mxu0 %v6557_v22 }
 0x5ac   : > { %3523 = vmatprep.subr.bf16.mxu0 %v6558_v37  ;;  %v6593_v37 = vld [vmem:[#allocation52_spill] sm:$0xff] }
 0x5af   : > { %3524 = vmatpush1.bf16.msra.mxu0 %v6559_v38 }
 0x5b0   : > { %3525 = vmatprep.subr.bf16.mxu0 %v6560_v49 }
 0x5b3   : > { %3526 = vmatpush1.bf16.msra.mxu0 %v6561_v52 }
 0x5b4   : > { %3527 = vmatprep.subr.bf16.mxu0 %v6562_v56 }
 0x5b7   : > { %3528 = vmatpush1.bf16.msra.mxu0 %v6563_v63  ;;  %v6594_v63 = vld [vmem:[#allocation53_spill] sm:$0xff] }
 0x5b8   : > { %3529 = vmatprep.subr.bf16.mxu0 %v6564_v16 }
 0x5bb   : > { %3530 = vmatpush1.bf16.msra.mxu0 %v6565_v17 }
 0x5bc   : > { %3531 = vmatprep.subr.bf16.mxu0 %v6566_v23 }
 0x5bf   : > { %3532 = vmatpush1.bf16.msra.mxu0 %v6567_v24  ;;  %v6595_v24 = vld [vmem:[#allocation54_spill] sm:$0xff] }
 0x5c0   : > { %3533 = vmatprep.subr.bf16.mxu0 %v6568_v25 }
 0x5c3   : > { %3534 = vmatpush1.bf16.msra.mxu0 %v6569_v28 }
 0x5c4   : > { %3535 = vmatprep.subr.bf16.mxu0 %v6570_v31 }
 0x5c7   : > { %3536 = vmatpush1.bf16.msra.mxu0 %v6571_v32 }
 0x5c8   : > { %3537 = vmatprep.subr.bf16.mxu0 %v6572_v27 }
 0x5cb   : > { %3538 = vmatpush1.bf16.msra.mxu0 %v6573_v33 }
 0x5cc   : > { %3885 = vmatprep.subr.msk.bf16.mxu0 %vm4276_vm6, %v5087_v39  ;;  %v6588_v39 = vld [vmem:[#allocation47_spill] sm:$0xff] }
 0x5cf   : > { %3540 = vmatpush1.bf16.msra.mxu0 %v5098_v60  ;;  %v2003_v60 = vadd.f32 %v6588_v39, %v1886_v26 }
 0x5d0   : > { %3886 = vmatprep.subr.msk.bf16.mxu0 %vm4276_vm6, %v5125_v61 }
 0x5d3   : > { %3542 = vmatpush1.bf16.msra.mxu0 %v5133_v15  ;;  %v6589_v15 = vld [vmem:[#allocation48_spill] sm:$0xff] }
 0x5d4   : > { %3543 = vmatprep.subr.bf16.mxu0 %v5347_v45  ;;  %v2005_v45 = vadd.f32 %v6589_v15, %v1886_v26 }
 0x5d7   : > { %3544 = vmatpush1.bf16.msra.mxu0 %v6574_v30 }
 0x5d8   : > { %3545 = vmatprep.subr.bf16.mxu0 %v5357_v50 }
 0x5db   : > { %3546 = vmatpush1.bf16.msra.mxu0 %v6575_v36 }
 0x5dc   : > { %3547 = vmatprep.subr.bf16.mxu0 %v6576_v42 }
 0x5df   : > { %3548 = vmatpush1.bf16.msra.mxu0 %v6577_v9 }
 0x5e0   : > { %3560 = vmatprep.subr.bf16.mxu0 %v5380_v47  ;;  %v6590_v47 = vld [vmem:[#allocation49_spill] sm:$0xff] }
 0x5e2   : > { %3550 = vmatmul.mubr.bf16.vlgmr.msra.gmra.mrb[8].mxu0 %v4056_v53 }
 0x5e3   : > { %3561 = vmatpush1.bf16.msra.mxu0 %v5388_v18 }
 0x5e4   : > { %3562 = vmatprep.subr.bf16.mxu0 %v5396_v11 }
 0x5e7   : > { %3563 = vmatpush1.bf16.msra.mxu0 %v5401_v58 }
 0x5e8   : > { %3564 = vmatprep.subr.bf16.mxu0 %v5409_v5  ;;  %v6591_v5 = vld [vmem:[#allocation50_spill] sm:$0xff] }
 0x5eb   : > { %3565 = vmatpush1.bf16.msra.mxu0 %v5417_v13 }
 0x5ec   : > { %3566 = vmatprep.subr.bf16.mxu0 %v6578_v46 }
 0x5ef   : > { %3567 = vmatpush1.bf16.msra.mxu0 %v6579_v57 }
 0x5f0   : > { %3568 = vmatprep.subr.bf16.mxu0 %v6580_v8 }
 0x5f3   : > { %3569 = vmatpush1.bf16.msra.mxu0 %v6581_v4 }
 0x5f4   : > { %3570 = vmatprep.subr.bf16.mxu0 %v5431_v14 }
 0x5f7   : > { %3571 = vmatpush1.bf16.msra.mxu0 %v6582_v62 }
 0x5f8   : > { %3572 = vmatprep.subr.bf16.mxu0 %v5441_v35  ;;  %v1891_v35 = vpop.permute.xlu1 %1890 }
 0x5f9   : > { %v2007_v11 = vadd.f32 %v6590_v47, %v1891_v35  ;;  %v2009_v13 = vadd.f32 %v6591_v5, %v1891_v35 }
 0x5fb   : > { %3573 = vmatpush1.bf16.msra.mxu0 %v6583_v29 }
 0x5fc   : > { %3574 = vmatprep.subr.bf16.mxu0 %v5451_v7  ;;  %v1901_v2 = vpop.permute.xlu1 %1900 }
 0x5fd   : > { %v2017_v16 = vadd.f32 %v6594_v63, %v1901_v2  ;;  %v2019_v25 = vadd.f32 %v6595_v24, %v1901_v2 }
 0x5ff   : > { %3575 = vmatpush1.bf16.msra.mxu0 %v6584_v3 }
 0x600   : > { %3576 = vmatprep.subr.bf16.mxu0 %v5461_v0 }
 0x603   : > { %3577 = vmatpush1.bf16.msra.mxu0 %v6585_v34 }
 0x604   : > { %3578 = vmatprep.subr.bf16.mxu0 %v6586_v12 }
 0x607   : > { %3579 = vmatpush1.bf16.msra.mxu0 %v5476_v21 }
 0x608   : > { %3580 = vmatprep.subr.bf16.mxu0 %v5481_v40  ;;  %v1896_v40 = vpop.permute.xlu0 %1895 }
 0x609   : > { %v2013_v10 = vadd.f32 %v6592_v54, %v1896_v40  ;;  %v2015_v38 = vadd.f32 %v6593_v37, %v1896_v40 }
 0x60b   : > { %3581 = vmatpush1.bf16.msra.mxu0 %v6587_v1 }
 0x60c   : > { %3582 = vmatprep.subr.bf16.mxu0 %v5486_v6 }
 0x60f   : > { %3583 = vmatpush1.bf16.msra.mxu0 %v5494_v59 }
 0x610   : > { %3584 = vmatprep.subr.bf16.mxu0 %v5501_v55 }
 0x613   : > { %3585 = vmatpush1.bf16.msra.mxu0 %v5504_v41 }
 0x635   : > { %v2108_v61 = vpop.f32.mrb[0].mxu0 }
 0x636   : > { %v3900_v21 = vadd.f32 %v2108_v61, %v2003_v60  ;;  %v2110_v50 = vpop.f32.mrb[1].mxu0 }
 0x637   : > { %v3902_v18 = vadd.f32 %v2110_v50, %v2005_v45  ;;  %v2112_v58 = vpop.f32.mrb[2].mxu0  ;;  %v2456_v45 = vld [vmem:[%s6239_s7 + $0x48] sm:$0xff] }
 0x638   : > { %v2135_v14 = vmul.f32 0.01, %v3900_v21  ;;  %v3904_v0 = vadd.f32 %v2112_v58, %v2007_v11  ;;  %v2114_v7 = vpop.f32.mrb[3].mxu0  ;;  %vm2127_vm3 = vcmp.ge.f32.partialorder %v3900_v21, 0.0 }
 0x639   : > { %v2136_v41 = vmul.f32 0.01, %v3902_v18  ;;  %v3906_v6 = vadd.f32 %v2114_v7, %v2009_v13  ;;  %vm2128_vm7 = vcmp.ge.f32.partialorder %v3902_v18, 0.0 }
 0x63a   : > { %vm2129_vm2 = vcmp.ge.f32.partialorder %v3904_v0, 0.0  ;;  %v2137_v59 = vmul.f32 0.01, %v3904_v0  ;;  %v2143_v20 = vsel %vm2127_vm3, %v3900_v21, %v2135_v14  ;;  %v2460_v21 = vld [vmem:[%s6239_s7 + $0x68] sm:$0xff] }
 0x63b   : > { %vm2130_vm9 = vcmp.ge.f32.partialorder %v3906_v6, 0.0  ;;  %v2138_v55 = vmul.f32 0.01, %v3906_v6  ;;  %v2144_v48 = vsel %vm2128_vm7, %v3902_v18, %v2136_v41  ;;  %v3843_v18 = vcombine.high %v2456_v45, %v2460_v21 }
 0x63c   : > { %v2145_v43 = vsel %vm2129_vm2, %v3904_v0, %v2137_v59  ;;  %v3842_v40 = vcombine.low %v2456_v45, %v2460_v21  ;;  %v6603_v59 = vld [vmem:[#allocation6_spill] sm:$0xff] }
 0x63d   : > { %v5637_v51 = vpack.c.bf16 %v2145_v43, %v2143_v20  ;;  %v2146_v19 = vsel %vm2130_vm9, %v3906_v6, %v2138_v55  ;;  %v2118_v22 = vpop.f32.mrb[4].mxu0  ;;  %2793 = vmatprep.mubr.bf16.mxu1 %v3843_v18  ;;  %vm6604_vm9 = vcmp.ne.s16.totalorder %v6603_v59, 0  ;;  %v5725_v55 = vld [vmem:[%s6239_s7 + $0x10] sm:$0xff]  ;;  %v6628_v18 = vld [vmem:[#allocation18_spill] sm:$0xff] }
 0x63e   : > { %v5640_v49 = vpack.c.bf16 %v2146_v19, %v2144_v48  ;;  %v3908_v52 = vadd.f32 %v2118_v22, %v2013_v10  ;;  %v2120_v56 = vpop.f32.mrb[5].mxu0  ;;  %2794 = vmatmul.mubr.bf16.gmra.mrb[28].mxu1 %v3842_v40  ;;  %v5730_v20 = vld [vmem:[%s6239_s7 + $0x30] sm:$0xff]  ;;  %v6605_v19 = vld [vmem:[#allocation10_spill] sm:$0xff] }
 0x63f   : > { %v3910_v17 = vadd.f32 %v2120_v56, %v2015_v38  ;;  %v2122_v23 = vpop.f32.mrb[6].mxu0  ;;  %2159 = vrot.lane.b32.xlu0 %v5637_v51, %s4081_s23  ;;  %v3836_v54 = vcombine.low %v5725_v55, %v5730_v20  ;;  %v3837_v10 = vcombine.high %v5725_v55, %v5730_v20  ;;  %v4061_v48 = vld [vmem:[%s6241_s9 + $0x14] ss:$44 sps:$4 sm:$0x3f]   ;;  %v6607_v38 = vld [vmem:[#allocation12_spill] sm:$0xff] }
 0x640   : > { %v2139_v28 = vmul.f32 0.01, %v3908_v52  ;;  %v3912_v31 = vadd.f32 %v2122_v23, %v2017_v16  ;;  %v2124_v32 = vpop.f32.mrb[7].mxu0  ;;  %2161 = vrot.lane.b32.xlu1 %v5640_v49, %s4081_s23  ;;  %vm2131_vm13 = vcmp.ge.f32.partialorder %v3908_v52, 0.0  ;;  %3592 = vmatprep.mubr.bf16.mxu0 %v4061_v48  ;;  %v6636_v48 = vld [vmem:[#allocation23_spill] sm:$0xff] }
 0x641   : > { %v2140_v27 = vmul.f32 0.01, %v3910_v17  ;;  %v3914_v33 = vadd.f32 %v2124_v32, %v2019_v25  ;;  %vm2132_vm3 = vcmp.ge.f32.partialorder %v3910_v17, 0.0  ;;  %2836 = vmatprep.mubr.bf16.mxu1 %v3837_v10 }
 0x642   : > { %vm2133_vm7 = vcmp.ge.f32.partialorder %v3912_v31, 0.0  ;;  %v2141_v30 = vmul.f32 0.01, %v3912_v31  ;;  %v2147_v42 = vsel %vm2131_vm13, %v3908_v52, %v2139_v28  ;;  %vm6606_vm13 = vcmp.ne.s16.totalorder %v6605_v19, 0 }
 0x643   : > { %vm2134_vm2 = vcmp.ge.f32.partialorder %v3914_v33, 0.0  ;;  %v2142_v36 = vmul.f32 0.01, %v3914_v33  ;;  %v2148_v9 = vsel %vm2132_vm3, %v3910_v17, %v2140_v27  ;;  %vm6608_vm3 = vcmp.ne.s16.totalorder %v6607_v38, 0  ;;  %v6614_v27 = vld [vmem:[#allocation14_spill] sm:$0xff] }
 0x644   : > { %v2149_v53 = vsel %vm2133_vm7, %v3912_v31, %v2141_v30  ;;  %vm6609_vm7 = vmmov %vm6604_vm9  ;;  %v6612_v31 = vld [vmem:[#allocation13_spill] sm:$0xff] }
 0x645   : > { %v5648_v46 = vpack.c.bf16 %v2149_v53, %v2147_v42  ;;  %v2150_v57 = vsel %vm2134_vm2, %v3914_v33, %v2142_v36  ;;  %vm6611_vm2 = vmmov %vm6606_vm13  ;;  %v6617_v53 = vld [vmem:[#allocation20_spill] sm:$0xff] }
 0x646   : > { %v5650_v8 = vpack.c.bf16 %v2150_v57, %v2148_v9  ;;  %v4067_v57 = vld [vmem:[%s6241_s9 + $0x24] ss:$44 sps:$4 sm:$0x3f]  }
 0x647   : > { %2163 = vrot.lane.b32.xlu0 %v5648_v46, %s4081_s23 }
 0x648   : > { %2165 = vrot.lane.b32.xlu1 %v5650_v8, %s4081_s23 }
 0x6b1   : > { %v2160_v4 = vpop.permute.xlu0 %2159 }
 0x6b2   : > { %v5657_v62 = vsel %vm447_vm1, 0, %v2160_v4  ;;  %v2162_v29 = vpop.permute.xlu1 %2161 }
 0x6b3   : > { %v5660_v3 = vsel %vm447_vm1, %v2160_v4, %v2162_v29  ;;  %v5663_v34 = vsel %vm447_vm1, %v2162_v29, 0  ;;  %v2191_v1 = vsel %vm498_vm4, %v5657_v62, 0  ;;  %v2183_v35 = vsel %vm4272_vm5, %v5657_v62, 0  ;;  %v6620_v29 = vld [vmem:[#allocation16_spill] sm:$0xff] }
 0x6b4   : > { %2203 = vrot.lane.b32.xlu0 %v2191_v1, %s4089_s12  ;;  %3880 = vmatprep.subr.msk.bf16.mxu1 %vm4276_vm6, %v5660_v3  ;;  %v2193_v60 = vsel %vm500_vm8, %v5663_v34, 0  ;;  %v2227_v15 = vsel %vm540_vm11, %v5657_v62, 0  ;;  %v2229_v47 = vsel %vm542_vm10, %v5663_v34, 0  ;;  %v2263_v0 = vsel %vm582_vm15, %v5657_v62, 0 }
 0x6b5   : > { %3887 = vmatprep.subr.msk.bf16.mxu0 %vm4276_vm6, %v5660_v3  ;;  %2207 = vrot.lane.b32.xlu1 %v2193_v60, %s4089_s12  ;;  %v2265_v6 = vsel %vm584_vm14, %v5663_v34, 0  ;;  %v2192_v2 = vsel %vm6604_vm9, %v5660_v3, 0  ;;  %v2228_v22 = vsel %vm6606_vm13, %v5660_v3, 0  ;;  %v2264_v52 = vsel %vm6608_vm3, %v5660_v3, 0  ;;  %v6623_v60 = vld [vmem:[#allocation21_spill] sm:$0xff] }
 0x6b6   : > { %2831 = vmatpush1.bf16.msra.mxu1 %v2183_v35  ;;  %3587 = vmatpush1.bf16.msra.mxu0 %v2183_v35  ;;  %v2304_v24 = vsel %vm629_vm12, %v5660_v3, 0  ;;  %vm6613_vm9 = vcmp.ne.s16.totalorder %v6612_v31, 0  ;;  %vm6615_vm13 = vcmp.ne.s16.totalorder %v6614_v27, 0  ;;  %v2341_v4 = vsel %vm672_vm0, %v5663_v34, 0 }
 0x6b7   : > { %v2305_v32 = vsel %vm6613_vm9, %v5663_v34, 0  ;;  %v2303_v33 = vsel %vm6615_vm13, %v5657_v62, 0  ;;  %vm6621_vm9 = vcmp.ne.s16.totalorder %v6620_v29, 0 }
 0x6b8   : > { %2239 = vrot.lane.b32.xlu0 %v2227_v15, %s4090_s13  ;;  %v2339_v1 = vsel %vm6621_vm9, %v5657_v62, 0 }
 0x6b9   : > { %v2164_v11 = vpop.permute.xlu0 %2163  ;;  %2243 = vrot.lane.b32.xlu1 %v2229_v47, %s4090_s13  ;;  %v6626_v47 = vld [vmem:[#allocation17_spill] sm:$0xff] }
 0x6ba   : > { %v5697_v58 = vsel %vm447_vm1, 0, %v2164_v11  ;;  %v2166_v5 = vpop.permute.xlu1 %2165 }
 0x6bb   : > { %v5700_v13 = vsel %vm447_vm1, %v2164_v11, %v2166_v5  ;;  %v2185_v7 = vsel %vm4272_vm5, %v5697_v58, 0  ;;  %v2194_v43 = vsel %vm498_vm4, %v5697_v58, 0  ;;  %v2230_v37 = vsel %vm540_vm11, %v5697_v58, 0 }
 0x6bc   : > { %2275 = vrot.lane.b32.xlu0 %v2263_v0, %s4091_s14  ;;  %3881 = vmatprep.subr.msk.bf16.mxu1 %vm4276_vm6, %v5700_v13  ;;  %v2181_v56 = vsel %vm447_vm1, %v2166_v5, 0  ;;  %v2195_v63 = vsel %vm6609_vm7, %v5700_v13, 0  ;;  %v2266_v17 = vsel %vm582_vm15, %v5697_v58, 0  ;;  %v2231_v25 = vsel %vm6611_vm2, %v5700_v13, 0  ;;  %vm6616_vm7 = vmmov %vm6615_vm13 }
 0x6bd   : > { %3888 = vmatprep.subr.msk.bf16.mxu0 %vm4276_vm6, %v5700_v13  ;;  %2279 = vrot.lane.b32.xlu1 %v2265_v6, %s4091_s14  ;;  %v2196_v16 = vsel %vm500_vm8, %v2181_v56, 0  ;;  %v2232_v28 = vsel %vm542_vm10, %v2181_v56, 0  ;;  %v2267_v30 = vsel %vm6608_vm3, %v5700_v13, 0  ;;  %v2268_v36 = vsel %vm584_vm14, %v2181_v56, 0  ;;  %vm6622_vm13 = vmmov %vm6621_vm9  ;;  %v6632_v6 = vld [vmem:[#allocation24_spill] sm:$0xff] }
 0x6be   : > { %2833 = vmatpush1.bf16.msra.mxu1 %v2185_v7  ;;  %3589 = vmatpush1.bf16.msra.mxu0 %v2185_v7  ;;  %v2306_v42 = vsel %vm6616_vm7, %v5697_v58, 0  ;;  %vm6618_vm2 = vcmp.ne.s16.totalorder %v6617_v53, 0  ;;  %v2342_v35 = vsel %vm6622_vm13, %v5697_v58, 0  ;;  %vm6624_vm3 = vcmp.ne.s16.totalorder %v6623_v60, 0 }
 0x6bf   : > { %v2340_v9 = vsel %vm6618_vm2, %v5660_v3, 0  ;;  %v2376_v15 = vsel %vm6624_vm3, %v5660_v3, 0  ;;  %v2307_v45 = vsel %vm629_vm12, %v5700_v13, 0  ;;  %vm6625_vm7 = vcmp.ne.s16.totalorder %v6612_v31, 0 }
 0x6c0   : > { %2205 = vrot.lane.b32.xlu0 %v2192_v2, %s4089_s12  ;;  %v2308_v21 = vsel %vm6625_vm7, %v2181_v56, 0  ;;  %vm6627_vm2 = vcmp.ne.s16.totalorder %v6626_v47, 0  ;;  %vm6629_vm9 = vcmp.ne.s16.totalorder %v6628_v18, 0  ;;  %vm6630_vm13 = vcmp.ne.s16.totalorder %v6617_v53, 0 }
 0x6c1   : > { %2209 = vrot.lane.b32.xlu1 %v2194_v43, %s4089_s12  ;;  %v2377_v11 = vsel %vm6627_vm2, %v5663_v34, 0  ;;  %v2375_v5 = vsel %vm6629_vm9, %v5657_v62, 0  ;;  %v2343_v0 = vsel %vm6630_vm13, %v5700_v13, 0  ;;  %v2344_v7 = vsel %vm672_vm0, %v2181_v56, 0  ;;  %vm6631_vm3 = vmmov %vm6629_vm9 }
 0x6c2   : > { %v2378_v40 = vsel %vm6631_vm3, %v5697_v58, 0  ;;  %vm6633_vm7 = vcmp.ne.s16.totalorder %v6632_v6, 0  ;;  %vm6634_vm2 = vcmp.ne.s16.totalorder %v6623_v60, 0  ;;  %vm6635_vm9 = vcmp.ne.s16.totalorder %v6626_v47, 0 }
 0x6c3   : > { %v2412_v2 = vsel %vm6633_vm7, %v5660_v3, 0  ;;  %v2379_v43 = vsel %vm6634_vm2, %v5700_v13, 0  ;;  %v2380_v10 = vsel %vm6635_vm9, %v2181_v56, 0  ;;  %vm6637_vm13 = vcmp.ne.s16.totalorder %v6636_v48, 0  ;;  %v6638_v3 = vld [vmem:[#allocation22_spill] sm:$0xff] }
 0x6c4   : > { %2241 = vrot.lane.b32.xlu0 %v2228_v22, %s4090_s13  ;;  %v2413_v22 = vsel %vm6637_vm13, %v5663_v34, 0  ;;  %vm6639_vm3 = vcmp.ne.s16.totalorder %v6638_v3, 0  ;;  %vm6640_vm2 = vmmov %vm6637_vm13  ;;  %vm6642_vm13 = vcmask 1039360  }
 0x6c5   : > { %2245 = vrot.lane.b32.xlu1 %v2230_v37, %s4090_s13  ;;  %v2411_v37 = vsel %vm6639_vm3, %v5657_v62, 0  ;;  %vm6641_vm9 = vmmov %vm6639_vm3  ;;  %v2589_v62 = vld [vmem:[%s6240_s8] sm:$0xff] }
 0x6c6   : > { %v2414_v34 = vsel %vm6641_vm9, %v5697_v58, 0  ;;  %v2592_v58 = vld [vmem:[%s6240_s8 + $0x18] sm:$0xff]  ;;  %vm6643_vm3 = vmmov %vm6642_vm13  ;;  %vm6646_vm9 = vcmask 1031168  }
 0x6c8   : > { %2277 = vrot.lane.b32.xlu0 %v2264_v52, %s4091_s14  ;;  %v2415_v52 = vsel %vm6633_vm7, %v5700_v13, 0  ;;  %v2590_v13 = vld [vmem:[%s6240_s8 + $0x8] sm:$0xff]  ;;  %vm6644_vm7 = vmmov %vm6643_vm3 }
 0x6c9   : > { %2211 = vrot.lane.b32.xlu1 %v2195_v63, %s4089_s12  ;;  %v2416_v63 = vsel %vm6640_vm2, %v2181_v56, 0  ;;  %v2591_v56 = vld [vmem:[%s6240_s8 + $0x10] sm:$0xff]  ;;  %vm6645_vm2 = vmmov %vm6643_vm3 }
 0x6cc   : > { %2213 = vrot.lane.b32.xlu0 %v2196_v16, %s4089_s12 }
 0x6cd   : > { %2281 = vrot.lane.b32.xlu1 %v2266_v17, %s4091_s14 }
 0x6d0   : > { %2317 = vrot.lane.b32.xlu0 %v2304_v24, %s4092_s15 }
 0x6d1   : > { %2247 = vrot.lane.b32.xlu1 %v2231_v25, %s4090_s13 }
 0x6d4   : > { %2249 = vrot.lane.b32.xlu0 %v2232_v28, %s4090_s13 }
 0x6d5   : > { %2319 = vrot.lane.b32.xlu1 %v2305_v32, %s4092_s15 }
 0x6d8   : > { %2315 = vrot.lane.b32.xlu0 %v2303_v33, %s4092_s15 }
 0x6d9   : > { %2283 = vrot.lane.b32.xlu1 %v2267_v30, %s4091_s14  ;;  %v2457_v30 = vld [vmem:[%s6239_s7 + $0x50] sm:$0xff] }
 0x6dc   : > { %2285 = vrot.lane.b32.xlu0 %v2268_v36, %s4091_s14  ;;  %v2461_v36 = vld [vmem:[%s6239_s7 + $0x70] sm:$0xff] }
 0x6dd   : > { %2321 = vrot.lane.b32.xlu1 %v2306_v42, %s4092_s15  ;;  %v3844_v55 = vcombine.low %v2457_v30, %v2461_v36 }
 0x6e0   : > { %2353 = vrot.lane.b32.xlu0 %v2340_v9, %s4093_s16 }
 0x6e1   : > { %2355 = vrot.lane.b32.xlu1 %v2341_v4, %s4093_s16 }
 0x6e4   : > { %2351 = vrot.lane.b32.xlu0 %v2339_v1, %s4093_s16  ;;  %v4059_v1 = vld [vmem:[%s6241_s9 + $0x10] ss:$44 sps:$4 sm:$0x3f]  }
 0x6e5   : > { %2357 = vrot.lane.b32.xlu1 %v2342_v35, %s4093_s16  ;;  %v3845_v35 = vcombine.high %v2457_v30, %v2461_v36 }
 0x6e8   : > { %2389 = vrot.lane.b32.xlu0 %v2376_v15, %s4094_s19 }
 0x6e9   : > { %2323 = vrot.lane.b32.xlu1 %v2307_v45, %s4092_s15 }
 0x6ec   : > { %2325 = vrot.lane.b32.xlu0 %v2308_v21, %s4092_s15 }
 0x6ed   : > { %2391 = vrot.lane.b32.xlu1 %v2377_v11, %s4094_s19 }
 0x6f0   : > { %2387 = vrot.lane.b32.xlu0 %v2375_v5, %s4094_s19  ;;  %v5903_v5 = vld [vmem:[%s6239_s7 + $0x18] sm:$0xff] }
 0x6f1   : > { %2359 = vrot.lane.b32.xlu1 %v2343_v0, %s4093_s16  ;;  %v5908_v0 = vld [vmem:[%s6239_s7 + $0x38] sm:$0xff] }
 0x6f4   : > { %2361 = vrot.lane.b32.xlu0 %v2344_v7, %s4093_s16 }
 0x6f5   : > { %2393 = vrot.lane.b32.xlu1 %v2378_v40, %s4094_s19 }
 0x6f8   : > { %2425 = vrot.lane.b32.xlu0 %v2412_v2, %s4095_s24 }
 0x6f9   : > { %2395 = vrot.lane.b32.xlu1 %v2379_v43, %s4094_s19 }
 0x6fc   : > { %2397 = vrot.lane.b32.xlu0 %v2380_v10, %s4094_s19 }
 0x6fd   : > { %2427 = vrot.lane.b32.xlu1 %v2413_v22, %s4095_s24 }
 0x700   : > { %2423 = vrot.lane.b32.xlu0 %v2411_v37, %s4095_s24 }
 0x701   : > { %2431 = vrot.lane.b32.xlu1 %v2415_v52, %s4095_s24 }
 0x704   : > { %2433 = vrot.lane.b32.xlu0 %v2416_v63, %s4095_s24 }
 0x705   : > { %2429 = vrot.lane.b32.xlu1 %v2414_v34, %s4095_s24 }
 0x708   : > { %2595 = vperm.xlu0 %4013, %v2589_v62  }
 0x709   : > { %2600 = vperm.xlu1 %4012, %v2590_v13  }
 0x70c   : > { %2605 = vperm.xlu0 %4013, %v2591_v56  }
 0x70d   : > { %2610 = vperm.xlu1 %4012, %v2592_v58  }
 0x726   : > { %v2204_v16 = vpop.permute.xlu0 %2203 }
 0x727   : > { %v2208_v17 = vpop.permute.xlu1 %2207 }
 0x72a   : > { %v2240_v24 = vpop.permute.xlu0 %2239 }
 0x72b   : > { %v2244_v25 = vpop.permute.xlu1 %2243 }
 0x72e   : > { %v2276_v28 = vpop.permute.xlu0 %2275 }
 0x72f   : > { %v2280_v32 = vpop.permute.xlu1 %2279 }
 0x732   : > { %v2206_v33 = vpop.permute.xlu0 %2205 }
 0x733   : > { %v2215_v42 = vsel %vm6642_vm13, %v2204_v16, %v2206_v33  ;;  %v2210_v9 = vpop.permute.xlu1 %2209  ;;  %v2216_v4 = vsel %vm6643_vm3, %v2206_v33, %v2208_v17  ;;  %vm6647_vm13 = vmmov %vm6646_vm9  ;;  %vm6648_vm3 = vcmask 916480  }
 0x734   : > { %2834 = vmatprep.subr.bf16.mxu1 %v2216_v4  ;;  %3590 = vmatprep.subr.bf16.mxu0 %v2216_v4 }
 0x735   : > { %2835 = vmatpush1.bf16.msra.mxu1 %v2215_v42  ;;  %3591 = vmatpush1.bf16.msra.mxu0 %v2215_v42 }
 0x736   : > { %v2242_v15 = vpop.permute.xlu0 %2241 }
 0x737   : > { %v2246_v45 = vpop.permute.xlu1 %2245  ;;  %v2252_v43 = vsel %vm6646_vm9, %v2242_v15, %v2244_v25  ;;  %v2251_v37 = vsel %vm6647_vm13, %v2240_v24, %v2242_v15  ;;  %vm6652_vm13 = vmmov %vm6648_vm3 }
 0x738   : > { %2837 = vmatmul.mubr.bf16.vlgmr.msra.gmra.mrb[24].mxu1 %v3836_v54  ;;  %3593 = vmatmul.mubr.bf16.vlgmr.msra.gmra.mrb[8].mxu0 %v4059_v1  ;;  %v3839_v54 = vcombine.high %v5903_v5, %v5908_v0 }
 0x739   : > { %2846 = vmatprep.mubr.bf16.mxu1 %v3845_v35 }
 0x73a   : > { %v2278_v21 = vpop.permute.xlu0 %2277 }
 0x73b   : > { %v2212_v11 = vpop.permute.xlu1 %2211  ;;  %v2287_v16 = vsel %vm6652_vm13, %v2276_v28, %v2278_v21 }
 0x73c   : > { %v2217_v20 = vsel %vm6645_vm2, %v2210_v9, %v2212_v11 }
 0x73e   : > { %v2214_v7 = vpop.permute.xlu0 %2213 }
 0x73f   : > { %v2282_v40 = vpop.permute.xlu1 %2281  ;;  %v2218_v2 = vsel %vm6644_vm7, %v2212_v11, %v2214_v7  ;;  %vm6649_vm7 = vmmov %vm6646_vm9 }
 0x740   : > { %2857 = vmatprep.subr.bf16.mxu1 %v2218_v2  ;;  %3603 = vmatprep.subr.bf16.mxu0 %v2218_v2  ;;  %vm6650_vm2 = vmmov %vm6649_vm7 }
 0x741   : > { %2858 = vmatpush1.bf16.msra.mxu1 %v2217_v20  ;;  %3604 = vmatpush1.bf16.msra.mxu0 %v2217_v20  ;;  %vm6651_vm9 = vmmov %vm6648_vm3 }
 0x742   : > { %v2318_v10 = vpop.permute.xlu0 %2317  ;;  %2859 = vmatprep.subr.bf16.mxu1 %v2252_v43  ;;  %3605 = vmatprep.subr.bf16.mxu0 %v2252_v43  ;;  %v2288_v13 = vsel %vm6651_vm9, %v2278_v21, %v2280_v32 }
 0x743   : > { %v2248_v22 = vpop.permute.xlu1 %2247  ;;  %2847 = vmatmul.mubr.bf16.gmra.mrb[28].mxu1 %v3844_v55 }
 0x744   : > { %3848 = vmatprep.mubr.msk.bf16.mxu1 %vm6648_vm3, %v3839_v54  ;;  %v2253_v62 = vsel %vm6650_vm2, %v2246_v45, %v2248_v22  ;;  %vm6654_vm2 = vcmask 900096  }
 0x745   : > { %2860 = vmatpush1.bf16.msra.mxu1 %v2251_v37  ;;  %3606 = vmatpush1.bf16.msra.mxu0 %v2251_v37  ;;  %vm6655_vm9 = vmmov %vm6654_vm2 }
 0x746   : > { %v2250_v52 = vpop.permute.xlu0 %2249  ;;  %vm6656_vm13 = vmmov %vm6654_vm2 }
 0x747   : > { %v2320_v63 = vpop.permute.xlu1 %2319  ;;  %v2254_v34 = vsel %vm6649_vm7, %v2248_v22, %v2250_v52  ;;  %vm6653_vm7 = vmmov %vm6648_vm3 }
 0x748   : > { %2861 = vmatprep.subr.bf16.mxu1 %v2254_v34  ;;  %3607 = vmatprep.subr.bf16.mxu0 %v2254_v34  ;;  %v2328_v42 = vsel %vm6654_vm2, %v2318_v10, %v2320_v63 }
 0x749   : > { %2862 = vmatpush1.bf16.msra.mxu1 %v2253_v62  ;;  %3608 = vmatpush1.bf16.msra.mxu0 %v2253_v62 }
 0x74a   : > { %v2316_v56 = vpop.permute.xlu0 %2315  ;;  %2863 = vmatprep.subr.bf16.mxu1 %v2288_v13  ;;  %3609 = vmatprep.subr.bf16.mxu0 %v2288_v13 }
 0x74b   : > { %v2284_v58 = vpop.permute.xlu1 %2283  ;;  %v2327_v4 = vsel %vm6655_vm9, %v2316_v56, %v2318_v10 }
 0x74c   : > { %v2289_v33 = vsel %vm6653_vm7, %v2282_v40, %v2284_v58  ;;  %vm6658_vm7 = vcmask 785408  }
 0x74d   : > { %2864 = vmatpush1.bf16.msra.mxu1 %v2287_v16  ;;  %3610 = vmatpush1.bf16.msra.mxu0 %v2287_v16  ;;  %v2462_v16 = vld [vmem:[%s6239_s7 + $0x78] sm:$0xff] }
 0x74e   : > { %v2286_v17 = vpop.permute.xlu0 %2285 }
 0x74f   : > { %v2322_v24 = vpop.permute.xlu1 %2321  ;;  %v2290_v25 = vsel %vm6648_vm3, %v2284_v58, %v2286_v17  ;;  %vm6657_vm3 = vmmov %vm6654_vm2  ;;  %v2458_v58 = vld [vmem:[%s6239_s7 + $0x58] sm:$0xff] }
 0x750   : > { %2865 = vmatprep.subr.bf16.mxu1 %v2290_v25  ;;  %3611 = vmatprep.subr.bf16.mxu0 %v2290_v25  ;;  %vm6659_vm2 = vmmov %vm6658_vm7 }
 0x751   : > { %2866 = vmatpush1.bf16.msra.mxu1 %v2289_v33  ;;  %3612 = vmatpush1.bf16.msra.mxu0 %v2289_v33  ;;  %vm6660_vm9 = vmmov %vm6659_vm2  ;;  %v3838_v33 = vcombine.low %v5903_v5, %v5908_v0 }
 0x752   : > { %v2354_v30 = vpop.permute.xlu0 %2353  ;;  %2867 = vmatprep.subr.bf16.mxu1 %v5640_v49  ;;  %3613 = vmatprep.subr.bf16.mxu0 %v5640_v49 }
 0x753   : > { %v2356_v32 = vpop.permute.xlu1 %2355 }
 0x755   : > { %2868 = vmatpush1.bf16.msra.mxu1 %v5637_v51  ;;  %3614 = vmatpush1.bf16.msra.mxu0 %v5637_v51 }
 0x756   : > { %v2352_v28 = vpop.permute.xlu0 %2351  ;;  %2869 = vmatprep.subr.bf16.mxu1 %v5650_v8  ;;  %3615 = vmatprep.subr.bf16.mxu0 %v5650_v8 }
 0x757   : > { %v2358_v36 = vpop.permute.xlu1 %2357  ;;  %v2363_v21 = vsel %vm6659_vm2, %v2352_v28, %v2354_v30 }
 0x759   : > { %2870 = vmatpush1.bf16.msra.mxu1 %v5648_v46  ;;  %3616 = vmatpush1.bf16.msra.mxu0 %v5648_v46  ;;  %v2364_v46 = vsel %vm6658_vm7, %v2354_v30, %v2356_v32  ;;  %v3847_v30 = vcombine.high %v2458_v58, %v2462_v16  ;;  %v3846_v32 = vcombine.low %v2458_v58, %v2462_v16 }
 0x75a   : > { %v2390_v9 = vpop.permute.xlu0 %2389  ;;  %2871 = vmatprep.subr.bf16.mxu1 %v2328_v42  ;;  %3617 = vmatprep.subr.bf16.mxu0 %v2328_v42 }
 0x75b   : > { %v2324_v49 = vpop.permute.xlu1 %2323 }
 0x75c   : > { %v2329_v8 = vsel %vm6657_vm3, %v2322_v24, %v2324_v49  ;;  %vm6662_vm3 = vcmask 777216  }
 0x75d   : > { %2872 = vmatpush1.bf16.msra.mxu1 %v2327_v4  ;;  %3618 = vmatpush1.bf16.msra.mxu0 %v2327_v4  ;;  %vm6663_vm7 = vmmov %vm6662_vm3 }
 0x75e   : > { %v2326_v51 = vpop.permute.xlu0 %2325 }
 0x75f   : > { %v2392_v1 = vpop.permute.xlu1 %2391  ;;  %v2330_v35 = vsel %vm6656_vm13, %v2324_v49, %v2326_v51  ;;  %vm6661_vm13 = vmmov %vm6659_vm2 }
 0x760   : > { %2873 = vmatprep.subr.bf16.mxu1 %v2330_v35  ;;  %3619 = vmatprep.subr.bf16.mxu0 %v2330_v35  ;;  %v2400_v55 = vsel %vm6662_vm3, %v2390_v9, %v2392_v1  ;;  %vm6664_vm2 = vmmov %vm6662_vm3 }
 0x761   : > { %2874 = vmatpush1.bf16.msra.mxu1 %v2329_v8  ;;  %3620 = vmatpush1.bf16.msra.mxu0 %v2329_v8 }
 0x762   : > { %v2388_v15 = vpop.permute.xlu0 %2387  ;;  %2875 = vmatprep.subr.bf16.mxu1 %v2364_v46  ;;  %3621 = vmatprep.subr.bf16.mxu0 %v2364_v46 }
 0x763   : > { %v2360_v45 = vpop.permute.xlu1 %2359  ;;  %v2399_v43 = vsel %vm6663_vm7, %v2388_v15, %v2390_v9 }
 0x764   : > { %v2365_v2 = vsel %vm6661_vm13, %v2358_v36, %v2360_v45  ;;  %vm6666_vm13 = vcmask 769024  }
 0x765   : > { %2876 = vmatpush1.bf16.msra.mxu1 %v2363_v21  ;;  %3622 = vmatpush1.bf16.msra.mxu0 %v2363_v21  ;;  %vm6667_vm3 = vmmov %vm6666_vm13 }
 0x766   : > { %v2362_v11 = vpop.permute.xlu0 %2361  ;;  %vm6668_vm7 = vmmov %vm6667_vm3 }
 0x767   : > { %v2394_v7 = vpop.permute.xlu1 %2393  ;;  %v2366_v40 = vsel %vm6660_vm9, %v2360_v45, %v2362_v11  ;;  %vm6665_vm9 = vmmov %vm6664_vm2  ;;  %v4064_v11 = vld [vmem:[%s6241_s9 + $0x1c] ss:$44 sps:$4 sm:$0x3f]  }
 0x768   : > { %2877 = vmatprep.subr.bf16.mxu1 %v2366_v40  ;;  %3623 = vmatprep.subr.bf16.mxu0 %v2366_v40 }
 0x769   : > { %2878 = vmatpush1.bf16.msra.mxu1 %v2365_v2  ;;  %3624 = vmatpush1.bf16.msra.mxu0 %v2365_v2 }
 0x76a   : > { %v2426_v20 = vpop.permute.xlu0 %2425  ;;  %2879 = vmatprep.subr.bf16.mxu1 %v2400_v55  ;;  %3625 = vmatprep.subr.bf16.mxu0 %v2400_v55 }
 0x76b   : > { %v2396_v54 = vpop.permute.xlu1 %2395  ;;  %3635 = vmatprep.mubr.bf16.mxu0 %v4064_v11 }
 0x76c   : > { %v2401_v52 = vsel %vm6665_vm9, %v2394_v7, %v2396_v54  ;;  %vm6670_vm9 = vcmask 916480  }
 0x76d   : > { %2880 = vmatpush1.bf16.msra.mxu1 %v2399_v43  ;;  %3626 = vmatpush1.bf16.msra.mxu0 %v2399_v43 }
 0x76e   : > { %v2398_v10 = vpop.permute.xlu0 %2397 }
 0x76f   : > { %v2428_v22 = vpop.permute.xlu1 %2427  ;;  %v2402_v37 = vsel %vm6664_vm2, %v2396_v54, %v2398_v10  ;;  %vm6669_vm2 = vmmov %vm6667_vm3 }
 0x770   : > { %2881 = vmatprep.subr.bf16.mxu1 %v2402_v37  ;;  %3627 = vmatprep.subr.bf16.mxu0 %v2402_v37  ;;  %v2436_v63 = vsel %vm6666_vm13, %v2426_v20, %v2428_v22 }
 0x771   : > { %2882 = vmatpush1.bf16.msra.mxu1 %v2401_v52  ;;  %3628 = vmatpush1.bf16.msra.mxu0 %v2401_v52 }
 0x772   : > { %v2424_v34 = vpop.permute.xlu0 %2423  ;;  %2883 = vmatprep.subr.bf16.mxu1 %v2436_v63  ;;  %3629 = vmatprep.subr.bf16.mxu0 %v2436_v63 }
 0x773   : > { %v2435_v62 = vsel %vm6667_vm3, %v2424_v34, %v2426_v20  ;;  %v2432_v13 = vpop.permute.xlu1 %2431 }
 0x775   : > { %2884 = vmatpush1.bf16.msra.mxu1 %v2435_v62  ;;  %3630 = vmatpush1.bf16.msra.mxu0 %v2435_v62 }
 0x776   : > { %v2434_v56 = vpop.permute.xlu0 %2433 }
 0x777   : > { %v2430_v17 = vpop.permute.xlu1 %2429  ;;  %v2438_v24 = vsel %vm6668_vm7, %v2432_v13, %v2434_v56 }
 0x778   : > { %v2437_v25 = vsel %vm6669_vm2, %v2430_v17, %v2432_v13  ;;  %2885 = vmatprep.subr.bf16.mxu1 %v2438_v24  ;;  %3631 = vmatprep.subr.bf16.mxu0 %v2438_v24 }
 0x779   : > { %2886 = vmatpush1.bf16.msra.mxu1 %v2437_v25  ;;  %3632 = vmatpush1.bf16.msra.mxu0 %v2437_v25 }
 0x77c   : > { %2890 = vmatmul.mubr.bf16.vlgmr.msra.gmra.mrb[24].mxu1 %v3838_v33 }
 0x77d   : > { %3849 = vmatprep.mubr.msk.bf16.mxu1 %vm6670_vm9, %v3847_v30 }
 0x784   : > { %2900 = vmatmul.mubr.bf16.gmra.mrb[28].mxu1 %v3846_v32 }
 0x787   : > { %v2596_v28 = vpop.permute.xlu0 %2595 }
 0x788   : > { %v2601_v49 = vpop.permute.xlu1 %2600 }
 0x78b   : > { %v2606_v7 = vpop.permute.xlu0 %2605 }
 0x78c   : > { %v2611_v22 = vpop.permute.xlu1 %2610 }
 0x84f   : > { %v2891_v36 = vpop.f32.mrb[24].mxu1 }
 0x850   : > { %v3915_v42 = vadd.f32 %v2891_v36, %v2596_v28  ;;  %v2893_v9 = vpop.f32.mrb[25].mxu1 }
 0x851   : > { %v3916_v4 = vadd.f32 %v2893_v9, %v2596_v28  ;;  %v2895_v51 = vpop.f32.mrb[26].mxu1 }
 0x852   : > { %v2918_v1 = vmul.f32 0.01, %v3915_v42  ;;  %v3917_v35 = vadd.f32 %v2895_v51, %v2601_v49  ;;  %v2897_v8 = vpop.f32.mrb[27].mxu1  ;;  %vm2910_vm13 = vcmp.ge.f32.partialorder %v3915_v42, 0.0 }
 0x853   : > { %v2919_v5 = vmul.f32 0.01, %v3916_v4  ;;  %v3918_v0 = vadd.f32 %v2897_v8, %v2601_v49  ;;  %vm2911_vm3 = vcmp.ge.f32.partialorder %v3916_v4, 0.0 }
 0x854   : > { %vm2912_vm7 = vcmp.ge.f32.partialorder %v3917_v35, 0.0  ;;  %v2920_v46 = vmul.f32 0.01, %v3917_v35  ;;  %v2926_v45 = vsel %vm2910_vm13, %v3915_v42, %v2918_v1 }
 0x855   : > { %vm2913_vm2 = vcmp.ge.f32.partialorder %v3918_v0, 0.0  ;;  %v2921_v15 = vmul.f32 0.01, %v3918_v0  ;;  %v2927_v40 = vsel %vm2911_vm3, %v3916_v4, %v2919_v5 }
 0x856   : > { %v2928_v21 = vsel %vm2912_vm7, %v3917_v35, %v2920_v46  ;;  %v4062_v35 = vld [vmem:[%s6241_s9 + $0x18] ss:$44 sps:$4 sm:$0x3f]  }
 0x857   : > { %v5959_v2 = vpack.c.bf16 %v2928_v21, %v2926_v45  ;;  %v2929_v55 = vsel %vm2913_vm2, %v3918_v0, %v2921_v15  ;;  %v2901_v20 = vpop.f32.mrb[28].mxu1  ;;  %vm6671_vm2 = vcmp.ne.s16.totalorder %v6603_v59, 0 }
 0x858   : > { %v5961_v54 = vpack.c.bf16 %v2929_v55, %v2927_v40  ;;  %v3919_v43 = vadd.f32 %v2901_v20, %v2606_v7  ;;  %v2903_v10 = vpop.f32.mrb[29].mxu1 }
 0x859   : > { %v3920_v37 = vadd.f32 %v2903_v10, %v2606_v7  ;;  %v2905_v52 = vpop.f32.mrb[30].mxu1  ;;  %2942 = vrot.lane.b32.xlu0 %v5959_v2, %s4081_s23 }
 0x85a   : > { %v2922_v63 = vmul.f32 0.01, %v3919_v43  ;;  %v3921_v34 = vadd.f32 %v2905_v52, %v2611_v22  ;;  %v2907_v62 = vpop.f32.mrb[31].mxu1  ;;  %2944 = vrot.lane.b32.xlu1 %v5961_v54, %s4081_s23  ;;  %vm2914_vm9 = vcmp.ge.f32.partialorder %v3919_v43, 0.0 }
 0x85b   : > { %v2923_v13 = vmul.f32 0.01, %v3920_v37  ;;  %v3922_v56 = vadd.f32 %v2907_v62, %v2611_v22  ;;  %vm2915_vm13 = vcmp.ge.f32.partialorder %v3920_v37, 0.0 }
 0x85c   : > { %vm2916_vm3 = vcmp.ge.f32.partialorder %v3921_v34, 0.0  ;;  %v2924_v58 = vmul.f32 0.01, %v3921_v34  ;;  %v2930_v17 = vsel %vm2914_vm9, %v3919_v43, %v2922_v63  ;;  %vm6672_vm9 = vcmp.ne.s16.totalorder %v6605_v19, 0 }
 0x85d   : > { %vm2917_vm7 = vcmp.ge.f32.partialorder %v3922_v56, 0.0  ;;  %v2925_v16 = vmul.f32 0.01, %v3922_v56  ;;  %v2931_v25 = vsel %vm2915_vm13, %v3920_v37, %v2923_v13 }
 0x85e   : > { %v2932_v24 = vsel %vm2916_vm3, %v3921_v34, %v2924_v58 }
 0x85f   : > { %v5967_v33 = vpack.c.bf16 %v2932_v24, %v2930_v17  ;;  %v2933_v30 = vsel %vm2917_vm7, %v3922_v56, %v2925_v16  ;;  %vm6684_vm7 = vcmp.ne.s16.totalorder %v6623_v60, 0 }
 0x860   : > { %v5969_v32 = vpack.c.bf16 %v2933_v30, %v2931_v25  ;;  %v3404_v30 = vld [vmem:[%s6242_s10] sm:$0xff] }
 0x861   : > { %2946 = vrot.lane.b32.xlu0 %v5967_v33, %s4081_s23 }
 0x862   : > { %2948 = vrot.lane.b32.xlu1 %v5969_v32, %s4081_s23 }
 0x8cb   : > { %v2943_v28 = vpop.permute.xlu0 %2942 }
 0x8cc   : > { %v5976_v36 = vsel %vm447_vm1, 0, %v2943_v28  ;;  %v2945_v42 = vpop.permute.xlu1 %2944 }
 0x8cd   : > { %v5979_v9 = vsel %vm447_vm1, %v2943_v28, %v2945_v42  ;;  %v5982_v49 = vsel %vm447_vm1, %v2945_v42, 0  ;;  %v2974_v4 = vsel %vm498_vm4, %v5976_v36, 0  ;;  %v2966_v51 = vsel %vm4272_vm5, %v5976_v36, 0 }
 0x8ce   : > { %2986 = vrot.lane.b32.xlu0 %v2974_v4, %s4089_s12  ;;  %3889 = vmatprep.subr.msk.bf16.mxu0 %vm4276_vm6, %v5979_v9  ;;  %v2976_v1 = vsel %vm500_vm8, %v5982_v49, 0  ;;  %v3010_v8 = vsel %vm540_vm11, %v5976_v36, 0  ;;  %v3012_v5 = vsel %vm542_vm10, %v5982_v49, 0  ;;  %v2975_v21 = vsel %vm6671_vm2, %v5979_v9, 0 }
 0x8cf   : > { %2990 = vrot.lane.b32.xlu1 %v2976_v1, %s4089_s12  ;;  %3634 = vmatpush1.bf16.msra.mxu0 %v2966_v51  ;;  %v3048_v7 = vsel %vm584_vm14, %v5982_v49, 0  ;;  %v3011_v40 = vsel %vm6672_vm9, %v5979_v9, 0  ;;  %v3046_v10 = vsel %vm582_vm15, %v5976_v36, 0  ;;  %v3087_v22 = vsel %vm629_vm12, %v5979_v9, 0 }
 0x8d0   : > { %v3159_v13 = vsel %vm6684_vm7, %v5979_v9, 0 }
 0x8d2   : > { %3022 = vrot.lane.b32.xlu0 %v3010_v8, %s4090_s13  ;;  %3636 = vmatmul.mubr.bf16.vlgmr.msra.gmra.mrb[8].mxu0 %v4062_v35 }
 0x8d3   : > { %v2947_v0 = vpop.permute.xlu0 %2946  ;;  %3026 = vrot.lane.b32.xlu1 %v3012_v5, %s4090_s13  ;;  %3678 = vmatprep.mubr.bf16.mxu0 %v4067_v57 }
 0x8d4   : > { %v6010_v46 = vsel %vm447_vm1, 0, %v2947_v0  ;;  %v2949_v15 = vpop.permute.xlu1 %2948 }
 0x8d5   : > { %v6013_v45 = vsel %vm447_vm1, %v2947_v0, %v2949_v15  ;;  %v2968_v11 = vsel %vm4272_vm5, %v6010_v46, 0  ;;  %v2977_v26 = vsel %vm498_vm4, %v6010_v46, 0  ;;  %vm6673_vm5 = vcmp.ne.s16.totalorder %v6607_v38, 0  ;;  %vm6674_vm4 = vmmov %vm6671_vm2 }
 0x8d6   : > { %2988 = vrot.lane.b32.xlu0 %v2975_v21, %s4089_s12  ;;  %3890 = vmatprep.subr.msk.bf16.mxu0 %vm4276_vm6, %v6013_v45  ;;  %v3047_v44 = vsel %vm6673_vm5, %v5979_v9, 0  ;;  %v6041_v55 = vsel %vm447_vm1, %v2949_v15, 0  ;;  %v3013_v20 = vsel %vm540_vm11, %v6010_v46, 0  ;;  %v2978_v43 = vsel %vm6674_vm4, %v6013_v45, 0  ;;  %vm6675_vm1 = vmmov %vm6672_vm9 }
 0x8d7   : > { %3062 = vrot.lane.b32.xlu1 %v3048_v7, %s4091_s14  ;;  %3647 = vmatpush1.bf16.msra.mxu0 %v2968_v11  ;;  %v2979_v12 = vsel %vm500_vm8, %v6041_v55, 0  ;;  %v3049_v61 = vsel %vm582_vm15, %v6010_v46, 0  ;;  %v3015_v39 = vsel %vm542_vm10, %v6041_v55, 0  ;;  %v3014_v59 = vsel %vm6675_vm1, %v6013_v45, 0  ;;  %vm6677_vm8 = vmmov %vm6673_vm5 }
 0x8d8   : > { %vm6676_vm6 = vcmp.ne.s16.totalorder %v6612_v31, 0  ;;  %v3051_v50 = vsel %vm584_vm14, %v6041_v55, 0  ;;  %v3050_v19 = vsel %vm6677_vm8, %v6013_v45, 0  ;;  %vm6678_vm10 = vcmp.ne.s16.totalorder %v6614_v27, 0  ;;  %vm6690_vm4 = vmmov %vm6684_vm7 }
 0x8d9   : > { %v3088_v14 = vsel %vm6676_vm6, %v5982_v49, 0  ;;  %v3086_v37 = vsel %vm6678_vm10, %v5976_v36, 0  ;;  %vm6679_vm11 = vmmov %vm6678_vm10  ;;  %vm6680_vm14 = vcmp.ne.s16.totalorder %v6617_v53, 0  ;;  %v3124_v38 = vsel %vm672_vm0, %v5982_v49, 0 }
 0x8da   : > { %3024 = vrot.lane.b32.xlu0 %v3011_v40, %s4090_s13  ;;  %v3089_v52 = vsel %vm6679_vm11, %v6010_v46, 0  ;;  %v3123_v41 = vsel %vm6680_vm14, %v5979_v9, 0  ;;  %vm6681_vm15 = vcmp.ne.s16.totalorder %v6620_v29, 0  ;;  %vm6683_vm3 = vmmov %vm6676_vm6  ;;  %v3090_v62 = vsel %vm629_vm12, %v6013_v45, 0 }
 0x8db   : > { %2992 = vrot.lane.b32.xlu1 %v2977_v26, %s4089_s12  ;;  %v3122_v63 = vsel %vm6681_vm15, %v5976_v36, 0  ;;  %vm6682_vm13 = vmmov %vm6681_vm15  ;;  %v3091_v34 = vsel %vm6683_vm3, %v6041_v55, 0  ;;  %vm6685_vm2 = vcmp.ne.s16.totalorder %v6626_v47, 0  ;;  %v3127_v31 = vsel %vm672_vm0, %v6041_v55, 0 }
 0x8dc   : > { %v3125_v27 = vsel %vm6682_vm13, %v6010_v46, 0  ;;  %v3160_v29 = vsel %vm6685_vm2, %v5982_v49, 0  ;;  %vm6686_vm12 = vmmov %vm6680_vm14  ;;  %vm6687_vm9 = vcmp.ne.s16.totalorder %v6628_v18, 0  ;;  %v3162_v16 = vsel %vm6690_vm4, %v6013_v45, 0 }
 0x8dd   : > { %v3126_v23 = vsel %vm6686_vm12, %v6013_v45, 0  ;;  %v3158_v56 = vsel %vm6687_vm9, %v5976_v36, 0  ;;  %vm6688_vm5 = vmmov %vm6687_vm9  ;;  %vm6691_vm1 = vcmp.ne.s16.totalorder %v6632_v6, 0  ;;  %vm6692_vm6 = vcmp.ne.s16.totalorder %v6636_v48, 0  ;;  %v3405_v6 = vld [vmem:[%s6242_s10 + $0x8] sm:$0xf] }
 0x8de   : > { %3060 = vrot.lane.b32.xlu0 %v3047_v44, %s4091_s14  ;;  %v3161_v58 = vsel %vm6688_vm5, %v6010_v46, 0  ;;  %vm6689_vm0 = vmmov %vm6685_vm2  ;;  %v3195_v18 = vsel %vm6691_vm1, %v5979_v9, 0  ;;  %v3196_v17 = vsel %vm6692_vm6, %v5982_v49, 0  ;;  %vm6693_vm8 = vcmp.ne.s16.totalorder %v6638_v3, 0 }
 0x8df   : > { %3028 = vrot.lane.b32.xlu1 %v3013_v20, %s4090_s13  ;;  %v3163_v53 = vsel %vm6689_vm0, %v6041_v55, 0  ;;  %v3194_v47 = vsel %vm6693_vm8, %v5976_v36, 0  ;;  %vm6694_vm10 = vmmov %vm6691_vm1  ;;  %vm6697_vm15 = vcmask 1039360   ;;  %vm6701_vm2 = vcmask 1031168  }
 0x8e0   : > { %v3198_v60 = vsel %vm6694_vm10, %v6013_v45, 0  ;;  %vm6695_vm11 = vmmov %vm6692_vm6  ;;  %vm6705_vm0 = vcmask 916480  }
 0x8e1   : > { %v3199_v24 = vsel %vm6695_vm11, %v6041_v55, 0  ;;  %vm6696_vm14 = vmmov %vm6693_vm8  ;;  %vm6709_vm8 = vcmask 900096  }
 0x8e2   : > { %2996 = vrot.lane.b32.xlu0 %v2979_v12, %s4089_s12  ;;  %v3197_v25 = vsel %vm6696_vm14, %v6010_v46, 0  ;;  %vm6698_vm13 = vmmov %vm6697_vm15 }
 0x8e3   : > { %2994 = vrot.lane.b32.xlu1 %v2978_v43, %s4089_s12  ;;  %vm6699_vm3 = vmmov %vm6698_vm13 }
 0x8e4   : > { %vm6700_vm7 = vmmov %vm6699_vm3 }
 0x8e5   : > { %vm6702_vm12 = vmmov %vm6701_vm2 }
 0x8e6   : > { %3058 = vrot.lane.b32.xlu0 %v3046_v10, %s4091_s14  ;;  %vm6703_vm9 = vmmov %vm6701_vm2 }
 0x8e7   : > { %3064 = vrot.lane.b32.xlu1 %v3049_v61, %s4091_s14  ;;  %vm6704_vm5 = vmmov %vm6701_vm2 }
 0x8e8   : > { %vm6706_vm4 = vmmov %vm6705_vm0 }
 0x8e9   : > { %vm6707_vm1 = vmmov %vm6705_vm0 }
 0x8ea   : > { %3032 = vrot.lane.b32.xlu0 %v3015_v39, %s4090_s13  ;;  %vm6708_vm6 = vmmov %vm6705_vm0 }
 0x8eb   : > { %3030 = vrot.lane.b32.xlu1 %v3014_v59, %s4090_s13  ;;  %vm6710_vm10 = vmmov %vm6709_vm8 }
 0x8ec   : > { %vm6711_vm11 = vmmov %vm6709_vm8 }
 0x8ed   : > { %vm6712_vm14 = vmmov %vm6709_vm8 }
 0x8ee   : > { %3100 = vrot.lane.b32.xlu0 %v3087_v22, %s4092_s15 }
 0x8ef   : > { %3102 = vrot.lane.b32.xlu1 %v3088_v14, %s4092_s15 }
 0x8f2   : > { %3068 = vrot.lane.b32.xlu0 %v3051_v50, %s4091_s14 }
 0x8f3   : > { %3066 = vrot.lane.b32.xlu1 %v3050_v19, %s4091_s14 }
 0x8f6   : > { %3098 = vrot.lane.b32.xlu0 %v3086_v37, %s4092_s15 }
 0x8f7   : > { %3104 = vrot.lane.b32.xlu1 %v3089_v52, %s4092_s15 }
 0x8fa   : > { %3136 = vrot.lane.b32.xlu0 %v3123_v41, %s4093_s16 }
 0x8fb   : > { %3138 = vrot.lane.b32.xlu1 %v3124_v38, %s4093_s16 }
 0x8fe   : > { %3134 = vrot.lane.b32.xlu0 %v3122_v63, %s4093_s16 }
 0x8ff   : > { %3140 = vrot.lane.b32.xlu1 %v3125_v27, %s4093_s16 }
 0x902   : > { %3108 = vrot.lane.b32.xlu0 %v3091_v34, %s4092_s15 }
 0x903   : > { %3106 = vrot.lane.b32.xlu1 %v3090_v62, %s4092_s15 }
 0x906   : > { %3172 = vrot.lane.b32.xlu0 %v3159_v13, %s4094_s19 }
 0x907   : > { %3174 = vrot.lane.b32.xlu1 %v3160_v29, %s4094_s19 }
 0x90a   : > { %3144 = vrot.lane.b32.xlu0 %v3127_v31, %s4093_s16 }
 0x90b   : > { %3142 = vrot.lane.b32.xlu1 %v3126_v23, %s4093_s16 }
 0x90e   : > { %3170 = vrot.lane.b32.xlu0 %v3158_v56, %s4094_s19 }
 0x90f   : > { %3176 = vrot.lane.b32.xlu1 %v3161_v58, %s4094_s19 }
 0x912   : > { %3180 = vrot.lane.b32.xlu0 %v3163_v53, %s4094_s19 }
 0x913   : > { %3178 = vrot.lane.b32.xlu1 %v3162_v16, %s4094_s19 }
 0x916   : > { %3208 = vrot.lane.b32.xlu0 %v3195_v18, %s4095_s24 }
 0x917   : > { %3210 = vrot.lane.b32.xlu1 %v3196_v17, %s4095_s24 }
 0x91a   : > { %3206 = vrot.lane.b32.xlu0 %v3194_v47, %s4095_s24 }
 0x91b   : > { %3214 = vrot.lane.b32.xlu1 %v3198_v60, %s4095_s24 }
 0x91e   : > { %3216 = vrot.lane.b32.xlu0 %v3199_v24, %s4095_s24 }
 0x91f   : > { %3212 = vrot.lane.b32.xlu1 %v3197_v25, %s4095_s24 }
 0x922   : > { %3408 = vperm.xlu0 %4013, %v3404_v30  }
 0x923   : > { %3413 = vperm.xlu1 %4012, %v3405_v6  }
 0x940   : > { %v2987_v48 = vpop.permute.xlu0 %2986 }
 0x941   : > { %v2991_v28 = vpop.permute.xlu1 %2990 }
 0x944   : > { %v3023_v36 = vpop.permute.xlu0 %3022 }
 0x945   : > { %v3027_v42 = vpop.permute.xlu1 %3026 }
 0x948   : > { %v2989_v9 = vpop.permute.xlu0 %2988 }
 0x949   : > { %v2998_v3 = vsel %vm6697_vm15, %v2987_v48, %v2989_v9  ;;  %v3063_v49 = vpop.permute.xlu1 %3062  ;;  %v2999_v4 = vsel %vm6698_vm13, %v2989_v9, %v2991_v28  ;;  %vm6713_vm15 = vcmask 785408  }
 0x94a   : > { %3648 = vmatprep.subr.bf16.mxu0 %v2999_v4  ;;  %vm6714_vm13 = vmmov %vm6713_vm15  ;;  %v6725_v4 = vmov 0  }
 0x94b   : > { %3649 = vmatpush1.bf16.msra.mxu0 %v2998_v3 }
 0x94c   : > { %v3025_v51 = vpop.permute.xlu0 %3024 }
 0x94d   : > { %v2993_v1 = vpop.permute.xlu1 %2992  ;;  %v3035_v21 = vsel %vm6701_vm2, %v3025_v51, %v3027_v42  ;;  %v3034_v7 = vsel %vm6702_vm12, %v3023_v36, %v3025_v51  ;;  %vm6717_vm2 = vcmask 777216   ;;  %v4065_v36 = vld [vmem:[%s6241_s9 + $0x20] ss:$44 sps:$4 sm:$0x3f]  }
 0x94e   : > { %vm6718_vm12 = vmmov %vm6717_vm2  ;;  %v4068_v51 = vld [vmem:[%s6241_s9 + $0x28] ss:$44 sps:$4 sm:$0x3f]  }
 0x950   : > { %v3061_v35 = vpop.permute.xlu0 %3060 }
 0x951   : > { %v3029_v8 = vpop.permute.xlu1 %3028  ;;  %v3071_v12 = vsel %vm6705_vm0, %v3061_v35, %v3063_v49  ;;  %vm6721_vm0 = vcmask 769024  }
 0x954   : > { %v2997_v5 = vpop.permute.xlu0 %2996 }
 0x955   : > { %v2995_v0 = vpop.permute.xlu1 %2994 }
 0x956   : > { %v3000_v46 = vsel %vm6699_vm3, %v2993_v1, %v2995_v0  ;;  %v3001_v15 = vsel %vm6700_vm7, %v2995_v0, %v2997_v5  ;;  %vm6715_vm3 = vmmov %vm6714_vm13 }
 0x957   : > { %3650 = vmatprep.subr.bf16.mxu0 %v3001_v15  ;;  %vm6716_vm7 = vmmov %vm6715_vm3 }
 0x958   : > { %v3059_v45 = vpop.permute.xlu0 %3058  ;;  %3651 = vmatpush1.bf16.msra.mxu0 %v3000_v46 }
 0x959   : > { %3652 = vmatprep.subr.bf16.mxu0 %v3035_v21  ;;  %v3065_v11 = vpop.permute.xlu1 %3064  ;;  %v3070_v10 = vsel %vm6706_vm4, %v3059_v45, %v3061_v35  ;;  %vm6722_vm4 = vmmov %vm6721_vm0 }
 0x95c   : > { %v3033_v40 = vpop.permute.xlu0 %3032  ;;  %3653 = vmatpush1.bf16.msra.mxu0 %v3034_v7 }
 0x95d   : > { %v3031_v26 = vpop.permute.xlu1 %3030 }
 0x95e   : > { %v3036_v44 = vsel %vm6703_vm9, %v3029_v8, %v3031_v26  ;;  %v3037_v55 = vsel %vm6704_vm5, %v3031_v26, %v3033_v40  ;;  %vm6719_vm9 = vmmov %vm6717_vm2 }
 0x95f   : > { %3654 = vmatprep.subr.bf16.mxu0 %v3037_v55  ;;  %vm6720_vm5 = vmmov %vm6717_vm2 }
 0x960   : > { %v3101_v20 = vpop.permute.xlu0 %3100  ;;  %3655 = vmatpush1.bf16.msra.mxu0 %v3036_v44 }
 0x961   : > { %3656 = vmatprep.subr.bf16.mxu0 %v3071_v12  ;;  %v3103_v43 = vpop.permute.xlu1 %3102 }
 0x962   : > { %v3111_v41 = vsel %vm6709_vm8, %v3101_v20, %v3103_v43  ;;  %vm6726_vm8 = vcmask 130048  }
 0x964   : > { %v3069_v61 = vpop.permute.xlu0 %3068  ;;  %3657 = vmatpush1.bf16.msra.mxu0 %v3070_v10 }
 0x965   : > { %v3067_v39 = vpop.permute.xlu1 %3066 }
 0x966   : > { %v3072_v59 = vsel %vm6707_vm1, %v3065_v11, %v3067_v39  ;;  %v3073_v22 = vsel %vm6708_vm6, %v3067_v39, %v3069_v61  ;;  %vm6723_vm1 = vmmov %vm6721_vm0 }
 0x967   : > { %3658 = vmatprep.subr.bf16.mxu0 %v3073_v22  ;;  %vm6724_vm6 = vmmov %vm6721_vm0 }
 0x968   : > { %v3099_v14 = vpop.permute.xlu0 %3098  ;;  %3659 = vmatpush1.bf16.msra.mxu0 %v3072_v59 }
 0x969   : > { %3660 = vmatprep.subr.bf16.mxu0 %v5961_v54  ;;  %v3105_v50 = vpop.permute.xlu1 %3104  ;;  %v3110_v63 = vsel %vm6710_vm10, %v3099_v14, %v3101_v20 }
 0x96c   : > { %v3137_v19 = vpop.permute.xlu0 %3136  ;;  %3661 = vmatpush1.bf16.msra.mxu0 %v5959_v2 }
 0x96d   : > { %3662 = vmatprep.subr.bf16.mxu0 %v5969_v32  ;;  %v3139_v37 = vpop.permute.xlu1 %3138 }
 0x96e   : > { %v3147_v32 = vsel %vm6713_vm15, %v3137_v19, %v3139_v37 }
 0x970   : > { %v3135_v52 = vpop.permute.xlu0 %3134  ;;  %3663 = vmatpush1.bf16.msra.mxu0 %v5967_v33 }
 0x971   : > { %3664 = vmatprep.subr.bf16.mxu0 %v3111_v41  ;;  %v3141_v38 = vpop.permute.xlu1 %3140  ;;  %v3146_v13 = vsel %vm6714_vm13, %v3135_v52, %v3137_v19 }
 0x974   : > { %v3109_v27 = vpop.permute.xlu0 %3108  ;;  %3665 = vmatpush1.bf16.msra.mxu0 %v3110_v63 }
 0x975   : > { %v3107_v34 = vpop.permute.xlu1 %3106 }
 0x976   : > { %v3112_v54 = vsel %vm6711_vm11, %v3105_v50, %v3107_v34  ;;  %v3113_v62 = vsel %vm6712_vm14, %v3107_v34, %v3109_v27 }
 0x977   : > { %3666 = vmatprep.subr.bf16.mxu0 %v3113_v62 }
 0x978   : > { %v3173_v2 = vpop.permute.xlu0 %3172  ;;  %3667 = vmatpush1.bf16.msra.mxu0 %v3112_v54 }
 0x979   : > { %3668 = vmatprep.subr.bf16.mxu0 %v3147_v32  ;;  %v3175_v33 = vpop.permute.xlu1 %3174 }
 0x97a   : > { %v3183_v57 = vsel %vm6717_vm2, %v3173_v2, %v3175_v33 }
 0x97c   : > { %v3145_v29 = vpop.permute.xlu0 %3144  ;;  %3669 = vmatpush1.bf16.msra.mxu0 %v3146_v13 }
 0x97d   : > { %v3143_v31 = vpop.permute.xlu1 %3142 }
 0x97e   : > { %v3148_v23 = vsel %vm6715_vm3, %v3141_v38, %v3143_v31  ;;  %v3149_v56 = vsel %vm6716_vm7, %v3143_v31, %v3145_v29 }
 0x97f   : > { %3670 = vmatprep.subr.bf16.mxu0 %v3149_v56 }
 0x980   : > { %v3171_v58 = vpop.permute.xlu0 %3170  ;;  %3671 = vmatpush1.bf16.msra.mxu0 %v3148_v23 }
 0x981   : > { %3672 = vmatprep.subr.bf16.mxu0 %v3183_v57  ;;  %v3177_v53 = vpop.permute.xlu1 %3176  ;;  %v3182_v16 = vsel %vm6718_vm12, %v3171_v58, %v3173_v2 }
 0x984   : > { %v3181_v18 = vpop.permute.xlu0 %3180  ;;  %3673 = vmatpush1.bf16.msra.mxu0 %v3182_v16 }
 0x985   : > { %v3179_v17 = vpop.permute.xlu1 %3178 }
 0x986   : > { %v3184_v47 = vsel %vm6719_vm9, %v3177_v53, %v3179_v17  ;;  %v3185_v60 = vsel %vm6720_vm5, %v3179_v17, %v3181_v18 }
 0x987   : > { %3674 = vmatprep.subr.bf16.mxu0 %v3185_v60 }
 0x988   : > { %v3209_v24 = vpop.permute.xlu0 %3208  ;;  %3675 = vmatpush1.bf16.msra.mxu0 %v3184_v47 }
 0x989   : > { %v3211_v25 = vpop.permute.xlu1 %3210 }
 0x98a   : > { %v3219_v30 = vsel %vm6721_vm0, %v3209_v24, %v3211_v25 }
 0x98b   : > { %3676 = vmatprep.subr.bf16.mxu0 %v3219_v30 }
 0x98c   : > { %v3207_v6 = vpop.permute.xlu0 %3206 }
 0x98d   : > { %v3218_v48 = vsel %vm6722_vm4, %v3207_v6, %v3209_v24  ;;  %v3215_v28 = vpop.permute.xlu1 %3214 }
 0x98e   : > { %3677 = vmatpush1.bf16.msra.mxu0 %v3218_v48 }
 0x990   : > { %v3217_v42 = vpop.permute.xlu0 %3216 }
 0x991   : > { %3679 = vmatmul.mubr.bf16.vlgmr.msra.gmra.mrb[8].mxu0 %v4065_v36  ;;  %v3213_v9 = vpop.permute.xlu1 %3212  ;;  %v3221_v3 = vsel %vm6723_vm1, %v3215_v28, %v3217_v42 }
 0x992   : > { %v3220_v49 = vsel %vm6724_vm6, %v3213_v9, %v3215_v28  ;;  %3689 = vmatprep.subr.bf16.mxu0 %v3221_v3  ;;  %3721 = vmatprep.mubr.bf16.mxu0 %v6725_v4 }
 0x993   : > { %3690 = vmatpush1.bf16.msra.mxu0 %v3220_v49 }
 0x99d   : > { %3861 = vmatmul.mubr.msk.bf16.vlgmr.msra.gmra.mrb[8].mxu0 %vm6726_vm8, %v4068_v51 }
 0x9a1   : > { %v3409_v1 = vpop.permute.xlu0 %3408 }
 0x9a2   : > { %v3414_v0 = vpop.permute.xlu1 %3413 }
 0xa70   : > { %v3723_v35 = vpop.f32.mrb[8].mxu0 }
 0xa71   : > { %v3923_v8 = vadd.f32 %v3723_v35, %v3409_v1  ;;  %v3725_v5 = vpop.f32.mrb[9].mxu0 }
 0xa72   : > { %v3924_v46 = vadd.f32 %v3725_v5, %v3409_v1  ;;  %v3727_v15 = vpop.f32.mrb[10].mxu0 }
 0xa73   : > { %3732 = vst [vmem:[%s386_s25] sm:$0xff] %v3923_v8  ;;  %v3925_v45 = vadd.f32 %v3727_v15, %v3414_v0  ;;  %v3729_v21 = vpop.f32.mrb[11].mxu0 }
 0xa74   : > { %3733 = vst [vmem:[%s386_s25 + $0x8] sm:$0xff] %v3924_v46  ;;  %v3926_v11 = vadd.f32 %v3729_v21, %v3414_v0 }
 0xa75   : > { %3734 = vst [vmem:[%s386_s25 + $0x10] sm:$0xf] %v3925_v45 }
 0xa76   : > { %3735 = vst [vmem:[%s386_s25 + $0x18] sm:$0xf] %v3926_v11 }
 0xa77 PF: > { %s21_s17 = sadd.s32 1, %s4077_s17  }
 0xa78   : > { %p18_p4 = scmp.ge.s32.totalorder %s21_s17, 4  }
 0xa7a   :  { %20 = sbr.rel (!%p18_p4) target bundleno = 1 (0x1), region = 94 }

</bundles_post_ra>
